<compile_context>
chip_gen: v7x
topology: tpu7x:2x2x1
jax: 0.10.0
libtpu: 0.0.40
codegen_flags: <defaults>
</compile_context>

<pallas_src>
import functools
import math

import jax
import jax.numpy as jnp
from jax.experimental import pallas as pl
from jax.experimental.pallas import tpu as pltpu

LN_EPS = 1e-5

# per-layer stacked weight ordering shared by wrapper and kernel
_WEIGHT_KEYS = ("wq", "bq", "wk", "bk", "wv", "bv", "wo", "bo", "ag", "ab",
                "w1", "b1", "w2", "b2", "fg", "fb")


# ---------------------------------------------------------------------------
# in-kernel helpers
# ---------------------------------------------------------------------------
def _layer_norm(x, gamma, beta):
    mu = jnp.mean(x, axis=-1, keepdims=True)
    var = jnp.mean((x - mu) ** 2, axis=-1, keepdims=True)
    return (x - mu) * jax.lax.rsqrt(var + LN_EPS) * gamma + beta


def _attn_ln_block(x_q, x_kv, l, wq_r, bq_r, wk_r, bk_r, wv_r, bv_r,
                   wo_r, bo_r, g_r, b_r, num_heads):
    """Post-LN multi-head attention block: LN(x_q + MHA(x_q, x_kv))."""
    Lq, D = x_q.shape
    dh = D // num_heads
    scale = 1.0 / math.sqrt(dh)

    y = jnp.zeros((Lq, D), jnp.float32)
    for h in range(num_heads):          # static loop over heads
        lo, hi = h * dh, (h + 1) * dh
        # static Ref slices of the weights (no value-level lane slicing)
        qh = (jnp.dot(x_q, wq_r[l, :, lo:hi], preferred_element_type=jnp.float32)
              + bq_r[l, :, lo:hi]) * scale
        kh = (jnp.dot(x_kv, wk_r[l, :, lo:hi], preferred_element_type=jnp.float32)
              + bk_r[l, :, lo:hi])
        vh = (jnp.dot(x_kv, wv_r[l, :, lo:hi], preferred_element_type=jnp.float32)
              + bv_r[l, :, lo:hi])
        s = jnp.dot(qh, kh.T, preferred_element_type=jnp.float32)
        s = s - jnp.max(s, axis=-1, keepdims=True)
        p = jnp.exp(s)
        p = p * pl.reciprocal(jnp.sum(p, axis=-1, keepdims=True), approx=True)
        oh = jnp.dot(p, vh, preferred_element_type=jnp.float32)
        # accumulate the output projection per head (row slice of wo);
        # equivalent to concat(heads) @ Wo without any lane-dim reassembly.
        y = y + jnp.dot(oh, wo_r[l, lo:hi, :], preferred_element_type=jnp.float32)
    y = y + bo_r[l]
    return _layer_norm(x_q + y, g_r[l], b_r[l])


def _ffn_ln_block(x, l, w1_r, b1_r, w2_r, b2_r, g_r, b_r):
    """Post-LN feed-forward block: LN(x + W2 relu(W1 x + b1) + b2)."""
    h = jnp.dot(x, w1_r[l], preferred_element_type=jnp.float32) + b1_r[l]
    h = jnp.maximum(h, 0.0)
    y = jnp.dot(h, w2_r[l], preferred_element_type=jnp.float32) + b2_r[l]
    return _layer_norm(x + y, g_r[l], b_r[l])


# ---------------------------------------------------------------------------
# fused forward kernel (one grid step == one batch element)
# ---------------------------------------------------------------------------
def _rbd_plm_kernel(num_heads, n_inter, n_combined, L, NL, use_pos,
                    feat_ref, lab_ref, pos_ref,
                    i_wq, i_bq, i_wk, i_bk, i_wv, i_bv, i_wo, i_bo, i_ag, i_ab,
                    i_w1, i_b1, i_w2, i_b2, i_fg, i_fb,
                    c_wq, c_bq, c_wk, c_bk, c_wv, c_bv, c_wo, c_bo, c_ag, c_ab,
                    c_w1, c_b1, c_w2, c_b2, c_fg, c_fb,
                    lni_g, lni_b, pool_w, pool_b,
                    out_ref, emb_ref):
    feat = feat_ref[0]                              # (L, D)
    if use_pos:
        feat = feat + pos_ref[...]                  # positional embedding add fused in
    lab = lab_ref[0]                                # (NL, D)

    # inter-attention layers: labels cross-attend to features (features unchanged)
    for l in range(n_inter):
        lab = _attn_ln_block(lab, feat, l, i_wq, i_bq, i_wk, i_bk, i_wv, i_bv,
                             i_wo, i_bo, i_ag, i_ab, num_heads)
        lab = _ffn_ln_block(lab, l, i_w1, i_b1, i_w2, i_b2, i_fg, i_fb)

    # "concat" into adjacent (sublane-aligned) row ranges of the VMEM scratch,
    # then the intermediate LayerNorm over the concatenated sequence.
    emb_ref[0:L, :] = feat
    emb_ref[L:L + NL, :] = lab
    emb = _layer_norm(emb_ref[...], lni_g[...], lni_b[...])    # (L+NL, D)

    # combined self-attention layers
    for l in range(n_combined):
        emb = _attn_ln_block(emb, emb, l, c_wq, c_bq, c_wk, c_bk, c_wv, c_bv,
                             c_wo, c_bo, c_ag, c_ab, num_heads)
        emb = _ffn_ln_block(emb, l, c_w1, c_b1, c_w2, c_b2, c_fg, c_fb)

    # element-wise pooling head (kernel epilogue)
    lab_final = emb[L:L + NL, :]                                   # (NL, D)
    scores = jnp.sum(lab_final * pool_w[...], axis=-1, keepdims=True) + pool_b[...]  # (NL, 1)
    out_ref[0] = scores.T                                          # (1, NL)


# ---------------------------------------------------------------------------
# Parameter construction (deterministic, PyTorch-style uniform init),
# per-layer weights stacked along a leading layer dimension.
# ---------------------------------------------------------------------------
def init_params(key, cfg):
    D, H, NL = cfg["emb_dim"], cfg["hidden"], cfg["num_labels"]
    NI, NC = cfg["inter_attn_layers"], cfg["combined_attn_layers"]
    keys = iter(jax.random.split(key, 512))

    def u(shape, stdv):
        return jax.random.uniform(next(keys), shape, jnp.float32, -stdv, stdv)

    s = 1.0 / math.sqrt(D)
    sh = 1.0 / math.sqrt(H)

    def block_stack(n):
        return dict(
            wq=u((n, D, D), s), bq=u((n, 1, D), s),
            wk=u((n, D, D), s), bk=u((n, 1, D), s),
            wv=u((n, D, D), s), bv=u((n, 1, D), s),
            wo=u((n, D, D), s), bo=u((n, 1, D), s),
            ag=jnp.ones((n, 1, D), jnp.float32), ab=jnp.zeros((n, 1, D), jnp.float32),
            w1=u((n, D, H), s), b1=u((n, 1, H), s),
            w2=u((n, H, D), sh), b2=u((n, 1, D), sh),
            fg=jnp.ones((n, 1, D), jnp.float32), fb=jnp.zeros((n, 1, D), jnp.float32),
        )

    return {
        "backbone_emb": u((cfg["input_size"], D), s),
        "label_lt": u((NL, D), s),
        "known_label_lt": u((3, D), s).at[0].set(0.0),     # padding_idx = 0
        "pos_emb": u((cfg["seq_len"], D), s),
        "inter": block_stack(NI),
        "combined": block_stack(NC),
        "ln_inter_g": jnp.ones((1, D), jnp.float32),
        "ln_inter_b": jnp.zeros((1, D), jnp.float32),
        "pool_w": u((NL, D), s),
        "pool_b": u((NL, 1), s),
    }


# ---------------------------------------------------------------------------
# RBD_pLM forward: embedding gathers in JAX, everything else in ONE kernel.
# ---------------------------------------------------------------------------
def rbd_plm_forward(params, src, mask, cfg):
    B, L = src.shape
    NL, D = cfg["num_labels"], cfg["emb_dim"]

    # backbone ('emb'): embedding lookup (data-dependent gather -> XLA)
    features = params["backbone_emb"][src]                              # (B, L, D)

    # label embeddings (+ label-mask-token embeddings when use_lmt)
    label_emb = jnp.broadcast_to(params["label_lt"][None], (B, NL, D))
    if cfg["use_lmt"]:
        lvec = jnp.where(mask == -1, 0, jnp.where(mask == 0, 1, 2)).astype(jnp.int32)
        label_emb = label_emb + params["known_label_lt"][lvec]

    pos = (params["pos_emb"][:L] if cfg["use_pos_enc"]
           else jnp.zeros((L, D), jnp.float32))

    inter, comb = params["inter"], params["combined"]
    weight_args = ([inter[k] for k in _WEIGHT_KEYS]
                   + [comb[k] for k in _WEIGHT_KEYS]
                   + [params["ln_inter_g"], params["ln_inter_b"],
                      params["pool_w"], params["pool_b"]])

    def act_spec(rows):
        return pl.BlockSpec((1, rows, D), lambda b: (b, 0, 0))

    def full_spec(a):
        nd = a.ndim
        return pl.BlockSpec(a.shape, lambda b, _nd=nd: (0,) * _nd)

    in_specs = ([act_spec(L), act_spec(NL), full_spec(pos)]
                + [full_spec(a) for a in weight_args])

    kernel = functools.partial(
        _rbd_plm_kernel, cfg["heads"], cfg["inter_attn_layers"],
        cfg["combined_attn_layers"], L, NL, bool(cfg["use_pos_enc"]))

    # NOTE: at production sizes (D~512+, L~1-2K), cast matmul inputs to bf16 on
    # v6e/v7x and tile L / flash-block the attention for v7x's 64 MiB VMEM.
    out = pl.pallas_call(
        kernel,
        out_shape=jax.ShapeDtypeStruct((B, 1, NL), jnp.float32),
        grid=(B,),
        in_specs=in_specs,
        out_specs=pl.BlockSpec((1, 1, NL), lambda b: (b, 0, 0)),
        scratch_shapes=[pltpu.VMEM((L + NL, D), jnp.float32)],
        compiler_params=pltpu.CompilerParams(dimension_semantics=("parallel",)),
    )(features, label_emb, pos, *weight_args)

    attns = None   # assumed self_attn_block does not return attention weights
    return out[:, 0, :], attns


# ---------------------------------------------------------------------------
# main
# ---------------------------------------------------------------------------
if __name__ == "__main__":
    cfg = dict(
        emb_dim=32, heads=4, hidden=64,          # hdim_expansion = 2
        num_labels=8, input_size=16, seq_len=16,
        use_lmt=True, use_pos_enc=True,
        inter_attn_layers=1, combined_attn_layers=1,
    )

    key = jax.random.PRNGKey(0)
    kp, ks, km = jax.random.split(key, 3)
    params = init_params(kp, cfg)

    B = 2
    src = jax.random.randint(ks, (B, cfg["seq_len"]), 0, cfg["input_size"], dtype=jnp.int32)
    mask = jax.random.randint(km, (B, cfg["num_labels"]), -1, 2, dtype=jnp.int32)  # {-1,0,1}

    fwd = jax.jit(lambda p, s, m: rbd_plm_forward(p, s, m, cfg))
    out, attns = fwd(params, src, mask)
    out = jax.block_until_ready(out)
    assert out.shape == (B, cfg["num_labels"]), out.shape
    print("KERNEL_OK")
</pallas_src>

<mosaic_0001>
module attributes {stable_mosaic.version = 11 : i64} {
  func.func @_rbd_plm_kernel(%arg0: i32, %arg1: memref<1x16x32xf32, #tpu.memory_space<vmem>>, %arg2: memref<1x8x32xf32, #tpu.memory_space<vmem>>, %arg3: memref<16x32xf32, #tpu.memory_space<vmem>>, %arg4: memref<1x32x32xf32, #tpu.memory_space<vmem>>, %arg5: memref<1x1x32xf32, #tpu.memory_space<vmem>>, %arg6: memref<1x32x32xf32, #tpu.memory_space<vmem>>, %arg7: memref<1x1x32xf32, #tpu.memory_space<vmem>>, %arg8: memref<1x32x32xf32, #tpu.memory_space<vmem>>, %arg9: memref<1x1x32xf32, #tpu.memory_space<vmem>>, %arg10: memref<1x32x32xf32, #tpu.memory_space<vmem>>, %arg11: memref<1x1x32xf32, #tpu.memory_space<vmem>>, %arg12: memref<1x1x32xf32, #tpu.memory_space<vmem>>, %arg13: memref<1x1x32xf32, #tpu.memory_space<vmem>>, %arg14: memref<1x32x64xf32, #tpu.memory_space<vmem>>, %arg15: memref<1x1x64xf32, #tpu.memory_space<vmem>>, %arg16: memref<1x64x32xf32, #tpu.memory_space<vmem>>, %arg17: memref<1x1x32xf32, #tpu.memory_space<vmem>>, %arg18: memref<1x1x32xf32, #tpu.memory_space<vmem>>, %arg19: memref<1x1x32xf32, #tpu.memory_space<vmem>>, %arg20: memref<1x32x32xf32, #tpu.memory_space<vmem>>, %arg21: memref<1x1x32xf32, #tpu.memory_space<vmem>>, %arg22: memref<1x32x32xf32, #tpu.memory_space<vmem>>, %arg23: memref<1x1x32xf32, #tpu.memory_space<vmem>>, %arg24: memref<1x32x32xf32, #tpu.memory_space<vmem>>, %arg25: memref<1x1x32xf32, #tpu.memory_space<vmem>>, %arg26: memref<1x32x32xf32, #tpu.memory_space<vmem>>, %arg27: memref<1x1x32xf32, #tpu.memory_space<vmem>>, %arg28: memref<1x1x32xf32, #tpu.memory_space<vmem>>, %arg29: memref<1x1x32xf32, #tpu.memory_space<vmem>>, %arg30: memref<1x32x64xf32, #tpu.memory_space<vmem>>, %arg31: memref<1x1x64xf32, #tpu.memory_space<vmem>>, %arg32: memref<1x64x32xf32, #tpu.memory_space<vmem>>, %arg33: memref<1x1x32xf32, #tpu.memory_space<vmem>>, %arg34: memref<1x1x32xf32, #tpu.memory_space<vmem>>, %arg35: memref<1x1x32xf32, #tpu.memory_space<vmem>>, %arg36: memref<1x32xf32, #tpu.memory_space<vmem>>, %arg37: memref<1x32xf32, #tpu.memory_space<vmem>>, %arg38: memref<8x32xf32, #tpu.memory_space<vmem>>, %arg39: memref<8x1xf32, #tpu.memory_space<vmem>>, %arg40: memref<1x1x8xf32, #tpu.memory_space<vmem>>, %arg41: memref<24x32xf32, #tpu.memory_space<vmem>>) attributes {dimension_semantics = [#tpu.dimension_semantics<parallel>], iteration_bounds = array<i64: 2>, scalar_prefetch = 0 : i64, scratch_operands = 1 : i64, tpu.core_type = #tpu.core_type<tc>, window_params = [{transform_indices = @transform_0, window_bounds = array<i64: 1, 16, 32>}, {transform_indices = @transform_1, window_bounds = array<i64: 1, 8, 32>}, {pipeline_mode = #tpu.pipeline_mode<synchronous>, transform_indices = @transform_2, window_bounds = array<i64: 16, 32>}, {pipeline_mode = #tpu.pipeline_mode<synchronous>, transform_indices = @transform_3, window_bounds = array<i64: 1, 32, 32>}, {pipeline_mode = #tpu.pipeline_mode<synchronous>, transform_indices = @transform_4, window_bounds = array<i64: 1, 1, 32>}, {pipeline_mode = #tpu.pipeline_mode<synchronous>, transform_indices = @transform_5, window_bounds = array<i64: 1, 32, 32>}, {pipeline_mode = #tpu.pipeline_mode<synchronous>, transform_indices = @transform_6, window_bounds = array<i64: 1, 1, 32>}, {pipeline_mode = #tpu.pipeline_mode<synchronous>, transform_indices = @transform_7, window_bounds = array<i64: 1, 32, 32>}, {pipeline_mode = #tpu.pipeline_mode<synchronous>, transform_indices = @transform_8, window_bounds = array<i64: 1, 1, 32>}, {pipeline_mode = #tpu.pipeline_mode<synchronous>, transform_indices = @transform_9, window_bounds = array<i64: 1, 32, 32>}, {pipeline_mode = #tpu.pipeline_mode<synchronous>, transform_indices = @transform_10, window_bounds = array<i64: 1, 1, 32>}, {pipeline_mode = #tpu.pipeline_mode<synchronous>, transform_indices = @transform_11, window_bounds = array<i64: 1, 1, 32>}, {pipeline_mode = #tpu.pipeline_mode<synchronous>, transform_indices = @transform_12, window_bounds = array<i64: 1, 1, 32>}, {pipeline_mode = #tpu.pipeline_mode<synchronous>, transform_indices = @transform_13, window_bounds = array<i64: 1, 32, 64>}, {pipeline_mode = #tpu.pipeline_mode<synchronous>, transform_indices = @transform_14, window_bounds = array<i64: 1, 1, 64>}, {pipeline_mode = #tpu.pipeline_mode<synchronous>, transform_indices = @transform_15, window_bounds = array<i64: 1, 64, 32>}, {pipeline_mode = #tpu.pipeline_mode<synchronous>, transform_indices = @transform_16, window_bounds = array<i64: 1, 1, 32>}, {pipeline_mode = #tpu.pipeline_mode<synchronous>, transform_indices = @transform_17, window_bounds = array<i64: 1, 1, 32>}, {pipeline_mode = #tpu.pipeline_mode<synchronous>, transform_indices = @transform_18, window_bounds = array<i64: 1, 1, 32>}, {pipeline_mode = #tpu.pipeline_mode<synchronous>, transform_indices = @transform_19, window_bounds = array<i64: 1, 32, 32>}, {pipeline_mode = #tpu.pipeline_mode<synchronous>, transform_indices = @transform_20, window_bounds = array<i64: 1, 1, 32>}, {pipeline_mode = #tpu.pipeline_mode<synchronous>, transform_indices = @transform_21, window_bounds = array<i64: 1, 32, 32>}, {pipeline_mode = #tpu.pipeline_mode<synchronous>, transform_indices = @transform_22, window_bounds = array<i64: 1, 1, 32>}, {pipeline_mode = #tpu.pipeline_mode<synchronous>, transform_indices = @transform_23, window_bounds = array<i64: 1, 32, 32>}, {pipeline_mode = #tpu.pipeline_mode<synchronous>, transform_indices = @transform_24, window_bounds = array<i64: 1, 1, 32>}, {pipeline_mode = #tpu.pipeline_mode<synchronous>, transform_indices = @transform_25, window_bounds = array<i64: 1, 32, 32>}, {pipeline_mode = #tpu.pipeline_mode<synchronous>, transform_indices = @transform_26, window_bounds = array<i64: 1, 1, 32>}, {pipeline_mode = #tpu.pipeline_mode<synchronous>, transform_indices = @transform_27, window_bounds = array<i64: 1, 1, 32>}, {pipeline_mode = #tpu.pipeline_mode<synchronous>, transform_indices = @transform_28, window_bounds = array<i64: 1, 1, 32>}, {pipeline_mode = #tpu.pipeline_mode<synchronous>, transform_indices = @transform_29, window_bounds = array<i64: 1, 32, 64>}, {pipeline_mode = #tpu.pipeline_mode<synchronous>, transform_indices = @transform_30, window_bounds = array<i64: 1, 1, 64>}, {pipeline_mode = #tpu.pipeline_mode<synchronous>, transform_indices = @transform_31, window_bounds = array<i64: 1, 64, 32>}, {pipeline_mode = #tpu.pipeline_mode<synchronous>, transform_indices = @transform_32, window_bounds = array<i64: 1, 1, 32>}, {pipeline_mode = #tpu.pipeline_mode<synchronous>, transform_indices = @transform_33, window_bounds = array<i64: 1, 1, 32>}, {pipeline_mode = #tpu.pipeline_mode<synchronous>, transform_indices = @transform_34, window_bounds = array<i64: 1, 1, 32>}, {pipeline_mode = #tpu.pipeline_mode<synchronous>, transform_indices = @transform_35, window_bounds = array<i64: 1, 32>}, {pipeline_mode = #tpu.pipeline_mode<synchronous>, transform_indices = @transform_36, window_bounds = array<i64: 1, 32>}, {pipeline_mode = #tpu.pipeline_mode<synchronous>, transform_indices = @transform_37, window_bounds = array<i64: 8, 32>}, {pipeline_mode = #tpu.pipeline_mode<synchronous>, transform_indices = @transform_38, window_bounds = array<i64: 8, 1>}, {transform_indices = @transform_39, window_bounds = array<i64: 1, 1, 8>}]} {
    %c0 = arith.constant 0 : index
    %c0_0 = arith.constant 0 : index
    %c0_1 = arith.constant 0 : index
    %0 = vector.load %arg1[%c0, %c0_0, %c0_1] : memref<1x16x32xf32, #tpu.memory_space<vmem>>, vector<1x16x32xf32>
    %1 = vector.shape_cast %0 : vector<1x16x32xf32> to vector<16x32xf32>
    %c0_2 = arith.constant 0 : index
    %c0_3 = arith.constant 0 : index
    %2 = vector.load %arg3[%c0_2, %c0_3] : memref<16x32xf32, #tpu.memory_space<vmem>>, vector<16x32xf32>
    %3 = arith.addf %1, %2 : vector<16x32xf32>
    %c0_4 = arith.constant 0 : index
    %c0_5 = arith.constant 0 : index
    %c0_6 = arith.constant 0 : index
    %4 = vector.load %arg2[%c0_4, %c0_5, %c0_6] : memref<1x8x32xf32, #tpu.memory_space<vmem>>, vector<1x8x32xf32>
    %5 = vector.shape_cast %4 : vector<1x8x32xf32> to vector<8x32xf32>
    %cst = arith.constant 0.000000e+00 : f32
    %6 = vector.broadcast %cst : f32 to vector<8x32xf32>
    %c0_7 = arith.constant 0 : index
    %c0_8 = arith.constant 0 : index
    %c0_9 = arith.constant 0 : index
    %7 = vector.load %arg4[%c0_7, %c0_8, %c0_9] : memref<1x32x32xf32, #tpu.memory_space<vmem>>, vector<1x32x8xf32>
    %8 = vector.shape_cast %7 : vector<1x32x8xf32> to vector<32x8xf32>
    %cst_10 = arith.constant dense<0.000000e+00> : vector<8x8xf32>
    %9 = tpu.matmul %5, %8, %cst_10 {dimension_numbers = #tpu.dot_dimension_numbers<[1], [0], [0], [1], [0, 0, 1, 1], [], []>} : vector<8x32xf32>, vector<32x8xf32>, vector<8x8xf32> -> vector<8x8xf32>
    %c0_11 = arith.constant 0 : index
    %c0_12 = arith.constant 0 : index
    %c0_13 = arith.constant 0 : index
    %10 = vector.load %arg5[%c0_11, %c0_12, %c0_13] : memref<1x1x32xf32, #tpu.memory_space<vmem>>, vector<1x1x8xf32>
    %11 = vector.shape_cast %10 : vector<1x1x8xf32> to vector<1x8xf32>
    %12 = vector.broadcast %11 : vector<1x8xf32> to vector<8x8xf32>
    %13 = arith.addf %9, %12 : vector<8x8xf32>
    %cst_14 = arith.constant 0.353553385 : f32
    %14 = vector.broadcast %cst_14 : f32 to vector<8x8xf32>
    %15 = arith.mulf %13, %14 : vector<8x8xf32>
    %c0_15 = arith.constant 0 : index
    %c0_16 = arith.constant 0 : index
    %c0_17 = arith.constant 0 : index
    %16 = vector.load %arg6[%c0_15, %c0_16, %c0_17] : memref<1x32x32xf32, #tpu.memory_space<vmem>>, vector<1x32x8xf32>
    %17 = vector.shape_cast %16 : vector<1x32x8xf32> to vector<32x8xf32>
    %cst_18 = arith.constant dense<0.000000e+00> : vector<16x8xf32>
    %18 = tpu.matmul %3, %17, %cst_18 {dimension_numbers = #tpu.dot_dimension_numbers<[1], [0], [0], [1], [0, 0, 1, 1], [], []>} : vector<16x32xf32>, vector<32x8xf32>, vector<16x8xf32> -> vector<16x8xf32>
    %c0_19 = arith.constant 0 : index
    %c0_20 = arith.constant 0 : index
    %c0_21 = arith.constant 0 : index
    %19 = vector.load %arg7[%c0_19, %c0_20, %c0_21] : memref<1x1x32xf32, #tpu.memory_space<vmem>>, vector<1x1x8xf32>
    %20 = vector.shape_cast %19 : vector<1x1x8xf32> to vector<1x8xf32>
    %21 = vector.broadcast %20 : vector<1x8xf32> to vector<16x8xf32>
    %22 = arith.addf %18, %21 : vector<16x8xf32>
    %c0_22 = arith.constant 0 : index
    %c0_23 = arith.constant 0 : index
    %c0_24 = arith.constant 0 : index
    %23 = vector.load %arg8[%c0_22, %c0_23, %c0_24] : memref<1x32x32xf32, #tpu.memory_space<vmem>>, vector<1x32x8xf32>
    %24 = vector.shape_cast %23 : vector<1x32x8xf32> to vector<32x8xf32>
    %cst_25 = arith.constant dense<0.000000e+00> : vector<16x8xf32>
    %25 = tpu.matmul %3, %24, %cst_25 {dimension_numbers = #tpu.dot_dimension_numbers<[1], [0], [0], [1], [0, 0, 1, 1], [], []>} : vector<16x32xf32>, vector<32x8xf32>, vector<16x8xf32> -> vector<16x8xf32>
    %c0_26 = arith.constant 0 : index
    %c0_27 = arith.constant 0 : index
    %c0_28 = arith.constant 0 : index
    %26 = vector.load %arg9[%c0_26, %c0_27, %c0_28] : memref<1x1x32xf32, #tpu.memory_space<vmem>>, vector<1x1x8xf32>
    %27 = vector.shape_cast %26 : vector<1x1x8xf32> to vector<1x8xf32>
    %28 = vector.broadcast %27 : vector<1x8xf32> to vector<16x8xf32>
    %29 = arith.addf %25, %28 : vector<16x8xf32>
    %30 = tpu.transpose %22, [1, 0] : vector<16x8xf32> -> vector<8x16xf32>
    %cst_29 = arith.constant dense<0.000000e+00> : vector<8x16xf32>
    %31 = tpu.matmul %15, %30, %cst_29 {dimension_numbers = #tpu.dot_dimension_numbers<[1], [0], [0], [1], [0, 0, 1, 1], [], []>} : vector<8x8xf32>, vector<8x16xf32>, vector<8x16xf32> -> vector<8x16xf32>
    %cst_30 = arith.constant dense<0xFF800000> : vector<8xf32>
    %32 = vector.multi_reduction <maximumf>, %31, %cst_30 [1] : vector<8x16xf32> to vector<8xf32>
    %33 = vector.shape_cast %32 : vector<8xf32> to vector<8x1xf32>
    %34 = vector.broadcast %33 : vector<8x1xf32> to vector<8x16xf32>
    %35 = arith.subf %31, %34 : vector<8x16xf32>
    %36 = math.exp %35 : vector<8x16xf32>
    %cst_31 = arith.constant dense<0.000000e+00> : vector<8xf32>
    %37 = vector.multi_reduction <add>, %36, %cst_31 [1] : vector<8x16xf32> to vector<8xf32>
    %38 = vector.shape_cast %37 : vector<8xf32> to vector<8x1xf32>
    %39 = tpu.reciprocal %38 {approx = true} : vector<8x1xf32> -> vector<8x1xf32>
    %40 = vector.broadcast %39 : vector<8x1xf32> to vector<8x16xf32>
    %41 = arith.mulf %36, %40 : vector<8x16xf32>
    %cst_32 = arith.constant dense<0.000000e+00> : vector<8x8xf32>
    %42 = tpu.matmul %41, %29, %cst_32 {dimension_numbers = #tpu.dot_dimension_numbers<[1], [0], [0], [1], [0, 0, 1, 1], [], []>} : vector<8x16xf32>, vector<16x8xf32>, vector<8x8xf32> -> vector<8x8xf32>
    %c0_33 = arith.constant 0 : index
    %c0_34 = arith.constant 0 : index
    %c0_35 = arith.constant 0 : index
    %43 = vector.load %arg10[%c0_33, %c0_34, %c0_35] : memref<1x32x32xf32, #tpu.memory_space<vmem>>, vector<1x8x32xf32>
    %44 = vector.shape_cast %43 : vector<1x8x32xf32> to vector<8x32xf32>
    %cst_36 = arith.constant dense<0.000000e+00> : vector<8x32xf32>
    %45 = tpu.matmul %42, %44, %cst_36 {dimension_numbers = #tpu.dot_dimension_numbers<[1], [0], [0], [1], [0, 0, 1, 1], [], []>} : vector<8x8xf32>, vector<8x32xf32>, vector<8x32xf32> -> vector<8x32xf32>
    %46 = arith.addf %6, %45 : vector<8x32xf32>
    %c0_37 = arith.constant 0 : index
    %c0_38 = arith.constant 0 : index
    %c8 = arith.constant 8 : index
    %47 = vector.load %arg4[%c0_37, %c0_38, %c8] : memref<1x32x32xf32, #tpu.memory_space<vmem>>, vector<1x32x8xf32>
    %48 = vector.shape_cast %47 : vector<1x32x8xf32> to vector<32x8xf32>
    %cst_39 = arith.constant dense<0.000000e+00> : vector<8x8xf32>
    %49 = tpu.matmul %5, %48, %cst_39 {dimension_numbers = #tpu.dot_dimension_numbers<[1], [0], [0], [1], [0, 0, 1, 1], [], []>} : vector<8x32xf32>, vector<32x8xf32>, vector<8x8xf32> -> vector<8x8xf32>
    %c0_40 = arith.constant 0 : index
    %c0_41 = arith.constant 0 : index
    %c8_42 = arith.constant 8 : index
    %50 = vector.load %arg5[%c0_40, %c0_41, %c8_42] : memref<1x1x32xf32, #tpu.memory_space<vmem>>, vector<1x1x8xf32>
    %51 = vector.shape_cast %50 : vector<1x1x8xf32> to vector<1x8xf32>
    %52 = vector.broadcast %51 : vector<1x8xf32> to vector<8x8xf32>
    %53 = arith.addf %49, %52 : vector<8x8xf32>
    %cst_43 = arith.constant 0.353553385 : f32
    %54 = vector.broadcast %cst_43 : f32 to vector<8x8xf32>
    %55 = arith.mulf %53, %54 : vector<8x8xf32>
    %c0_44 = arith.constant 0 : index
    %c0_45 = arith.constant 0 : index
    %c8_46 = arith.constant 8 : index
    %56 = vector.load %arg6[%c0_44, %c0_45, %c8_46] : memref<1x32x32xf32, #tpu.memory_space<vmem>>, vector<1x32x8xf32>
    %57 = vector.shape_cast %56 : vector<1x32x8xf32> to vector<32x8xf32>
    %cst_47 = arith.constant dense<0.000000e+00> : vector<16x8xf32>
    %58 = tpu.matmul %3, %57, %cst_47 {dimension_numbers = #tpu.dot_dimension_numbers<[1], [0], [0], [1], [0, 0, 1, 1], [], []>} : vector<16x32xf32>, vector<32x8xf32>, vector<16x8xf32> -> vector<16x8xf32>
    %c0_48 = arith.constant 0 : index
    %c0_49 = arith.constant 0 : index
    %c8_50 = arith.constant 8 : index
    %59 = vector.load %arg7[%c0_48, %c0_49, %c8_50] : memref<1x1x32xf32, #tpu.memory_space<vmem>>, vector<1x1x8xf32>
    %60 = vector.shape_cast %59 : vector<1x1x8xf32> to vector<1x8xf32>
    %61 = vector.broadcast %60 : vector<1x8xf32> to vector<16x8xf32>
    %62 = arith.addf %58, %61 : vector<16x8xf32>
    %c0_51 = arith.constant 0 : index
    %c0_52 = arith.constant 0 : index
    %c8_53 = arith.constant 8 : index
    %63 = vector.load %arg8[%c0_51, %c0_52, %c8_53] : memref<1x32x32xf32, #tpu.memory_space<vmem>>, vector<1x32x8xf32>
    %64 = vector.shape_cast %63 : vector<1x32x8xf32> to vector<32x8xf32>
    %cst_54 = arith.constant dense<0.000000e+00> : vector<16x8xf32>
    %65 = tpu.matmul %3, %64, %cst_54 {dimension_numbers = #tpu.dot_dimension_numbers<[1], [0], [0], [1], [0, 0, 1, 1], [], []>} : vector<16x32xf32>, vector<32x8xf32>, vector<16x8xf32> -> vector<16x8xf32>
    %c0_55 = arith.constant 0 : index
    %c0_56 = arith.constant 0 : index
    %c8_57 = arith.constant 8 : index
    %66 = vector.load %arg9[%c0_55, %c0_56, %c8_57] : memref<1x1x32xf32, #tpu.memory_space<vmem>>, vector<1x1x8xf32>
    %67 = vector.shape_cast %66 : vector<1x1x8xf32> to vector<1x8xf32>
    %68 = vector.broadcast %67 : vector<1x8xf32> to vector<16x8xf32>
    %69 = arith.addf %65, %68 : vector<16x8xf32>
    %70 = tpu.transpose %62, [1, 0] : vector<16x8xf32> -> vector<8x16xf32>
    %cst_58 = arith.constant dense<0.000000e+00> : vector<8x16xf32>
    %71 = tpu.matmul %55, %70, %cst_58 {dimension_numbers = #tpu.dot_dimension_numbers<[1], [0], [0], [1], [0, 0, 1, 1], [], []>} : vector<8x8xf32>, vector<8x16xf32>, vector<8x16xf32> -> vector<8x16xf32>
    %cst_59 = arith.constant dense<0xFF800000> : vector<8xf32>
    %72 = vector.multi_reduction <maximumf>, %71, %cst_59 [1] : vector<8x16xf32> to vector<8xf32>
    %73 = vector.shape_cast %72 : vector<8xf32> to vector<8x1xf32>
    %74 = vector.broadcast %73 : vector<8x1xf32> to vector<8x16xf32>
    %75 = arith.subf %71, %74 : vector<8x16xf32>
    %76 = math.exp %75 : vector<8x16xf32>
    %cst_60 = arith.constant dense<0.000000e+00> : vector<8xf32>
    %77 = vector.multi_reduction <add>, %76, %cst_60 [1] : vector<8x16xf32> to vector<8xf32>
    %78 = vector.shape_cast %77 : vector<8xf32> to vector<8x1xf32>
    %79 = tpu.reciprocal %78 {approx = true} : vector<8x1xf32> -> vector<8x1xf32>
    %80 = vector.broadcast %79 : vector<8x1xf32> to vector<8x16xf32>
    %81 = arith.mulf %76, %80 : vector<8x16xf32>
    %cst_61 = arith.constant dense<0.000000e+00> : vector<8x8xf32>
    %82 = tpu.matmul %81, %69, %cst_61 {dimension_numbers = #tpu.dot_dimension_numbers<[1], [0], [0], [1], [0, 0, 1, 1], [], []>} : vector<8x16xf32>, vector<16x8xf32>, vector<8x8xf32> -> vector<8x8xf32>
    %c0_62 = arith.constant 0 : index
    %c8_63 = arith.constant 8 : index
    %c0_64 = arith.constant 0 : index
    %83 = vector.load %arg10[%c0_62, %c8_63, %c0_64] : memref<1x32x32xf32, #tpu.memory_space<vmem>>, vector<1x8x32xf32>
    %84 = vector.shape_cast %83 : vector<1x8x32xf32> to vector<8x32xf32>
    %cst_65 = arith.constant dense<0.000000e+00> : vector<8x32xf32>
    %85 = tpu.matmul %82, %84, %cst_65 {dimension_numbers = #tpu.dot_dimension_numbers<[1], [0], [0], [1], [0, 0, 1, 1], [], []>} : vector<8x8xf32>, vector<8x32xf32>, vector<8x32xf32> -> vector<8x32xf32>
    %86 = arith.addf %46, %85 : vector<8x32xf32>
    %c0_66 = arith.constant 0 : index
    %c0_67 = arith.constant 0 : index
    %c16 = arith.constant 16 : index
    %87 = vector.load %arg4[%c0_66, %c0_67, %c16] : memref<1x32x32xf32, #tpu.memory_space<vmem>>, vector<1x32x8xf32>
    %88 = vector.shape_cast %87 : vector<1x32x8xf32> to vector<32x8xf32>
    %cst_68 = arith.constant dense<0.000000e+00> : vector<8x8xf32>
    %89 = tpu.matmul %5, %88, %cst_68 {dimension_numbers = #tpu.dot_dimension_numbers<[1], [0], [0], [1], [0, 0, 1, 1], [], []>} : vector<8x32xf32>, vector<32x8xf32>, vector<8x8xf32> -> vector<8x8xf32>
    %c0_69 = arith.constant 0 : index
    %c0_70 = arith.constant 0 : index
    %c16_71 = arith.constant 16 : index
    %90 = vector.load %arg5[%c0_69, %c0_70, %c16_71] : memref<1x1x32xf32, #tpu.memory_space<vmem>>, vector<1x1x8xf32>
    %91 = vector.shape_cast %90 : vector<1x1x8xf32> to vector<1x8xf32>
    %92 = vector.broadcast %91 : vector<1x8xf32> to vector<8x8xf32>
    %93 = arith.addf %89, %92 : vector<8x8xf32>
    %cst_72 = arith.constant 0.353553385 : f32
    %94 = vector.broadcast %cst_72 : f32 to vector<8x8xf32>
    %95 = arith.mulf %93, %94 : vector<8x8xf32>
    %c0_73 = arith.constant 0 : index
    %c0_74 = arith.constant 0 : index
    %c16_75 = arith.constant 16 : index
    %96 = vector.load %arg6[%c0_73, %c0_74, %c16_75] : memref<1x32x32xf32, #tpu.memory_space<vmem>>, vector<1x32x8xf32>
    %97 = vector.shape_cast %96 : vector<1x32x8xf32> to vector<32x8xf32>
    %cst_76 = arith.constant dense<0.000000e+00> : vector<16x8xf32>
    %98 = tpu.matmul %3, %97, %cst_76 {dimension_numbers = #tpu.dot_dimension_numbers<[1], [0], [0], [1], [0, 0, 1, 1], [], []>} : vector<16x32xf32>, vector<32x8xf32>, vector<16x8xf32> -> vector<16x8xf32>
    %c0_77 = arith.constant 0 : index
    %c0_78 = arith.constant 0 : index
    %c16_79 = arith.constant 16 : index
    %99 = vector.load %arg7[%c0_77, %c0_78, %c16_79] : memref<1x1x32xf32, #tpu.memory_space<vmem>>, vector<1x1x8xf32>
    %100 = vector.shape_cast %99 : vector<1x1x8xf32> to vector<1x8xf32>
    %101 = vector.broadcast %100 : vector<1x8xf32> to vector<16x8xf32>
    %102 = arith.addf %98, %101 : vector<16x8xf32>
    %c0_80 = arith.constant 0 : index
    %c0_81 = arith.constant 0 : index
    %c16_82 = arith.constant 16 : index
    %103 = vector.load %arg8[%c0_80, %c0_81, %c16_82] : memref<1x32x32xf32, #tpu.memory_space<vmem>>, vector<1x32x8xf32>
    %104 = vector.shape_cast %103 : vector<1x32x8xf32> to vector<32x8xf32>
    %cst_83 = arith.constant dense<0.000000e+00> : vector<16x8xf32>
    %105 = tpu.matmul %3, %104, %cst_83 {dimension_numbers = #tpu.dot_dimension_numbers<[1], [0], [0], [1], [0, 0, 1, 1], [], []>} : vector<16x32xf32>, vector<32x8xf32>, vector<16x8xf32> -> vector<16x8xf32>
    %c0_84 = arith.constant 0 : index
    %c0_85 = arith.constant 0 : index
    %c16_86 = arith.constant 16 : index
    %106 = vector.load %arg9[%c0_84, %c0_85, %c16_86] : memref<1x1x32xf32, #tpu.memory_space<vmem>>, vector<1x1x8xf32>
    %107 = vector.shape_cast %106 : vector<1x1x8xf32> to vector<1x8xf32>
    %108 = vector.broadcast %107 : vector<1x8xf32> to vector<16x8xf32>
    %109 = arith.addf %105, %108 : vector<16x8xf32>
    %110 = tpu.transpose %102, [1, 0] : vector<16x8xf32> -> vector<8x16xf32>
    %cst_87 = arith.constant dense<0.000000e+00> : vector<8x16xf32>
    %111 = tpu.matmul %95, %110, %cst_87 {dimension_numbers = #tpu.dot_dimension_numbers<[1], [0], [0], [1], [0, 0, 1, 1], [], []>} : vector<8x8xf32>, vector<8x16xf32>, vector<8x16xf32> -> vector<8x16xf32>
    %cst_88 = arith.constant dense<0xFF800000> : vector<8xf32>
    %112 = vector.multi_reduction <maximumf>, %111, %cst_88 [1] : vector<8x16xf32> to vector<8xf32>
    %113 = vector.shape_cast %112 : vector<8xf32> to vector<8x1xf32>
    %114 = vector.broadcast %113 : vector<8x1xf32> to vector<8x16xf32>
    %115 = arith.subf %111, %114 : vector<8x16xf32>
    %116 = math.exp %115 : vector<8x16xf32>
    %cst_89 = arith.constant dense<0.000000e+00> : vector<8xf32>
    %117 = vector.multi_reduction <add>, %116, %cst_89 [1] : vector<8x16xf32> to vector<8xf32>
    %118 = vector.shape_cast %117 : vector<8xf32> to vector<8x1xf32>
    %119 = tpu.reciprocal %118 {approx = true} : vector<8x1xf32> -> vector<8x1xf32>
    %120 = vector.broadcast %119 : vector<8x1xf32> to vector<8x16xf32>
    %121 = arith.mulf %116, %120 : vector<8x16xf32>
    %cst_90 = arith.constant dense<0.000000e+00> : vector<8x8xf32>
    %122 = tpu.matmul %121, %109, %cst_90 {dimension_numbers = #tpu.dot_dimension_numbers<[1], [0], [0], [1], [0, 0, 1, 1], [], []>} : vector<8x16xf32>, vector<16x8xf32>, vector<8x8xf32> -> vector<8x8xf32>
    %c0_91 = arith.constant 0 : index
    %c16_92 = arith.constant 16 : index
    %c0_93 = arith.constant 0 : index
    %123 = vector.load %arg10[%c0_91, %c16_92, %c0_93] : memref<1x32x32xf32, #tpu.memory_space<vmem>>, vector<1x8x32xf32>
    %124 = vector.shape_cast %123 : vector<1x8x32xf32> to vector<8x32xf32>
    %cst_94 = arith.constant dense<0.000000e+00> : vector<8x32xf32>
    %125 = tpu.matmul %122, %124, %cst_94 {dimension_numbers = #tpu.dot_dimension_numbers<[1], [0], [0], [1], [0, 0, 1, 1], [], []>} : vector<8x8xf32>, vector<8x32xf32>, vector<8x32xf32> -> vector<8x32xf32>
    %126 = arith.addf %86, %125 : vector<8x32xf32>
    %c0_95 = arith.constant 0 : index
    %c0_96 = arith.constant 0 : index
    %c24 = arith.constant 24 : index
    %127 = vector.load %arg4[%c0_95, %c0_96, %c24] : memref<1x32x32xf32, #tpu.memory_space<vmem>>, vector<1x32x8xf32>
    %128 = vector.shape_cast %127 : vector<1x32x8xf32> to vector<32x8xf32>
    %cst_97 = arith.constant dense<0.000000e+00> : vector<8x8xf32>
    %129 = tpu.matmul %5, %128, %cst_97 {dimension_numbers = #tpu.dot_dimension_numbers<[1], [0], [0], [1], [0, 0, 1, 1], [], []>} : vector<8x32xf32>, vector<32x8xf32>, vector<8x8xf32> -> vector<8x8xf32>
    %c0_98 = arith.constant 0 : index
    %c0_99 = arith.constant 0 : index
    %c24_100 = arith.constant 24 : index
    %130 = vector.load %arg5[%c0_98, %c0_99, %c24_100] : memref<1x1x32xf32, #tpu.memory_space<vmem>>, vector<1x1x8xf32>
    %131 = vector.shape_cast %130 : vector<1x1x8xf32> to vector<1x8xf32>
    %132 = vector.broadcast %131 : vector<1x8xf32> to vector<8x8xf32>
    %133 = arith.addf %129, %132 : vector<8x8xf32>
    %cst_101 = arith.constant 0.353553385 : f32
    %134 = vector.broadcast %cst_101 : f32 to vector<8x8xf32>
    %135 = arith.mulf %133, %134 : vector<8x8xf32>
    %c0_102 = arith.constant 0 : index
    %c0_103 = arith.constant 0 : index
    %c24_104 = arith.constant 24 : index
    %136 = vector.load %arg6[%c0_102, %c0_103, %c24_104] : memref<1x32x32xf32, #tpu.memory_space<vmem>>, vector<1x32x8xf32>
    %137 = vector.shape_cast %136 : vector<1x32x8xf32> to vector<32x8xf32>
    %cst_105 = arith.constant dense<0.000000e+00> : vector<16x8xf32>
    %138 = tpu.matmul %3, %137, %cst_105 {dimension_numbers = #tpu.dot_dimension_numbers<[1], [0], [0], [1], [0, 0, 1, 1], [], []>} : vector<16x32xf32>, vector<32x8xf32>, vector<16x8xf32> -> vector<16x8xf32>
    %c0_106 = arith.constant 0 : index
    %c0_107 = arith.constant 0 : index
    %c24_108 = arith.constant 24 : index
    %139 = vector.load %arg7[%c0_106, %c0_107, %c24_108] : memref<1x1x32xf32, #tpu.memory_space<vmem>>, vector<1x1x8xf32>
    %140 = vector.shape_cast %139 : vector<1x1x8xf32> to vector<1x8xf32>
    %141 = vector.broadcast %140 : vector<1x8xf32> to vector<16x8xf32>
    %142 = arith.addf %138, %141 : vector<16x8xf32>
    %c0_109 = arith.constant 0 : index
    %c0_110 = arith.constant 0 : index
    %c24_111 = arith.constant 24 : index
    %143 = vector.load %arg8[%c0_109, %c0_110, %c24_111] : memref<1x32x32xf32, #tpu.memory_space<vmem>>, vector<1x32x8xf32>
    %144 = vector.shape_cast %143 : vector<1x32x8xf32> to vector<32x8xf32>
    %cst_112 = arith.constant dense<0.000000e+00> : vector<16x8xf32>
    %145 = tpu.matmul %3, %144, %cst_112 {dimension_numbers = #tpu.dot_dimension_numbers<[1], [0], [0], [1], [0, 0, 1, 1], [], []>} : vector<16x32xf32>, vector<32x8xf32>, vector<16x8xf32> -> vector<16x8xf32>
    %c0_113 = arith.constant 0 : index
    %c0_114 = arith.constant 0 : index
    %c24_115 = arith.constant 24 : index
    %146 = vector.load %arg9[%c0_113, %c0_114, %c24_115] : memref<1x1x32xf32, #tpu.memory_space<vmem>>, vector<1x1x8xf32>
    %147 = vector.shape_cast %146 : vector<1x1x8xf32> to vector<1x8xf32>
    %148 = vector.broadcast %147 : vector<1x8xf32> to vector<16x8xf32>
    %149 = arith.addf %145, %148 : vector<16x8xf32>
    %150 = tpu.transpose %142, [1, 0] : vector<16x8xf32> -> vector<8x16xf32>
    %cst_116 = arith.constant dense<0.000000e+00> : vector<8x16xf32>
    %151 = tpu.matmul %135, %150, %cst_116 {dimension_numbers = #tpu.dot_dimension_numbers<[1], [0], [0], [1], [0, 0, 1, 1], [], []>} : vector<8x8xf32>, vector<8x16xf32>, vector<8x16xf32> -> vector<8x16xf32>
    %cst_117 = arith.constant dense<0xFF800000> : vector<8xf32>
    %152 = vector.multi_reduction <maximumf>, %151, %cst_117 [1] : vector<8x16xf32> to vector<8xf32>
    %153 = vector.shape_cast %152 : vector<8xf32> to vector<8x1xf32>
    %154 = vector.broadcast %153 : vector<8x1xf32> to vector<8x16xf32>
    %155 = arith.subf %151, %154 : vector<8x16xf32>
    %156 = math.exp %155 : vector<8x16xf32>
    %cst_118 = arith.constant dense<0.000000e+00> : vector<8xf32>
    %157 = vector.multi_reduction <add>, %156, %cst_118 [1] : vector<8x16xf32> to vector<8xf32>
    %158 = vector.shape_cast %157 : vector<8xf32> to vector<8x1xf32>
    %159 = tpu.reciprocal %158 {approx = true} : vector<8x1xf32> -> vector<8x1xf32>
    %160 = vector.broadcast %159 : vector<8x1xf32> to vector<8x16xf32>
    %161 = arith.mulf %156, %160 : vector<8x16xf32>
    %cst_119 = arith.constant dense<0.000000e+00> : vector<8x8xf32>
    %162 = tpu.matmul %161, %149, %cst_119 {dimension_numbers = #tpu.dot_dimension_numbers<[1], [0], [0], [1], [0, 0, 1, 1], [], []>} : vector<8x16xf32>, vector<16x8xf32>, vector<8x8xf32> -> vector<8x8xf32>
    %c0_120 = arith.constant 0 : index
    %c24_121 = arith.constant 24 : index
    %c0_122 = arith.constant 0 : index
    %163 = vector.load %arg10[%c0_120, %c24_121, %c0_122] : memref<1x32x32xf32, #tpu.memory_space<vmem>>, vector<1x8x32xf32>
    %164 = vector.shape_cast %163 : vector<1x8x32xf32> to vector<8x32xf32>
    %cst_123 = arith.constant dense<0.000000e+00> : vector<8x32xf32>
    %165 = tpu.matmul %162, %164, %cst_123 {dimension_numbers = #tpu.dot_dimension_numbers<[1], [0], [0], [1], [0, 0, 1, 1], [], []>} : vector<8x8xf32>, vector<8x32xf32>, vector<8x32xf32> -> vector<8x32xf32>
    %166 = arith.addf %126, %165 : vector<8x32xf32>
    %c0_124 = arith.constant 0 : index
    %c0_125 = arith.constant 0 : index
    %c0_126 = arith.constant 0 : index
    %167 = vector.load %arg11[%c0_124, %c0_125, %c0_126] : memref<1x1x32xf32, #tpu.memory_space<vmem>>, vector<1x1x32xf32>
    %168 = vector.shape_cast %167 : vector<1x1x32xf32> to vector<1x32xf32>
    %169 = vector.broadcast %168 : vector<1x32xf32> to vector<8x32xf32>
    %170 = arith.addf %166, %169 : vector<8x32xf32>
    %171 = arith.addf %5, %170 : vector<8x32xf32>
    %c0_127 = arith.constant 0 : index
    %c0_128 = arith.constant 0 : index
    %c0_129 = arith.constant 0 : index
    %172 = vector.load %arg12[%c0_127, %c0_128, %c0_129] : memref<1x1x32xf32, #tpu.memory_space<vmem>>, vector<1x1x32xf32>
    %173 = vector.shape_cast %172 : vector<1x1x32xf32> to vector<1x32xf32>
    %c0_130 = arith.constant 0 : index
    %c0_131 = arith.constant 0 : index
    %c0_132 = arith.constant 0 : index
    %174 = vector.load %arg13[%c0_130, %c0_131, %c0_132] : memref<1x1x32xf32, #tpu.memory_space<vmem>>, vector<1x1x32xf32>
    %175 = vector.shape_cast %174 : vector<1x1x32xf32> to vector<1x32xf32>
    %cst_133 = arith.constant dense<0.000000e+00> : vector<8xf32>
    %176 = vector.multi_reduction <add>, %171, %cst_133 [1] : vector<8x32xf32> to vector<8xf32>
    %177 = vector.shape_cast %176 : vector<8xf32> to vector<8x1xf32>
    %cst_134 = arith.constant 3.200000e+01 : f32
    %178 = vector.broadcast %cst_134 : f32 to vector<8x1xf32>
    %179 = arith.divf %177, %178 : vector<8x1xf32>
    %180 = vector.broadcast %179 : vector<8x1xf32> to vector<8x32xf32>
    %181 = arith.subf %171, %180 : vector<8x32xf32>
    %182 = arith.mulf %181, %181 : vector<8x32xf32>
    %cst_135 = arith.constant dense<0.000000e+00> : vector<8xf32>
    %183 = vector.multi_reduction <add>, %182, %cst_135 [1] : vector<8x32xf32> to vector<8xf32>
    %184 = vector.shape_cast %183 : vector<8xf32> to vector<8x1xf32>
    %cst_136 = arith.constant 3.200000e+01 : f32
    %185 = vector.broadcast %cst_136 : f32 to vector<8x1xf32>
    %186 = arith.divf %184, %185 : vector<8x1xf32>
    %187 = vector.broadcast %179 : vector<8x1xf32> to vector<8x32xf32>
    %188 = arith.subf %171, %187 : vector<8x32xf32>
    %cst_137 = arith.constant 9.99999974E-6 : f32
    %189 = vector.broadcast %cst_137 : f32 to vector<8x1xf32>
    %190 = arith.addf %186, %189 : vector<8x1xf32>
    %191 = math.rsqrt %190 : vector<8x1xf32>
    %192 = vector.broadcast %191 : vector<8x1xf32> to vector<8x32xf32>
    %193 = arith.mulf %188, %192 : vector<8x32xf32>
    %194 = vector.broadcast %173 : vector<1x32xf32> to vector<8x32xf32>
    %195 = arith.mulf %193, %194 : vector<8x32xf32>
    %196 = vector.broadcast %175 : vector<1x32xf32> to vector<8x32xf32>
    %197 = arith.addf %195, %196 : vector<8x32xf32>
    %c0_138 = arith.constant 0 : index
    %c0_139 = arith.constant 0 : index
    %c0_140 = arith.constant 0 : index
    %198 = vector.load %arg14[%c0_138, %c0_139, %c0_140] : memref<1x32x64xf32, #tpu.memory_space<vmem>>, vector<1x32x64xf32>
    %199 = vector.shape_cast %198 : vector<1x32x64xf32> to vector<32x64xf32>
    %cst_141 = arith.constant dense<0.000000e+00> : vector<8x64xf32>
    %200 = tpu.matmul %197, %199, %cst_141 {dimension_numbers = #tpu.dot_dimension_numbers<[1], [0], [0], [1], [0, 0, 1, 1], [], []>} : vector<8x32xf32>, vector<32x64xf32>, vector<8x64xf32> -> vector<8x64xf32>
    %c0_142 = arith.constant 0 : index
    %c0_143 = arith.constant 0 : index
    %c0_144 = arith.constant 0 : index
    %201 = vector.load %arg15[%c0_142, %c0_143, %c0_144] : memref<1x1x64xf32, #tpu.memory_space<vmem>>, vector<1x1x64xf32>
    %202 = vector.shape_cast %201 : vector<1x1x64xf32> to vector<1x64xf32>
    %203 = vector.broadcast %202 : vector<1x64xf32> to vector<8x64xf32>
    %204 = arith.addf %200, %203 : vector<8x64xf32>
    %cst_145 = arith.constant 0.000000e+00 : f32
    %205 = vector.broadcast %cst_145 : f32 to vector<8x64xf32>
    %206 = arith.maximumf %204, %205 : vector<8x64xf32>
    %c0_146 = arith.constant 0 : index
    %c0_147 = arith.constant 0 : index
    %c0_148 = arith.constant 0 : index
    %207 = vector.load %arg16[%c0_146, %c0_147, %c0_148] : memref<1x64x32xf32, #tpu.memory_space<vmem>>, vector<1x64x32xf32>
    %208 = vector.shape_cast %207 : vector<1x64x32xf32> to vector<64x32xf32>
    %cst_149 = arith.constant dense<0.000000e+00> : vector<8x32xf32>
    %209 = tpu.matmul %206, %208, %cst_149 {dimension_numbers = #tpu.dot_dimension_numbers<[1], [0], [0], [1], [0, 0, 1, 1], [], []>} : vector<8x64xf32>, vector<64x32xf32>, vector<8x32xf32> -> vector<8x32xf32>
    %c0_150 = arith.constant 0 : index
    %c0_151 = arith.constant 0 : index
    %c0_152 = arith.constant 0 : index
    %210 = vector.load %arg17[%c0_150, %c0_151, %c0_152] : memref<1x1x32xf32, #tpu.memory_space<vmem>>, vector<1x1x32xf32>
    %211 = vector.shape_cast %210 : vector<1x1x32xf32> to vector<1x32xf32>
    %212 = vector.broadcast %211 : vector<1x32xf32> to vector<8x32xf32>
    %213 = arith.addf %209, %212 : vector<8x32xf32>
    %214 = arith.addf %197, %213 : vector<8x32xf32>
    %c0_153 = arith.constant 0 : index
    %c0_154 = arith.constant 0 : index
    %c0_155 = arith.constant 0 : index
    %215 = vector.load %arg18[%c0_153, %c0_154, %c0_155] : memref<1x1x32xf32, #tpu.memory_space<vmem>>, vector<1x1x32xf32>
    %216 = vector.shape_cast %215 : vector<1x1x32xf32> to vector<1x32xf32>
    %c0_156 = arith.constant 0 : index
    %c0_157 = arith.constant 0 : index
    %c0_158 = arith.constant 0 : index
    %217 = vector.load %arg19[%c0_156, %c0_157, %c0_158] : memref<1x1x32xf32, #tpu.memory_space<vmem>>, vector<1x1x32xf32>
    %218 = vector.shape_cast %217 : vector<1x1x32xf32> to vector<1x32xf32>
    %cst_159 = arith.constant dense<0.000000e+00> : vector<8xf32>
    %219 = vector.multi_reduction <add>, %214, %cst_159 [1] : vector<8x32xf32> to vector<8xf32>
    %220 = vector.shape_cast %219 : vector<8xf32> to vector<8x1xf32>
    %cst_160 = arith.constant 3.200000e+01 : f32
    %221 = vector.broadcast %cst_160 : f32 to vector<8x1xf32>
    %222 = arith.divf %220, %221 : vector<8x1xf32>
    %223 = vector.broadcast %222 : vector<8x1xf32> to vector<8x32xf32>
    %224 = arith.subf %214, %223 : vector<8x32xf32>
    %225 = arith.mulf %224, %224 : vector<8x32xf32>
    %cst_161 = arith.constant dense<0.000000e+00> : vector<8xf32>
    %226 = vector.multi_reduction <add>, %225, %cst_161 [1] : vector<8x32xf32> to vector<8xf32>
    %227 = vector.shape_cast %226 : vector<8xf32> to vector<8x1xf32>
    %cst_162 = arith.constant 3.200000e+01 : f32
    %228 = vector.broadcast %cst_162 : f32 to vector<8x1xf32>
    %229 = arith.divf %227, %228 : vector<8x1xf32>
    %230 = vector.broadcast %222 : vector<8x1xf32> to vector<8x32xf32>
    %231 = arith.subf %214, %230 : vector<8x32xf32>
    %cst_163 = arith.constant 9.99999974E-6 : f32
    %232 = vector.broadcast %cst_163 : f32 to vector<8x1xf32>
    %233 = arith.addf %229, %232 : vector<8x1xf32>
    %234 = math.rsqrt %233 : vector<8x1xf32>
    %235 = vector.broadcast %234 : vector<8x1xf32> to vector<8x32xf32>
    %236 = arith.mulf %231, %235 : vector<8x32xf32>
    %237 = vector.broadcast %216 : vector<1x32xf32> to vector<8x32xf32>
    %238 = arith.mulf %236, %237 : vector<8x32xf32>
    %239 = vector.broadcast %218 : vector<1x32xf32> to vector<8x32xf32>
    %240 = arith.addf %238, %239 : vector<8x32xf32>
    %c0_164 = arith.constant 0 : index
    %c0_165 = arith.constant 0 : index
    %241 = vector.load %arg41[%c0_164, %c0_165] : memref<24x32xf32, #tpu.memory_space<vmem>>, vector<16x32xf32>
    tpu.vector_store %arg41[%c0_164, %c0_165], %3 {strides = array<i32>} : memref<24x32xf32, #tpu.memory_space<vmem>>, vector<16x32xf32>,
    %c16_166 = arith.constant 16 : index
    %c0_167 = arith.constant 0 : index
    %242 = vector.load %arg41[%c16_166, %c0_167] : memref<24x32xf32, #tpu.memory_space<vmem>>, vector<8x32xf32>
    tpu.vector_store %arg41[%c16_166, %c0_167], %240 {strides = array<i32>} : memref<24x32xf32, #tpu.memory_space<vmem>>, vector<8x32xf32>,
    %c0_168 = arith.constant 0 : index
    %c0_169 = arith.constant 0 : index
    %243 = vector.load %arg41[%c0_168, %c0_169] : memref<24x32xf32, #tpu.memory_space<vmem>>, vector<24x32xf32>
    %c0_170 = arith.constant 0 : index
    %c0_171 = arith.constant 0 : index
    %244 = vector.load %arg36[%c0_170, %c0_171] : memref<1x32xf32, #tpu.memory_space<vmem>>, vector<1x32xf32>
    %c0_172 = arith.constant 0 : index
    %c0_173 = arith.constant 0 : index
    %245 = vector.load %arg37[%c0_172, %c0_173] : memref<1x32xf32, #tpu.memory_space<vmem>>, vector<1x32xf32>
    %cst_174 = arith.constant dense<0.000000e+00> : vector<24xf32>
    %246 = vector.multi_reduction <add>, %243, %cst_174 [1] : vector<24x32xf32> to vector<24xf32>
    %247 = vector.shape_cast %246 : vector<24xf32> to vector<24x1xf32>
    %cst_175 = arith.constant 3.200000e+01 : f32
    %248 = vector.broadcast %cst_175 : f32 to vector<24x1xf32>
    %249 = arith.divf %247, %248 : vector<24x1xf32>
    %250 = vector.broadcast %249 : vector<24x1xf32> to vector<24x32xf32>
    %251 = arith.subf %243, %250 : vector<24x32xf32>
    %252 = arith.mulf %251, %251 : vector<24x32xf32>
    %cst_176 = arith.constant dense<0.000000e+00> : vector<24xf32>
    %253 = vector.multi_reduction <add>, %252, %cst_176 [1] : vector<24x32xf32> to vector<24xf32>
    %254 = vector.shape_cast %253 : vector<24xf32> to vector<24x1xf32>
    %cst_177 = arith.constant 3.200000e+01 : f32
    %255 = vector.broadcast %cst_177 : f32 to vector<24x1xf32>
    %256 = arith.divf %254, %255 : vector<24x1xf32>
    %257 = vector.broadcast %249 : vector<24x1xf32> to vector<24x32xf32>
    %258 = arith.subf %243, %257 : vector<24x32xf32>
    %cst_178 = arith.constant 9.99999974E-6 : f32
    %259 = vector.broadcast %cst_178 : f32 to vector<24x1xf32>
    %260 = arith.addf %256, %259 : vector<24x1xf32>
    %261 = math.rsqrt %260 : vector<24x1xf32>
    %262 = vector.broadcast %261 : vector<24x1xf32> to vector<24x32xf32>
    %263 = arith.mulf %258, %262 : vector<24x32xf32>
    %264 = vector.broadcast %244 : vector<1x32xf32> to vector<24x32xf32>
    %265 = arith.mulf %263, %264 : vector<24x32xf32>
    %266 = vector.broadcast %245 : vector<1x32xf32> to vector<24x32xf32>
    %267 = arith.addf %265, %266 : vector<24x32xf32>
    %cst_179 = arith.constant 0.000000e+00 : f32
    %268 = vector.broadcast %cst_179 : f32 to vector<24x32xf32>
    %c0_180 = arith.constant 0 : index
    %c0_181 = arith.constant 0 : index
    %c0_182 = arith.constant 0 : index
    %269 = vector.load %arg20[%c0_180, %c0_181, %c0_182] : memref<1x32x32xf32, #tpu.memory_space<vmem>>, vector<1x32x8xf32>
    %270 = vector.shape_cast %269 : vector<1x32x8xf32> to vector<32x8xf32>
    %cst_183 = arith.constant dense<0.000000e+00> : vector<24x8xf32>
    %271 = tpu.matmul %267, %270, %cst_183 {dimension_numbers = #tpu.dot_dimension_numbers<[1], [0], [0], [1], [0, 0, 1, 1], [], []>} : vector<24x32xf32>, vector<32x8xf32>, vector<24x8xf32> -> vector<24x8xf32>
    %c0_184 = arith.constant 0 : index
    %c0_185 = arith.constant 0 : index
    %c0_186 = arith.constant 0 : index
    %272 = vector.load %arg21[%c0_184, %c0_185, %c0_186] : memref<1x1x32xf32, #tpu.memory_space<vmem>>, vector<1x1x8xf32>
    %273 = vector.shape_cast %272 : vector<1x1x8xf32> to vector<1x8xf32>
    %274 = vector.broadcast %273 : vector<1x8xf32> to vector<24x8xf32>
    %275 = arith.addf %271, %274 : vector<24x8xf32>
    %cst_187 = arith.constant 0.353553385 : f32
    %276 = vector.broadcast %cst_187 : f32 to vector<24x8xf32>
    %277 = arith.mulf %275, %276 : vector<24x8xf32>
    %c0_188 = arith.constant 0 : index
    %c0_189 = arith.constant 0 : index
    %c0_190 = arith.constant 0 : index
    %278 = vector.load %arg22[%c0_188, %c0_189, %c0_190] : memref<1x32x32xf32, #tpu.memory_space<vmem>>, vector<1x32x8xf32>
    %279 = vector.shape_cast %278 : vector<1x32x8xf32> to vector<32x8xf32>
    %cst_191 = arith.constant dense<0.000000e+00> : vector<24x8xf32>
    %280 = tpu.matmul %267, %279, %cst_191 {dimension_numbers = #tpu.dot_dimension_numbers<[1], [0], [0], [1], [0, 0, 1, 1], [], []>} : vector<24x32xf32>, vector<32x8xf32>, vector<24x8xf32> -> vector<24x8xf32>
    %c0_192 = arith.constant 0 : index
    %c0_193 = arith.constant 0 : index
    %c0_194 = arith.constant 0 : index
    %281 = vector.load %arg23[%c0_192, %c0_193, %c0_194] : memref<1x1x32xf32, #tpu.memory_space<vmem>>, vector<1x1x8xf32>
    %282 = vector.shape_cast %281 : vector<1x1x8xf32> to vector<1x8xf32>
    %283 = vector.broadcast %282 : vector<1x8xf32> to vector<24x8xf32>
    %284 = arith.addf %280, %283 : vector<24x8xf32>
    %c0_195 = arith.constant 0 : index
    %c0_196 = arith.constant 0 : index
    %c0_197 = arith.constant 0 : index
    %285 = vector.load %arg24[%c0_195, %c0_196, %c0_197] : memref<1x32x32xf32, #tpu.memory_space<vmem>>, vector<1x32x8xf32>
    %286 = vector.shape_cast %285 : vector<1x32x8xf32> to vector<32x8xf32>
    %cst_198 = arith.constant dense<0.000000e+00> : vector<24x8xf32>
    %287 = tpu.matmul %267, %286, %cst_198 {dimension_numbers = #tpu.dot_dimension_numbers<[1], [0], [0], [1], [0, 0, 1, 1], [], []>} : vector<24x32xf32>, vector<32x8xf32>, vector<24x8xf32> -> vector<24x8xf32>
    %c0_199 = arith.constant 0 : index
    %c0_200 = arith.constant 0 : index
    %c0_201 = arith.constant 0 : index
    %288 = vector.load %arg25[%c0_199, %c0_200, %c0_201] : memref<1x1x32xf32, #tpu.memory_space<vmem>>, vector<1x1x8xf32>
    %289 = vector.shape_cast %288 : vector<1x1x8xf32> to vector<1x8xf32>
    %290 = vector.broadcast %289 : vector<1x8xf32> to vector<24x8xf32>
    %291 = arith.addf %287, %290 : vector<24x8xf32>
    %292 = tpu.transpose %284, [1, 0] : vector<24x8xf32> -> vector<8x24xf32>
    %cst_202 = arith.constant dense<0.000000e+00> : vector<24x24xf32>
    %293 = tpu.matmul %277, %292, %cst_202 {dimension_numbers = #tpu.dot_dimension_numbers<[1], [0], [0], [1], [0, 0, 1, 1], [], []>} : vector<24x8xf32>, vector<8x24xf32>, vector<24x24xf32> -> vector<24x24xf32>
    %cst_203 = arith.constant dense<0xFF800000> : vector<24xf32>
    %294 = vector.multi_reduction <maximumf>, %293, %cst_203 [1] : vector<24x24xf32> to vector<24xf32>
    %295 = vector.shape_cast %294 : vector<24xf32> to vector<24x1xf32>
    %296 = vector.broadcast %295 : vector<24x1xf32> to vector<24x24xf32>
    %297 = arith.subf %293, %296 : vector<24x24xf32>
    %298 = math.exp %297 : vector<24x24xf32>
    %cst_204 = arith.constant dense<0.000000e+00> : vector<24xf32>
    %299 = vector.multi_reduction <add>, %298, %cst_204 [1] : vector<24x24xf32> to vector<24xf32>
    %300 = vector.shape_cast %299 : vector<24xf32> to vector<24x1xf32>
    %301 = tpu.reciprocal %300 {approx = true} : vector<24x1xf32> -> vector<24x1xf32>
    %302 = vector.broadcast %301 : vector<24x1xf32> to vector<24x24xf32>
    %303 = arith.mulf %298, %302 : vector<24x24xf32>
    %cst_205 = arith.constant dense<0.000000e+00> : vector<24x8xf32>
    %304 = tpu.matmul %303, %291, %cst_205 {dimension_numbers = #tpu.dot_dimension_numbers<[1], [0], [0], [1], [0, 0, 1, 1], [], []>} : vector<24x24xf32>, vector<24x8xf32>, vector<24x8xf32> -> vector<24x8xf32>
    %c0_206 = arith.constant 0 : index
    %c0_207 = arith.constant 0 : index
    %c0_208 = arith.constant 0 : index
    %305 = vector.load %arg26[%c0_206, %c0_207, %c0_208] : memref<1x32x32xf32, #tpu.memory_space<vmem>>, vector<1x8x32xf32>
    %306 = vector.shape_cast %305 : vector<1x8x32xf32> to vector<8x32xf32>
    %cst_209 = arith.constant dense<0.000000e+00> : vector<24x32xf32>
    %307 = tpu.matmul %304, %306, %cst_209 {dimension_numbers = #tpu.dot_dimension_numbers<[1], [0], [0], [1], [0, 0, 1, 1], [], []>} : vector<24x8xf32>, vector<8x32xf32>, vector<24x32xf32> -> vector<24x32xf32>
    %308 = arith.addf %268, %307 : vector<24x32xf32>
    %c0_210 = arith.constant 0 : index
    %c0_211 = arith.constant 0 : index
    %c8_212 = arith.constant 8 : index
    %309 = vector.load %arg20[%c0_210, %c0_211, %c8_212] : memref<1x32x32xf32, #tpu.memory_space<vmem>>, vector<1x32x8xf32>
    %310 = vector.shape_cast %309 : vector<1x32x8xf32> to vector<32x8xf32>
    %cst_213 = arith.constant dense<0.000000e+00> : vector<24x8xf32>
    %311 = tpu.matmul %267, %310, %cst_213 {dimension_numbers = #tpu.dot_dimension_numbers<[1], [0], [0], [1], [0, 0, 1, 1], [], []>} : vector<24x32xf32>, vector<32x8xf32>, vector<24x8xf32> -> vector<24x8xf32>
    %c0_214 = arith.constant 0 : index
    %c0_215 = arith.constant 0 : index
    %c8_216 = arith.constant 8 : index
    %312 = vector.load %arg21[%c0_214, %c0_215, %c8_216] : memref<1x1x32xf32, #tpu.memory_space<vmem>>, vector<1x1x8xf32>
    %313 = vector.shape_cast %312 : vector<1x1x8xf32> to vector<1x8xf32>
    %314 = vector.broadcast %313 : vector<1x8xf32> to vector<24x8xf32>
    %315 = arith.addf %311, %314 : vector<24x8xf32>
    %cst_217 = arith.constant 0.353553385 : f32
    %316 = vector.broadcast %cst_217 : f32 to vector<24x8xf32>
    %317 = arith.mulf %315, %316 : vector<24x8xf32>
    %c0_218 = arith.constant 0 : index
    %c0_219 = arith.constant 0 : index
    %c8_220 = arith.constant 8 : index
    %318 = vector.load %arg22[%c0_218, %c0_219, %c8_220] : memref<1x32x32xf32, #tpu.memory_space<vmem>>, vector<1x32x8xf32>
    %319 = vector.shape_cast %318 : vector<1x32x8xf32> to vector<32x8xf32>
    %cst_221 = arith.constant dense<0.000000e+00> : vector<24x8xf32>
    %320 = tpu.matmul %267, %319, %cst_221 {dimension_numbers = #tpu.dot_dimension_numbers<[1], [0], [0], [1], [0, 0, 1, 1], [], []>} : vector<24x32xf32>, vector<32x8xf32>, vector<24x8xf32> -> vector<24x8xf32>
    %c0_222 = arith.constant 0 : index
    %c0_223 = arith.constant 0 : index
    %c8_224 = arith.constant 8 : index
    %321 = vector.load %arg23[%c0_222, %c0_223, %c8_224] : memref<1x1x32xf32, #tpu.memory_space<vmem>>, vector<1x1x8xf32>
    %322 = vector.shape_cast %321 : vector<1x1x8xf32> to vector<1x8xf32>
    %323 = vector.broadcast %322 : vector<1x8xf32> to vector<24x8xf32>
    %324 = arith.addf %320, %323 : vector<24x8xf32>
    %c0_225 = arith.constant 0 : index
    %c0_226 = arith.constant 0 : index
    %c8_227 = arith.constant 8 : index
    %325 = vector.load %arg24[%c0_225, %c0_226, %c8_227] : memref<1x32x32xf32, #tpu.memory_space<vmem>>, vector<1x32x8xf32>
    %326 = vector.shape_cast %325 : vector<1x32x8xf32> to vector<32x8xf32>
    %cst_228 = arith.constant dense<0.000000e+00> : vector<24x8xf32>
    %327 = tpu.matmul %267, %326, %cst_228 {dimension_numbers = #tpu.dot_dimension_numbers<[1], [0], [0], [1], [0, 0, 1, 1], [], []>} : vector<24x32xf32>, vector<32x8xf32>, vector<24x8xf32> -> vector<24x8xf32>
    %c0_229 = arith.constant 0 : index
    %c0_230 = arith.constant 0 : index
    %c8_231 = arith.constant 8 : index
    %328 = vector.load %arg25[%c0_229, %c0_230, %c8_231] : memref<1x1x32xf32, #tpu.memory_space<vmem>>, vector<1x1x8xf32>
    %329 = vector.shape_cast %328 : vector<1x1x8xf32> to vector<1x8xf32>
    %330 = vector.broadcast %329 : vector<1x8xf32> to vector<24x8xf32>
    %331 = arith.addf %327, %330 : vector<24x8xf32>
    %332 = tpu.transpose %324, [1, 0] : vector<24x8xf32> -> vector<8x24xf32>
    %cst_232 = arith.constant dense<0.000000e+00> : vector<24x24xf32>
    %333 = tpu.matmul %317, %332, %cst_232 {dimension_numbers = #tpu.dot_dimension_numbers<[1], [0], [0], [1], [0, 0, 1, 1], [], []>} : vector<24x8xf32>, vector<8x24xf32>, vector<24x24xf32> -> vector<24x24xf32>
    %cst_233 = arith.constant dense<0xFF800000> : vector<24xf32>
    %334 = vector.multi_reduction <maximumf>, %333, %cst_233 [1] : vector<24x24xf32> to vector<24xf32>
    %335 = vector.shape_cast %334 : vector<24xf32> to vector<24x1xf32>
    %336 = vector.broadcast %335 : vector<24x1xf32> to vector<24x24xf32>
    %337 = arith.subf %333, %336 : vector<24x24xf32>
    %338 = math.exp %337 : vector<24x24xf32>
    %cst_234 = arith.constant dense<0.000000e+00> : vector<24xf32>
    %339 = vector.multi_reduction <add>, %338, %cst_234 [1] : vector<24x24xf32> to vector<24xf32>
    %340 = vector.shape_cast %339 : vector<24xf32> to vector<24x1xf32>
    %341 = tpu.reciprocal %340 {approx = true} : vector<24x1xf32> -> vector<24x1xf32>
    %342 = vector.broadcast %341 : vector<24x1xf32> to vector<24x24xf32>
    %343 = arith.mulf %338, %342 : vector<24x24xf32>
    %cst_235 = arith.constant dense<0.000000e+00> : vector<24x8xf32>
    %344 = tpu.matmul %343, %331, %cst_235 {dimension_numbers = #tpu.dot_dimension_numbers<[1], [0], [0], [1], [0, 0, 1, 1], [], []>} : vector<24x24xf32>, vector<24x8xf32>, vector<24x8xf32> -> vector<24x8xf32>
    %c0_236 = arith.constant 0 : index
    %c8_237 = arith.constant 8 : index
    %c0_238 = arith.constant 0 : index
    %345 = vector.load %arg26[%c0_236, %c8_237, %c0_238] : memref<1x32x32xf32, #tpu.memory_space<vmem>>, vector<1x8x32xf32>
    %346 = vector.shape_cast %345 : vector<1x8x32xf32> to vector<8x32xf32>
    %cst_239 = arith.constant dense<0.000000e+00> : vector<24x32xf32>
    %347 = tpu.matmul %344, %346, %cst_239 {dimension_numbers = #tpu.dot_dimension_numbers<[1], [0], [0], [1], [0, 0, 1, 1], [], []>} : vector<24x8xf32>, vector<8x32xf32>, vector<24x32xf32> -> vector<24x32xf32>
    %348 = arith.addf %308, %347 : vector<24x32xf32>
    %c0_240 = arith.constant 0 : index
    %c0_241 = arith.constant 0 : index
    %c16_242 = arith.constant 16 : index
    %349 = vector.load %arg20[%c0_240, %c0_241, %c16_242] : memref<1x32x32xf32, #tpu.memory_space<vmem>>, vector<1x32x8xf32>
    %350 = vector.shape_cast %349 : vector<1x32x8xf32> to vector<32x8xf32>
    %cst_243 = arith.constant dense<0.000000e+00> : vector<24x8xf32>
    %351 = tpu.matmul %267, %350, %cst_243 {dimension_numbers = #tpu.dot_dimension_numbers<[1], [0], [0], [1], [0, 0, 1, 1], [], []>} : vector<24x32xf32>, vector<32x8xf32>, vector<24x8xf32> -> vector<24x8xf32>
    %c0_244 = arith.constant 0 : index
    %c0_245 = arith.constant 0 : index
    %c16_246 = arith.constant 16 : index
    %352 = vector.load %arg21[%c0_244, %c0_245, %c16_246] : memref<1x1x32xf32, #tpu.memory_space<vmem>>, vector<1x1x8xf32>
    %353 = vector.shape_cast %352 : vector<1x1x8xf32> to vector<1x8xf32>
    %354 = vector.broadcast %353 : vector<1x8xf32> to vector<24x8xf32>
    %355 = arith.addf %351, %354 : vector<24x8xf32>
    %cst_247 = arith.constant 0.353553385 : f32
    %356 = vector.broadcast %cst_247 : f32 to vector<24x8xf32>
    %357 = arith.mulf %355, %356 : vector<24x8xf32>
    %c0_248 = arith.constant 0 : index
    %c0_249 = arith.constant 0 : index
    %c16_250 = arith.constant 16 : index
    %358 = vector.load %arg22[%c0_248, %c0_249, %c16_250] : memref<1x32x32xf32, #tpu.memory_space<vmem>>, vector<1x32x8xf32>
    %359 = vector.shape_cast %358 : vector<1x32x8xf32> to vector<32x8xf32>
    %cst_251 = arith.constant dense<0.000000e+00> : vector<24x8xf32>
    %360 = tpu.matmul %267, %359, %cst_251 {dimension_numbers = #tpu.dot_dimension_numbers<[1], [0], [0], [1], [0, 0, 1, 1], [], []>} : vector<24x32xf32>, vector<32x8xf32>, vector<24x8xf32> -> vector<24x8xf32>
    %c0_252 = arith.constant 0 : index
    %c0_253 = arith.constant 0 : index
    %c16_254 = arith.constant 16 : index
    %361 = vector.load %arg23[%c0_252, %c0_253, %c16_254] : memref<1x1x32xf32, #tpu.memory_space<vmem>>, vector<1x1x8xf32>
    %362 = vector.shape_cast %361 : vector<1x1x8xf32> to vector<1x8xf32>
    %363 = vector.broadcast %362 : vector<1x8xf32> to vector<24x8xf32>
    %364 = arith.addf %360, %363 : vector<24x8xf32>
    %c0_255 = arith.constant 0 : index
    %c0_256 = arith.constant 0 : index
    %c16_257 = arith.constant 16 : index
    %365 = vector.load %arg24[%c0_255, %c0_256, %c16_257] : memref<1x32x32xf32, #tpu.memory_space<vmem>>, vector<1x32x8xf32>
    %366 = vector.shape_cast %365 : vector<1x32x8xf32> to vector<32x8xf32>
    %cst_258 = arith.constant dense<0.000000e+00> : vector<24x8xf32>
    %367 = tpu.matmul %267, %366, %cst_258 {dimension_numbers = #tpu.dot_dimension_numbers<[1], [0], [0], [1], [0, 0, 1, 1], [], []>} : vector<24x32xf32>, vector<32x8xf32>, vector<24x8xf32> -> vector<24x8xf32>
    %c0_259 = arith.constant 0 : index
    %c0_260 = arith.constant 0 : index
    %c16_261 = arith.constant 16 : index
    %368 = vector.load %arg25[%c0_259, %c0_260, %c16_261] : memref<1x1x32xf32, #tpu.memory_space<vmem>>, vector<1x1x8xf32>
    %369 = vector.shape_cast %368 : vector<1x1x8xf32> to vector<1x8xf32>
    %370 = vector.broadcast %369 : vector<1x8xf32> to vector<24x8xf32>
    %371 = arith.addf %367, %370 : vector<24x8xf32>
    %372 = tpu.transpose %364, [1, 0] : vector<24x8xf32> -> vector<8x24xf32>
    %cst_262 = arith.constant dense<0.000000e+00> : vector<24x24xf32>
    %373 = tpu.matmul %357, %372, %cst_262 {dimension_numbers = #tpu.dot_dimension_numbers<[1], [0], [0], [1], [0, 0, 1, 1], [], []>} : vector<24x8xf32>, vector<8x24xf32>, vector<24x24xf32> -> vector<24x24xf32>
    %cst_263 = arith.constant dense<0xFF800000> : vector<24xf32>
    %374 = vector.multi_reduction <maximumf>, %373, %cst_263 [1] : vector<24x24xf32> to vector<24xf32>
    %375 = vector.shape_cast %374 : vector<24xf32> to vector<24x1xf32>
    %376 = vector.broadcast %375 : vector<24x1xf32> to vector<24x24xf32>
    %377 = arith.subf %373, %376 : vector<24x24xf32>
    %378 = math.exp %377 : vector<24x24xf32>
    %cst_264 = arith.constant dense<0.000000e+00> : vector<24xf32>
    %379 = vector.multi_reduction <add>, %378, %cst_264 [1] : vector<24x24xf32> to vector<24xf32>
    %380 = vector.shape_cast %379 : vector<24xf32> to vector<24x1xf32>
    %381 = tpu.reciprocal %380 {approx = true} : vector<24x1xf32> -> vector<24x1xf32>
    %382 = vector.broadcast %381 : vector<24x1xf32> to vector<24x24xf32>
    %383 = arith.mulf %378, %382 : vector<24x24xf32>
    %cst_265 = arith.constant dense<0.000000e+00> : vector<24x8xf32>
    %384 = tpu.matmul %383, %371, %cst_265 {dimension_numbers = #tpu.dot_dimension_numbers<[1], [0], [0], [1], [0, 0, 1, 1], [], []>} : vector<24x24xf32>, vector<24x8xf32>, vector<24x8xf32> -> vector<24x8xf32>
    %c0_266 = arith.constant 0 : index
    %c16_267 = arith.constant 16 : index
    %c0_268 = arith.constant 0 : index
    %385 = vector.load %arg26[%c0_266, %c16_267, %c0_268] : memref<1x32x32xf32, #tpu.memory_space<vmem>>, vector<1x8x32xf32>
    %386 = vector.shape_cast %385 : vector<1x8x32xf32> to vector<8x32xf32>
    %cst_269 = arith.constant dense<0.000000e+00> : vector<24x32xf32>
    %387 = tpu.matmul %384, %386, %cst_269 {dimension_numbers = #tpu.dot_dimension_numbers<[1], [0], [0], [1], [0, 0, 1, 1], [], []>} : vector<24x8xf32>, vector<8x32xf32>, vector<24x32xf32> -> vector<24x32xf32>
    %388 = arith.addf %348, %387 : vector<24x32xf32>
    %c0_270 = arith.constant 0 : index
    %c0_271 = arith.constant 0 : index
    %c24_272 = arith.constant 24 : index
    %389 = vector.load %arg20[%c0_270, %c0_271, %c24_272] : memref<1x32x32xf32, #tpu.memory_space<vmem>>, vector<1x32x8xf32>
    %390 = vector.shape_cast %389 : vector<1x32x8xf32> to vector<32x8xf32>
    %cst_273 = arith.constant dense<0.000000e+00> : vector<24x8xf32>
    %391 = tpu.matmul %267, %390, %cst_273 {dimension_numbers = #tpu.dot_dimension_numbers<[1], [0], [0], [1], [0, 0, 1, 1], [], []>} : vector<24x32xf32>, vector<32x8xf32>, vector<24x8xf32> -> vector<24x8xf32>
    %c0_274 = arith.constant 0 : index
    %c0_275 = arith.constant 0 : index
    %c24_276 = arith.constant 24 : index
    %392 = vector.load %arg21[%c0_274, %c0_275, %c24_276] : memref<1x1x32xf32, #tpu.memory_space<vmem>>, vector<1x1x8xf32>
    %393 = vector.shape_cast %392 : vector<1x1x8xf32> to vector<1x8xf32>
    %394 = vector.broadcast %393 : vector<1x8xf32> to vector<24x8xf32>
    %395 = arith.addf %391, %394 : vector<24x8xf32>
    %cst_277 = arith.constant 0.353553385 : f32
    %396 = vector.broadcast %cst_277 : f32 to vector<24x8xf32>
    %397 = arith.mulf %395, %396 : vector<24x8xf32>
    %c0_278 = arith.constant 0 : index
    %c0_279 = arith.constant 0 : index
    %c24_280 = arith.constant 24 : index
    %398 = vector.load %arg22[%c0_278, %c0_279, %c24_280] : memref<1x32x32xf32, #tpu.memory_space<vmem>>, vector<1x32x8xf32>
    %399 = vector.shape_cast %398 : vector<1x32x8xf32> to vector<32x8xf32>
    %cst_281 = arith.constant dense<0.000000e+00> : vector<24x8xf32>
    %400 = tpu.matmul %267, %399, %cst_281 {dimension_numbers = #tpu.dot_dimension_numbers<[1], [0], [0], [1], [0, 0, 1, 1], [], []>} : vector<24x32xf32>, vector<32x8xf32>, vector<24x8xf32> -> vector<24x8xf32>
    %c0_282 = arith.constant 0 : index
    %c0_283 = arith.constant 0 : index
    %c24_284 = arith.constant 24 : index
    %401 = vector.load %arg23[%c0_282, %c0_283, %c24_284] : memref<1x1x32xf32, #tpu.memory_space<vmem>>, vector<1x1x8xf32>
    %402 = vector.shape_cast %401 : vector<1x1x8xf32> to vector<1x8xf32>
    %403 = vector.broadcast %402 : vector<1x8xf32> to vector<24x8xf32>
    %404 = arith.addf %400, %403 : vector<24x8xf32>
    %c0_285 = arith.constant 0 : index
    %c0_286 = arith.constant 0 : index
    %c24_287 = arith.constant 24 : index
    %405 = vector.load %arg24[%c0_285, %c0_286, %c24_287] : memref<1x32x32xf32, #tpu.memory_space<vmem>>, vector<1x32x8xf32>
    %406 = vector.shape_cast %405 : vector<1x32x8xf32> to vector<32x8xf32>
    %cst_288 = arith.constant dense<0.000000e+00> : vector<24x8xf32>
    %407 = tpu.matmul %267, %406, %cst_288 {dimension_numbers = #tpu.dot_dimension_numbers<[1], [0], [0], [1], [0, 0, 1, 1], [], []>} : vector<24x32xf32>, vector<32x8xf32>, vector<24x8xf32> -> vector<24x8xf32>
    %c0_289 = arith.constant 0 : index
    %c0_290 = arith.constant 0 : index
    %c24_291 = arith.constant 24 : index
    %408 = vector.load %arg25[%c0_289, %c0_290, %c24_291] : memref<1x1x32xf32, #tpu.memory_space<vmem>>, vector<1x1x8xf32>
    %409 = vector.shape_cast %408 : vector<1x1x8xf32> to vector<1x8xf32>
    %410 = vector.broadcast %409 : vector<1x8xf32> to vector<24x8xf32>
    %411 = arith.addf %407, %410 : vector<24x8xf32>
    %412 = tpu.transpose %404, [1, 0] : vector<24x8xf32> -> vector<8x24xf32>
    %cst_292 = arith.constant dense<0.000000e+00> : vector<24x24xf32>
    %413 = tpu.matmul %397, %412, %cst_292 {dimension_numbers = #tpu.dot_dimension_numbers<[1], [0], [0], [1], [0, 0, 1, 1], [], []>} : vector<24x8xf32>, vector<8x24xf32>, vector<24x24xf32> -> vector<24x24xf32>
    %cst_293 = arith.constant dense<0xFF800000> : vector<24xf32>
    %414 = vector.multi_reduction <maximumf>, %413, %cst_293 [1] : vector<24x24xf32> to vector<24xf32>
    %415 = vector.shape_cast %414 : vector<24xf32> to vector<24x1xf32>
    %416 = vector.broadcast %415 : vector<24x1xf32> to vector<24x24xf32>
    %417 = arith.subf %413, %416 : vector<24x24xf32>
    %418 = math.exp %417 : vector<24x24xf32>
    %cst_294 = arith.constant dense<0.000000e+00> : vector<24xf32>
    %419 = vector.multi_reduction <add>, %418, %cst_294 [1] : vector<24x24xf32> to vector<24xf32>
    %420 = vector.shape_cast %419 : vector<24xf32> to vector<24x1xf32>
    %421 = tpu.reciprocal %420 {approx = true} : vector<24x1xf32> -> vector<24x1xf32>
    %422 = vector.broadcast %421 : vector<24x1xf32> to vector<24x24xf32>
    %423 = arith.mulf %418, %422 : vector<24x24xf32>
    %cst_295 = arith.constant dense<0.000000e+00> : vector<24x8xf32>
    %424 = tpu.matmul %423, %411, %cst_295 {dimension_numbers = #tpu.dot_dimension_numbers<[1], [0], [0], [1], [0, 0, 1, 1], [], []>} : vector<24x24xf32>, vector<24x8xf32>, vector<24x8xf32> -> vector<24x8xf32>
    %c0_296 = arith.constant 0 : index
    %c24_297 = arith.constant 24 : index
    %c0_298 = arith.constant 0 : index
    %425 = vector.load %arg26[%c0_296, %c24_297, %c0_298] : memref<1x32x32xf32, #tpu.memory_space<vmem>>, vector<1x8x32xf32>
    %426 = vector.shape_cast %425 : vector<1x8x32xf32> to vector<8x32xf32>
    %cst_299 = arith.constant dense<0.000000e+00> : vector<24x32xf32>
    %427 = tpu.matmul %424, %426, %cst_299 {dimension_numbers = #tpu.dot_dimension_numbers<[1], [0], [0], [1], [0, 0, 1, 1], [], []>} : vector<24x8xf32>, vector<8x32xf32>, vector<24x32xf32> -> vector<24x32xf32>
    %428 = arith.addf %388, %427 : vector<24x32xf32>
    %c0_300 = arith.constant 0 : index
    %c0_301 = arith.constant 0 : index
    %c0_302 = arith.constant 0 : index
    %429 = vector.load %arg27[%c0_300, %c0_301, %c0_302] : memref<1x1x32xf32, #tpu.memory_space<vmem>>, vector<1x1x32xf32>
    %430 = vector.shape_cast %429 : vector<1x1x32xf32> to vector<1x32xf32>
    %431 = vector.broadcast %430 : vector<1x32xf32> to vector<24x32xf32>
    %432 = arith.addf %428, %431 : vector<24x32xf32>
    %433 = arith.addf %267, %432 : vector<24x32xf32>
    %c0_303 = arith.constant 0 : index
    %c0_304 = arith.constant 0 : index
    %c0_305 = arith.constant 0 : index
    %434 = vector.load %arg28[%c0_303, %c0_304, %c0_305] : memref<1x1x32xf32, #tpu.memory_space<vmem>>, vector<1x1x32xf32>
    %435 = vector.shape_cast %434 : vector<1x1x32xf32> to vector<1x32xf32>
    %c0_306 = arith.constant 0 : index
    %c0_307 = arith.constant 0 : index
    %c0_308 = arith.constant 0 : index
    %436 = vector.load %arg29[%c0_306, %c0_307, %c0_308] : memref<1x1x32xf32, #tpu.memory_space<vmem>>, vector<1x1x32xf32>
    %437 = vector.shape_cast %436 : vector<1x1x32xf32> to vector<1x32xf32>
    %cst_309 = arith.constant dense<0.000000e+00> : vector<24xf32>
    %438 = vector.multi_reduction <add>, %433, %cst_309 [1] : vector<24x32xf32> to vector<24xf32>
    %439 = vector.shape_cast %438 : vector<24xf32> to vector<24x1xf32>
    %cst_310 = arith.constant 3.200000e+01 : f32
    %440 = vector.broadcast %cst_310 : f32 to vector<24x1xf32>
    %441 = arith.divf %439, %440 : vector<24x1xf32>
    %442 = vector.broadcast %441 : vector<24x1xf32> to vector<24x32xf32>
    %443 = arith.subf %433, %442 : vector<24x32xf32>
    %444 = arith.mulf %443, %443 : vector<24x32xf32>
    %cst_311 = arith.constant dense<0.000000e+00> : vector<24xf32>
    %445 = vector.multi_reduction <add>, %444, %cst_311 [1] : vector<24x32xf32> to vector<24xf32>
    %446 = vector.shape_cast %445 : vector<24xf32> to vector<24x1xf32>
    %cst_312 = arith.constant 3.200000e+01 : f32
    %447 = vector.broadcast %cst_312 : f32 to vector<24x1xf32>
    %448 = arith.divf %446, %447 : vector<24x1xf32>
    %449 = vector.broadcast %441 : vector<24x1xf32> to vector<24x32xf32>
    %450 = arith.subf %433, %449 : vector<24x32xf32>
    %cst_313 = arith.constant 9.99999974E-6 : f32
    %451 = vector.broadcast %cst_313 : f32 to vector<24x1xf32>
    %452 = arith.addf %448, %451 : vector<24x1xf32>
    %453 = math.rsqrt %452 : vector<24x1xf32>
    %454 = vector.broadcast %453 : vector<24x1xf32> to vector<24x32xf32>
    %455 = arith.mulf %450, %454 : vector<24x32xf32>
    %456 = vector.broadcast %435 : vector<1x32xf32> to vector<24x32xf32>
    %457 = arith.mulf %455, %456 : vector<24x32xf32>
    %458 = vector.broadcast %437 : vector<1x32xf32> to vector<24x32xf32>
    %459 = arith.addf %457, %458 : vector<24x32xf32>
    %c0_314 = arith.constant 0 : index
    %c0_315 = arith.constant 0 : index
    %c0_316 = arith.constant 0 : index
    %460 = vector.load %arg30[%c0_314, %c0_315, %c0_316] : memref<1x32x64xf32, #tpu.memory_space<vmem>>, vector<1x32x64xf32>
    %461 = vector.shape_cast %460 : vector<1x32x64xf32> to vector<32x64xf32>
    %cst_317 = arith.constant dense<0.000000e+00> : vector<24x64xf32>
    %462 = tpu.matmul %459, %461, %cst_317 {dimension_numbers = #tpu.dot_dimension_numbers<[1], [0], [0], [1], [0, 0, 1, 1], [], []>} : vector<24x32xf32>, vector<32x64xf32>, vector<24x64xf32> -> vector<24x64xf32>
    %c0_318 = arith.constant 0 : index
    %c0_319 = arith.constant 0 : index
    %c0_320 = arith.constant 0 : index
    %463 = vector.load %arg31[%c0_318, %c0_319, %c0_320] : memref<1x1x64xf32, #tpu.memory_space<vmem>>, vector<1x1x64xf32>
    %464 = vector.shape_cast %463 : vector<1x1x64xf32> to vector<1x64xf32>
    %465 = vector.broadcast %464 : vector<1x64xf32> to vector<24x64xf32>
    %466 = arith.addf %462, %465 : vector<24x64xf32>
    %cst_321 = arith.constant 0.000000e+00 : f32
    %467 = vector.broadcast %cst_321 : f32 to vector<24x64xf32>
    %468 = arith.maximumf %466, %467 : vector<24x64xf32>
    %c0_322 = arith.constant 0 : index
    %c0_323 = arith.constant 0 : index
    %c0_324 = arith.constant 0 : index
    %469 = vector.load %arg32[%c0_322, %c0_323, %c0_324] : memref<1x64x32xf32, #tpu.memory_space<vmem>>, vector<1x64x32xf32>
    %470 = vector.shape_cast %469 : vector<1x64x32xf32> to vector<64x32xf32>
    %cst_325 = arith.constant dense<0.000000e+00> : vector<24x32xf32>
    %471 = tpu.matmul %468, %470, %cst_325 {dimension_numbers = #tpu.dot_dimension_numbers<[1], [0], [0], [1], [0, 0, 1, 1], [], []>} : vector<24x64xf32>, vector<64x32xf32>, vector<24x32xf32> -> vector<24x32xf32>
    %c0_326 = arith.constant 0 : index
    %c0_327 = arith.constant 0 : index
    %c0_328 = arith.constant 0 : index
    %472 = vector.load %arg33[%c0_326, %c0_327, %c0_328] : memref<1x1x32xf32, #tpu.memory_space<vmem>>, vector<1x1x32xf32>
    %473 = vector.shape_cast %472 : vector<1x1x32xf32> to vector<1x32xf32>
    %474 = vector.broadcast %473 : vector<1x32xf32> to vector<24x32xf32>
    %475 = arith.addf %471, %474 : vector<24x32xf32>
    %476 = arith.addf %459, %475 : vector<24x32xf32>
    %c0_329 = arith.constant 0 : index
    %c0_330 = arith.constant 0 : index
    %c0_331 = arith.constant 0 : index
    %477 = vector.load %arg34[%c0_329, %c0_330, %c0_331] : memref<1x1x32xf32, #tpu.memory_space<vmem>>, vector<1x1x32xf32>
    %478 = vector.shape_cast %477 : vector<1x1x32xf32> to vector<1x32xf32>
    %c0_332 = arith.constant 0 : index
    %c0_333 = arith.constant 0 : index
    %c0_334 = arith.constant 0 : index
    %479 = vector.load %arg35[%c0_332, %c0_333, %c0_334] : memref<1x1x32xf32, #tpu.memory_space<vmem>>, vector<1x1x32xf32>
    %480 = vector.shape_cast %479 : vector<1x1x32xf32> to vector<1x32xf32>
    %cst_335 = arith.constant dense<0.000000e+00> : vector<24xf32>
    %481 = vector.multi_reduction <add>, %476, %cst_335 [1] : vector<24x32xf32> to vector<24xf32>
    %482 = vector.shape_cast %481 : vector<24xf32> to vector<24x1xf32>
    %cst_336 = arith.constant 3.200000e+01 : f32
    %483 = vector.broadcast %cst_336 : f32 to vector<24x1xf32>
    %484 = arith.divf %482, %483 : vector<24x1xf32>
    %485 = vector.broadcast %484 : vector<24x1xf32> to vector<24x32xf32>
    %486 = arith.subf %476, %485 : vector<24x32xf32>
    %487 = arith.mulf %486, %486 : vector<24x32xf32>
    %cst_337 = arith.constant dense<0.000000e+00> : vector<24xf32>
    %488 = vector.multi_reduction <add>, %487, %cst_337 [1] : vector<24x32xf32> to vector<24xf32>
    %489 = vector.shape_cast %488 : vector<24xf32> to vector<24x1xf32>
    %cst_338 = arith.constant 3.200000e+01 : f32
    %490 = vector.broadcast %cst_338 : f32 to vector<24x1xf32>
    %491 = arith.divf %489, %490 : vector<24x1xf32>
    %492 = vector.broadcast %484 : vector<24x1xf32> to vector<24x32xf32>
    %493 = arith.subf %476, %492 : vector<24x32xf32>
    %cst_339 = arith.constant 9.99999974E-6 : f32
    %494 = vector.broadcast %cst_339 : f32 to vector<24x1xf32>
    %495 = arith.addf %491, %494 : vector<24x1xf32>
    %496 = math.rsqrt %495 : vector<24x1xf32>
    %497 = vector.broadcast %496 : vector<24x1xf32> to vector<24x32xf32>
    %498 = arith.mulf %493, %497 : vector<24x32xf32>
    %499 = vector.broadcast %478 : vector<1x32xf32> to vector<24x32xf32>
    %500 = arith.mulf %498, %499 : vector<24x32xf32>
    %501 = vector.broadcast %480 : vector<1x32xf32> to vector<24x32xf32>
    %502 = arith.addf %500, %501 : vector<24x32xf32>
    %503 = vector.extract_strided_slice %502 {offsets = [16, 0], sizes = [8, 32], strides = [1, 1]} : vector<24x32xf32> to vector<8x32xf32>
    %c0_340 = arith.constant 0 : index
    %c0_341 = arith.constant 0 : index
    %504 = vector.load %arg38[%c0_340, %c0_341] : memref<8x32xf32, #tpu.memory_space<vmem>>, vector<8x32xf32>
    %505 = arith.mulf %503, %504 : vector<8x32xf32>
    %cst_342 = arith.constant dense<0.000000e+00> : vector<8xf32>
    %506 = vector.multi_reduction <add>, %505, %cst_342 [1] : vector<8x32xf32> to vector<8xf32>
    %507 = vector.shape_cast %506 : vector<8xf32> to vector<8x1xf32>
    %c0_343 = arith.constant 0 : index
    %c0_344 = arith.constant 0 : index
    %508 = vector.load %arg39[%c0_343, %c0_344] : memref<8x1xf32, #tpu.memory_space<vmem>>, vector<8x1xf32>
    %509 = arith.addf %507, %508 : vector<8x1xf32>
    %510 = tpu.transpose %509, [1, 0] : vector<8x1xf32> -> vector<1x8xf32>
    %c0_345 = arith.constant 0 : index
    %c0_346 = arith.constant 0 : index
    %c0_347 = arith.constant 0 : index
    %511 = vector.load %arg40[%c0_345, %c0_346, %c0_347] : memref<1x1x8xf32, #tpu.memory_space<vmem>>, vector<1x1x8xf32>
    %512 = vector.shape_cast %511 : vector<1x1x8xf32> to vector<1x8xf32>
    %513 = vector.shape_cast %510 : vector<1x8xf32> to vector<1x1x8xf32>
    tpu.vector_store %arg40[%c0_345, %c0_346, %c0_347], %513 {strides = array<i32>} : memref<1x1x8xf32, #tpu.memory_space<vmem>>, vector<1x1x8xf32>,
    return
  }
  func.func @transform_0(%arg0: i32) -> (i32, i32, i32) {
    %c0_i32 = arith.constant 0 : i32
    %c0_i32_0 = arith.constant 0 : i32
    %c0_i32_1 = arith.constant 0 : i32
    return %arg0, %c0_i32, %c0_i32_0 : i32, i32, i32
  }
  func.func @transform_1(%arg0: i32) -> (i32, i32, i32) {
    %c0_i32 = arith.constant 0 : i32
    %c0_i32_0 = arith.constant 0 : i32
    %c0_i32_1 = arith.constant 0 : i32
    return %arg0, %c0_i32, %c0_i32_0 : i32, i32, i32
  }
  func.func @transform_2(%arg0: i32) -> (i32, i32) {
    %c0_i32 = arith.constant 0 : i32
    %c0_i32_0 = arith.constant 0 : i32
    %c0_i32_1 = arith.constant 0 : i32
    return %c0_i32, %c0_i32_0 : i32, i32
  }
  func.func @transform_3(%arg0: i32) -> (i32, i32, i32) {
    %c0_i32 = arith.constant 0 : i32
    %c0_i32_0 = arith.constant 0 : i32
    %c0_i32_1 = arith.constant 0 : i32
    %c0_i32_2 = arith.constant 0 : i32
    return %c0_i32, %c0_i32_0, %c0_i32_1 : i32, i32, i32
  }
  func.func @transform_4(%arg0: i32) -> (i32, i32, i32) {
    %c0_i32 = arith.constant 0 : i32
    %c0_i32_0 = arith.constant 0 : i32
    %c0_i32_1 = arith.constant 0 : i32
    %c0_i32_2 = arith.constant 0 : i32
    return %c0_i32, %c0_i32_0, %c0_i32_1 : i32, i32, i32
  }
  func.func @transform_5(%arg0: i32) -> (i32, i32, i32) {
    %c0_i32 = arith.constant 0 : i32
    %c0_i32_0 = arith.constant 0 : i32
    %c0_i32_1 = arith.constant 0 : i32
    %c0_i32_2 = arith.constant 0 : i32
    return %c0_i32, %c0_i32_0, %c0_i32_1 : i32, i32, i32
  }
  func.func @transform_6(%arg0: i32) -> (i32, i32, i32) {
    %c0_i32 = arith.constant 0 : i32
    %c0_i32_0 = arith.constant 0 : i32
    %c0_i32_1 = arith.constant 0 : i32
    %c0_i32_2 = arith.constant 0 : i32
    return %c0_i32, %c0_i32_0, %c0_i32_1 : i32, i32, i32
  }
  func.func @transform_7(%arg0: i32) -> (i32, i32, i32) {
    %c0_i32 = arith.constant 0 : i32
    %c0_i32_0 = arith.constant 0 : i32
    %c0_i32_1 = arith.constant 0 : i32
    %c0_i32_2 = arith.constant 0 : i32
    return %c0_i32, %c0_i32_0, %c0_i32_1 : i32, i32, i32
  }
  func.func @transform_8(%arg0: i32) -> (i32, i32, i32) {
    %c0_i32 = arith.constant 0 : i32
    %c0_i32_0 = arith.constant 0 : i32
    %c0_i32_1 = arith.constant 0 : i32
    %c0_i32_2 = arith.constant 0 : i32
    return %c0_i32, %c0_i32_0, %c0_i32_1 : i32, i32, i32
  }
  func.func @transform_9(%arg0: i32) -> (i32, i32, i32) {
    %c0_i32 = arith.constant 0 : i32
    %c0_i32_0 = arith.constant 0 : i32
    %c0_i32_1 = arith.constant 0 : i32
    %c0_i32_2 = arith.constant 0 : i32
    return %c0_i32, %c0_i32_0, %c0_i32_1 : i32, i32, i32
  }
  func.func @transform_10(%arg0: i32) -> (i32, i32, i32) {
    %c0_i32 = arith.constant 0 : i32
    %c0_i32_0 = arith.constant 0 : i32
    %c0_i32_1 = arith.constant 0 : i32
    %c0_i32_2 = arith.constant 0 : i32
    return %c0_i32, %c0_i32_0, %c0_i32_1 : i32, i32, i32
  }
  func.func @transform_11(%arg0: i32) -> (i32, i32, i32) {
    %c0_i32 = arith.constant 0 : i32
    %c0_i32_0 = arith.constant 0 : i32
    %c0_i32_1 = arith.constant 0 : i32
    %c0_i32_2 = arith.constant 0 : i32
    return %c0_i32, %c0_i32_0, %c0_i32_1 : i32, i32, i32
  }
  func.func @transform_12(%arg0: i32) -> (i32, i32, i32) {
    %c0_i32 = arith.constant 0 : i32
    %c0_i32_0 = arith.constant 0 : i32
    %c0_i32_1 = arith.constant 0 : i32
    %c0_i32_2 = arith.constant 0 : i32
    return %c0_i32, %c0_i32_0, %c0_i32_1 : i32, i32, i32
  }
  func.func @transform_13(%arg0: i32) -> (i32, i32, i32) {
    %c0_i32 = arith.constant 0 : i32
    %c0_i32_0 = arith.constant 0 : i32
    %c0_i32_1 = arith.constant 0 : i32
    %c0_i32_2 = arith.constant 0 : i32
    return %c0_i32, %c0_i32_0, %c0_i32_1 : i32, i32, i32
  }
  func.func @transform_14(%arg0: i32) -> (i32, i32, i32) {
    %c0_i32 = arith.constant 0 : i32
    %c0_i32_0 = arith.constant 0 : i32
    %c0_i32_1 = arith.constant 0 : i32
    %c0_i32_2 = arith.constant 0 : i32
    return %c0_i32, %c0_i32_0, %c0_i32_1 : i32, i32, i32
  }
  func.func @transform_15(%arg0: i32) -> (i32, i32, i32) {
    %c0_i32 = arith.constant 0 : i32
    %c0_i32_0 = arith.constant 0 : i32
    %c0_i32_1 = arith.constant 0 : i32
    %c0_i32_2 = arith.constant 0 : i32
    return %c0_i32, %c0_i32_0, %c0_i32_1 : i32, i32, i32
  }
  func.func @transform_16(%arg0: i32) -> (i32, i32, i32) {
    %c0_i32 = arith.constant 0 : i32
    %c0_i32_0 = arith.constant 0 : i32
    %c0_i32_1 = arith.constant 0 : i32
    %c0_i32_2 = arith.constant 0 : i32
    return %c0_i32, %c0_i32_0, %c0_i32_1 : i32, i32, i32
  }
  func.func @transform_17(%arg0: i32) -> (i32, i32, i32) {
    %c0_i32 = arith.constant 0 : i32
    %c0_i32_0 = arith.constant 0 : i32
    %c0_i32_1 = arith.constant 0 : i32
    %c0_i32_2 = arith.constant 0 : i32
    return %c0_i32, %c0_i32_0, %c0_i32_1 : i32, i32, i32
  }
  func.func @transform_18(%arg0: i32) -> (i32, i32, i32) {
    %c0_i32 = arith.constant 0 : i32
    %c0_i32_0 = arith.constant 0 : i32
    %c0_i32_1 = arith.constant 0 : i32
    %c0_i32_2 = arith.constant 0 : i32
    return %c0_i32, %c0_i32_0, %c0_i32_1 : i32, i32, i32
  }
  func.func @transform_19(%arg0: i32) -> (i32, i32, i32) {
    %c0_i32 = arith.constant 0 : i32
    %c0_i32_0 = arith.constant 0 : i32
    %c0_i32_1 = arith.constant 0 : i32
    %c0_i32_2 = arith.constant 0 : i32
    return %c0_i32, %c0_i32_0, %c0_i32_1 : i32, i32, i32
  }
  func.func @transform_20(%arg0: i32) -> (i32, i32, i32) {
    %c0_i32 = arith.constant 0 : i32
    %c0_i32_0 = arith.constant 0 : i32
    %c0_i32_1 = arith.constant 0 : i32
    %c0_i32_2 = arith.constant 0 : i32
    return %c0_i32, %c0_i32_0, %c0_i32_1 : i32, i32, i32
  }
  func.func @transform_21(%arg0: i32) -> (i32, i32, i32) {
    %c0_i32 = arith.constant 0 : i32
    %c0_i32_0 = arith.constant 0 : i32
    %c0_i32_1 = arith.constant 0 : i32
    %c0_i32_2 = arith.constant 0 : i32
    return %c0_i32, %c0_i32_0, %c0_i32_1 : i32, i32, i32
  }
  func.func @transform_22(%arg0: i32) -> (i32, i32, i32) {
    %c0_i32 = arith.constant 0 : i32
    %c0_i32_0 = arith.constant 0 : i32
    %c0_i32_1 = arith.constant 0 : i32
    %c0_i32_2 = arith.constant 0 : i32
    return %c0_i32, %c0_i32_0, %c0_i32_1 : i32, i32, i32
  }
  func.func @transform_23(%arg0: i32) -> (i32, i32, i32) {
    %c0_i32 = arith.constant 0 : i32
    %c0_i32_0 = arith.constant 0 : i32
    %c0_i32_1 = arith.constant 0 : i32
    %c0_i32_2 = arith.constant 0 : i32
    return %c0_i32, %c0_i32_0, %c0_i32_1 : i32, i32, i32
  }
  func.func @transform_24(%arg0: i32) -> (i32, i32, i32) {
    %c0_i32 = arith.constant 0 : i32
    %c0_i32_0 = arith.constant 0 : i32
    %c0_i32_1 = arith.constant 0 : i32
    %c0_i32_2 = arith.constant 0 : i32
    return %c0_i32, %c0_i32_0, %c0_i32_1 : i32, i32, i32
  }
  func.func @transform_25(%arg0: i32) -> (i32, i32, i32) {
    %c0_i32 = arith.constant 0 : i32
    %c0_i32_0 = arith.constant 0 : i32
    %c0_i32_1 = arith.constant 0 : i32
    %c0_i32_2 = arith.constant 0 : i32
    return %c0_i32, %c0_i32_0, %c0_i32_1 : i32, i32, i32
  }
  func.func @transform_26(%arg0: i32) -> (i32, i32, i32) {
    %c0_i32 = arith.constant 0 : i32
    %c0_i32_0 = arith.constant 0 : i32
    %c0_i32_1 = arith.constant 0 : i32
    %c0_i32_2 = arith.constant 0 : i32
    return %c0_i32, %c0_i32_0, %c0_i32_1 : i32, i32, i32
  }
  func.func @transform_27(%arg0: i32) -> (i32, i32, i32) {
    %c0_i32 = arith.constant 0 : i32
    %c0_i32_0 = arith.constant 0 : i32
    %c0_i32_1 = arith.constant 0 : i32
    %c0_i32_2 = arith.constant 0 : i32
    return %c0_i32, %c0_i32_0, %c0_i32_1 : i32, i32, i32
  }
  func.func @transform_28(%arg0: i32) -> (i32, i32, i32) {
    %c0_i32 = arith.constant 0 : i32
    %c0_i32_0 = arith.constant 0 : i32
    %c0_i32_1 = arith.constant 0 : i32
    %c0_i32_2 = arith.constant 0 : i32
    return %c0_i32, %c0_i32_0, %c0_i32_1 : i32, i32, i32
  }
  func.func @transform_29(%arg0: i32) -> (i32, i32, i32) {
    %c0_i32 = arith.constant 0 : i32
    %c0_i32_0 = arith.constant 0 : i32
    %c0_i32_1 = arith.constant 0 : i32
    %c0_i32_2 = arith.constant 0 : i32
    return %c0_i32, %c0_i32_0, %c0_i32_1 : i32, i32, i32
  }
  func.func @transform_30(%arg0: i32) -> (i32, i32, i32) {
    %c0_i32 = arith.constant 0 : i32
    %c0_i32_0 = arith.constant 0 : i32
    %c0_i32_1 = arith.constant 0 : i32
    %c0_i32_2 = arith.constant 0 : i32
    return %c0_i32, %c0_i32_0, %c0_i32_1 : i32, i32, i32
  }
  func.func @transform_31(%arg0: i32) -> (i32, i32, i32) {
    %c0_i32 = arith.constant 0 : i32
    %c0_i32_0 = arith.constant 0 : i32
    %c0_i32_1 = arith.constant 0 : i32
    %c0_i32_2 = arith.constant 0 : i32
    return %c0_i32, %c0_i32_0, %c0_i32_1 : i32, i32, i32
  }
  func.func @transform_32(%arg0: i32) -> (i32, i32, i32) {
    %c0_i32 = arith.constant 0 : i32
    %c0_i32_0 = arith.constant 0 : i32
    %c0_i32_1 = arith.constant 0 : i32
    %c0_i32_2 = arith.constant 0 : i32
    return %c0_i32, %c0_i32_0, %c0_i32_1 : i32, i32, i32
  }
  func.func @transform_33(%arg0: i32) -> (i32, i32, i32) {
    %c0_i32 = arith.constant 0 : i32
    %c0_i32_0 = arith.constant 0 : i32
    %c0_i32_1 = arith.constant 0 : i32
    %c0_i32_2 = arith.constant 0 : i32
    return %c0_i32, %c0_i32_0, %c0_i32_1 : i32, i32, i32
  }
  func.func @transform_34(%arg0: i32) -> (i32, i32, i32) {
    %c0_i32 = arith.constant 0 : i32
    %c0_i32_0 = arith.constant 0 : i32
    %c0_i32_1 = arith.constant 0 : i32
    %c0_i32_2 = arith.constant 0 : i32
    return %c0_i32, %c0_i32_0, %c0_i32_1 : i32, i32, i32
  }
  func.func @transform_35(%arg0: i32) -> (i32, i32) {
    %c0_i32 = arith.constant 0 : i32
    %c0_i32_0 = arith.constant 0 : i32
    %c0_i32_1 = arith.constant 0 : i32
    return %c0_i32, %c0_i32_0 : i32, i32
  }
  func.func @transform_36(%arg0: i32) -> (i32, i32) {
    %c0_i32 = arith.constant 0 : i32
    %c0_i32_0 = arith.constant 0 : i32
    %c0_i32_1 = arith.constant 0 : i32
    return %c0_i32, %c0_i32_0 : i32, i32
  }
  func.func @transform_37(%arg0: i32) -> (i32, i32) {
    %c0_i32 = arith.constant 0 : i32
    %c0_i32_0 = arith.constant 0 : i32
    %c0_i32_1 = arith.constant 0 : i32
    return %c0_i32, %c0_i32_0 : i32, i32
  }
  func.func @transform_38(%arg0: i32) -> (i32, i32) {
    %c0_i32 = arith.constant 0 : i32
    %c0_i32_0 = arith.constant 0 : i32
    %c0_i32_1 = arith.constant 0 : i32
    return %c0_i32, %c0_i32_0 : i32, i32
  }
  func.func @transform_39(%arg0: i32) -> (i32, i32, i32) {
    %c0_i32 = arith.constant 0 : i32
    %c0_i32_0 = arith.constant 0 : i32
    %c0_i32_1 = arith.constant 0 : i32
    return %arg0, %c0_i32, %c0_i32_0 : i32, i32, i32
  }
}

</mosaic_0001>

<bundles_post_ra>
// kernel: _lambda_.1
= control target key start
LH: loop header
LB: loop body
LE: loop exit
PB: predicated region body
PF: predicated region fallthrough
CT: control target
= control target key end

     0   :  { %s8177_s6 = smov 1   ;;  %s8178_s10 = smov 2   ;;  %s9488_s0 = inlined_call_operand.smem [shape: u32[40], index: -1, kind: input, shape index: {}] }
   0x1   :  { %s8231_s5 = sld [smem:[%s9488_s0]]   ;;  %s8179_s14 = smov 3  }
   0x2   :  { %s8236_s9 = sld [smem:[%s9488_s0 + %s8177_s6]]   ;;  %s8180_s18 = smov 4  }
   0x3   :  { %s8241_s13 = sld [smem:[%s9488_s0 + %s8178_s10]]   ;;  %s8181_s22 = smov 5  }
   0x4   :  { %s8246_s17 = sld [smem:[%s9488_s0 + %s8179_s14]]   ;;  %s8182_s26 = smov 6  }
   0x5   :  { %s8251_s21 = sld [smem:[%s9488_s0 + %s8180_s18]]   ;;  %s8183_s30 = smov 7  }
   0x6   :  { %s8256_s25 = sld [smem:[%s9488_s0 + %s8181_s22]]   ;;  %s8184_s4 = smov 8  }
   0x7   :  { %9510 = sst [smem:[#allocation6_spill]] %s8231_s5  ;;  %s8185_s10 = smov 9  }
   0x8   :  { %9511 = sst [smem:[#allocation7_spill]] %s8236_s9  ;;  %s8186_s15 = smov 10  }
   0x9   :  { %s8261_s29 = sld [smem:[%s9488_s0 + %s8182_s26]]   ;;  %s8187_s20 = smov 11  }
   0xa   :  { %9512 = sst [smem:[#allocation8_spill]] %s8246_s17  ;;  %s8188_s26 = smov 12  }
   0xb   :  { %s8266_s3 = sld [smem:[%s9488_s0 + %s8183_s30]]   ;;  %s8189_s1 = smov 13  }
   0xc   :  { %s8271_s8 = sld [smem:[%s9488_s0 + %s8184_s4]]   ;;  %s8190_s7 = smov 14  }
   0xd   :  { %s8276_s14 = sld [smem:[%s9488_s0 + %s8185_s10]]   ;;  %s8192_s22 = smov 16  }
   0xe   :  { %s8281_s19 = sld [smem:[%s9488_s0 + %s8186_s15]]   ;;  %s8191_s15 = smov 15  }
   0xf   :  { %s8286_s24 = sld [smem:[%s9488_s0 + %s8187_s20]]   ;;  %s8193_s28 = smov 17  }
  0x10   :  { %s8291_s30 = sld [smem:[%s9488_s0 + %s8188_s26]]  }
  0x11   :  { %9513 = sst [smem:[#allocation9_spill]] %s8266_s3 }
  0x12   :  { %9514 = sst [smem:[#allocation10_spill]] %s8271_s8 }
  0x13   :  { %s8296_s6 = sld [smem:[%s9488_s0 + %s8189_s1]]  }
  0x14   :  { %s8301_s12 = sld [smem:[%s9488_s0 + %s8190_s7]]   ;;  %s8194_s7 = smov 18  }
  0x15   :  { %s8306_s20 = sld [smem:[%s9488_s0 + %s8191_s15]]   ;;  %s8195_s15 = smov 19  }
  0x16   :  { %9515 = sst [smem:[#allocation11_spill]] %s8291_s30 }
  0x17   :  { %s8311_s27 = sld [smem:[%s9488_s0 + %s8192_s22]]   ;;  %s8196_s22 = smov 20  }
  0x18   :  { %s8316_s4 = sld [smem:[%s9488_s0 + %s8193_s28]]   ;;  %s8197_s28 = smov 21  }
  0x19   :  { %9516 = sst [smem:[#allocation12_spill]] %s8296_s6 }
  0x1a   :  { %9517 = sst [smem:[#allocation13_spill]] %s8301_s12 }
  0x1b   :  { %s8321_s12 = sld [smem:[%s9488_s0 + %s8194_s7]]   ;;  %s8198_s7 = smov 22  }
  0x1c   :  { %s8326_s30 = sld [smem:[%s9488_s0 + %s8195_s15]]   ;;  %s8199_s15 = smov 23  }
  0x1d   :  { %9518 = sst [smem:[#allocation14_spill]] %s8311_s27 }
  0x1e   :  { %9519 = sst [smem:[#allocation15_spill]] %s8316_s4 }
  0x1f   :  { %s8331_s27 = sld [smem:[%s9488_s0 + %s8196_s22]]   ;;  %s8200_s22 = smov 24  }
  0x20   :  { %s8336_s4 = sld [smem:[%s9488_s0 + %s8197_s28]]   ;;  %s8201_s28 = smov 25  }
  0x21   :  { %9520 = sst [smem:[#allocation16_spill]] %s8321_s12 }
  0x22   :  { %9521 = sst [smem:[#allocation17_spill]] %s8326_s30 }
  0x23   :  { %s8341_s12 = sld [smem:[%s9488_s0 + %s8198_s7]]   ;;  %s8202_s7 = smov 26  }
  0x24   :  { %s8346_s30 = sld [smem:[%s9488_s0 + %s8199_s15]]   ;;  %s8203_s15 = smov 27  }
  0x25   :  { %9522 = sst [smem:[#allocation18_spill]] %s8331_s27 }
  0x26   :  { %9523 = sst [smem:[#allocation19_spill]] %s8336_s4 }
  0x27   :  { %s8351_s27 = sld [smem:[%s9488_s0 + %s8200_s22]]   ;;  %s8204_s22 = smov 28  }
  0x28   :  { %s8356_s4 = sld [smem:[%s9488_s0 + %s8201_s28]]   ;;  %s8205_s28 = smov 29  }
  0x29   :  { %9524 = sst [smem:[#allocation20_spill]] %s8341_s12 }
  0x2a   :  { %9525 = sst [smem:[#allocation21_spill]] %s8346_s30 }
  0x2b   :  { %s8361_s12 = sld [smem:[%s9488_s0 + %s8202_s7]]   ;;  %s8206_s7 = smov 30  }
  0x2c   :  { %s8366_s30 = sld [smem:[%s9488_s0 + %s8203_s15]]   ;;  %s8207_s15 = smov 31  }
  0x2d   :  { %9526 = sst [smem:[#allocation22_spill]] %s8351_s27 }
  0x2e   :  { %9527 = sst [smem:[#allocation23_spill]] %s8356_s4 }
  0x2f   :  { %s8371_s27 = sld [smem:[%s9488_s0 + %s8204_s22]]   ;;  %s8208_s22 = smov 32  }
  0x30   :  { %s8376_s4 = sld [smem:[%s9488_s0 + %s8205_s28]]   ;;  %s8209_s28 = smov 33  }
  0x31   :  { %9528 = sst [smem:[#allocation24_spill]] %s8361_s12 }
  0x32   :  { %9529 = sst [smem:[#allocation25_spill]] %s8366_s30 }
  0x33   :  { %s8381_s12 = sld [smem:[%s9488_s0 + %s8206_s7]]   ;;  %s8210_s7 = smov 34  }
  0x34   :  { %s8386_s30 = sld [smem:[%s9488_s0 + %s8207_s15]]   ;;  %s8211_s15 = smov 35  }
  0x35   :  { %9530 = sst [smem:[#allocation26_spill]] %s8371_s27 }
  0x36   :  { %9531 = sst [smem:[#allocation27_spill]] %s8376_s4 }
  0x37   :  { %s8391_s27 = sld [smem:[%s9488_s0 + %s8208_s22]]   ;;  %s8212_s22 = smov 36  }
  0x38   :  { %s8396_s4 = sld [smem:[%s9488_s0 + %s8209_s28]]   ;;  %s8213_s28 = smov 37  }
  0x39   :  { %9532 = sst [smem:[#allocation28_spill]] %s8381_s12 }
  0x3a   :  { %9533 = sst [smem:[#allocation29_spill]] %s8386_s30 }
  0x3b   :  { %s8401_s12 = sld [smem:[%s9488_s0 + %s8210_s7]]   ;;  %s8214_s7 = smov 38  }
  0x3c   :  { %s8406_s30 = sld [smem:[%s9488_s0 + %s8211_s15]]   ;;  %s8215_s15 = smov 39  }
  0x3d   :  { %9534 = sst [smem:[#allocation30_spill]] %s8391_s27 }
  0x3e   :  { %9535 = sst [smem:[#allocation31_spill]] %s8396_s4 }
  0x3f   :  { %s8411_s27 = sld [smem:[%s9488_s0 + %s8212_s22]]  }
  0x40   :  { %s8416_s4 = sld [smem:[%s9488_s0 + %s8213_s28]]  }
  0x41   :  { %9536 = sst [smem:[#allocation32_spill]] %s8401_s12 }
  0x42   :  { %9537 = sst [smem:[#allocation33_spill]] %s8406_s30 }
  0x43   :  { %s8421_s12 = sld [smem:[%s9488_s0 + %s8214_s7]]  }
  0x44   :  { %s8426_s30 = sld [smem:[%s9488_s0 + %s8215_s15]]  }
  0x46   :  { %9538 = sst [smem:[#allocation34_spill]] %s8416_s4 }
  0x47   :  { %84 = vsyncpa [#allocation4], 0 }
  0x48   :  { %86 = vsyncpa [#allocation4 + $0x1], 0  ;;  %s8428_s22 = smov 0   ;;  %s8430_s23 = smov 0  }
  0x49   :  { %s8432_s26 = smov 0   ;;  %s8434_s28 = smov 0  }
  0x4a LB: > { %s9539_s6 = sld [smem:[#allocation12_spill]]  ;;  %s9540_s3 = sld [smem:[#allocation9_spill]]  ;;  %s8171_s26 = sphi %s8432_s26, %s9577_s26   ;;  %s8167_s23 = sphi %s8430_s23, %s9576_s23   ;;  %s8163_s22 = sphi %s8428_s22, %s9575_s22   ;;  %s8175_s28 = sphi %s8434_s28, %s9578_s28  }
  0x4b   : > { %s9541_s17 = sld [smem:[#allocation8_spill]]  ;;  %s8449_s0 = sadd.s32 4294967295, %s8175_s28  }
  0x4c   : > { %s6413_s1 = sadd.s32 4294967294, %s8175_s28   ;;  %s8453_s2 = sadd.s32 1, %s8175_s28  }
  0x4d   : > { %s928_s7 = sadd.s32 1, %s8171_s26  ;;  %s925_s10 = ssub.s32 %s8175_s28, %s8453_s2 }
  0x4e   : > { %p938_p0 = scmp.ne.s32.totalorder %s8171_s26, %s8167_s23  ;;  %p926_p1 = scmp.eq.s32.totalorder %s925_s10, 0 }
  0x4f   : > { %p939_p2 = scmp.eq.s32.totalorder %s8449_s0, 1  ;;  %p944_p3 = scmp.ne.s32.totalorder %s8167_s23, %s8163_s22 }
  0x50   : > { %p945_p4 = scmp.eq.s32.totalorder %s6413_s1, 1  ;;  %p6416_p7 = scmp.ge.s32.totalorder %s8175_s28, 1 }
  0x51   : > { %s8464_s11 = scalar_select %p926_p1, %s8171_s26, %s928_s7  }
  0x52   : > { %p8466_p5 = por %p939_p2, %p938_p0  ;;  %p8470_p6 = por %p945_p4, %p944_p3 }
  0x53   : > { %p1089_p8 = scmp.lt.s32.totalorder %s8175_s28, 3 }
  0x55   : > { %p1090_p9 = pnand %p6416_p7, %p1089_p8 }
  0x56   : > { %v8477_v0 = vld [vmem:[%s9541_s17] sm:$0xff] (!%p1090_p9)  ;;  %v8480_v1 = vld [vmem:[%s9541_s17 + $0x8] sm:$0xff] (!%p1090_p9)  ;;  %v8483_v2 = vld [vmem:[%s9541_s17 + $0x10] sm:$0xff] (!%p1090_p9)  ;;  %v8216_v3 = vmov (!%p1090_p9), 0.0|0.0   ;;  %vm8217_vm0 = vmmov (!%p1090_p9), 0   ;;  %v8218_v6 = vmov (!%p1090_p9), 0.0  }
  0x57   : > { %1093 = sbr.rel (%p1090_p9) target bundleno = 10614 (0x2976), region = 176  ;;  %7506 = vmatprep.subr.bf16.mxu0 (!%p1090_p9), %v8216_v3  ;;  %v7507_v4 = vpack.c.bf16 (!%p1090_p9), %v8480_v1, %v8477_v0  ;;  %v8489_v5 = vld [vmem:[%s9541_s17 + $0x18] sm:$0xff] (!%p1090_p9)  ;;  %6866 = vmatprep.mubr.msk.f32.mxu0 (!%p1090_p9), %vm8217_vm0, %v8218_v6  ;;  %p1188_p10 = scmp.lt.s32.totalorder (!%p1090_p9), %s8449_s0, 1  ;;  %v8495_v7 = vld [vmem:[%s8256_s25] sm:$0xff] (!%p1090_p9)  ;;  %v8498_v8 = vld [vmem:[%s8256_s25 + $0x8] sm:$0xff] (!%p1090_p9)  ;;  %vm1215_vm1 = vcmask (!%p1090_p9), 261120   ;;  %v8602_v53 = vpack.i.bf16 (!%p1090_p9), %v8480_v1, %v8477_v0 }
  0x58   : > { %s9544_s5 = sld [smem:[#allocation6_spill]] (!%p1090_p9)  ;;  %s9545_s9 = sld [smem:[#allocation7_spill]] (!%p1090_p9)  ;;  %7528 = vmatprep.subr.bf16.mxu1 (!%p1090_p9), %v8216_v3  ;;  %6895 = vmatprep.mubr.msk.f32.mxu1 (!%p1090_p9), %vm8217_vm0, %v8218_v6  ;;  %v7510_v9 = vpack.c.bf16 (!%p1090_p9), %v8489_v5, %v8483_v2  ;;  %v1199_v10 = vld [vmem:[%s8241_s13] sm:$0xff] (!%p1090_p9)  ;;  %v7512_v11 = vpack.c.bf16 (!%p1090_p9), %v8498_v8, %v8495_v7  ;;  %v1200_v12 = vld [vmem:[%s8241_s13 + $0x8] sm:$0xff] (!%p1090_p9)  ;;  %v1292_v13 = vld [vmem:[%s8256_s25 + $0x10] sm:$0xff] (!%p1090_p9)  ;;  %vm1468_vm2 = vcmask (!%p1090_p9), 64512   ;;  %v8578_v42 = vpack.i.bf16 (!%p1090_p9), %v8498_v8, %v8495_v7 }
  0x59   : > { %7508 = vmatpush3.bf16.msra.mxu0 (!%p1090_p9), %v7507_v4  ;;  %v1293_v14 = vld [vmem:[%s8256_s25 + $0x18] sm:$0xff] (!%p1090_p9)  ;;  %v8534_v23 = vld [vmem:[%s8261_s29] ss:$0 sm:$0xff] (!%p1090_p9)  ;;  %vm8540_vm3 = vmpackc.low (!%p1090_p9), %vm1468_vm2, %vm1468_vm2  ;;  %vm1548_vm4 = vcmask (!%p1090_p9), 130048   ;;  %s9548_s8 = sld [smem:[#allocation10_spill]] (!%p1090_p9)  ;;  %v8588_v44 = vpack.i.bf16 (!%p1090_p9), %v8489_v5, %v8483_v2  ;;  %vm3369_vm5 = vcmask (!%p1090_p9), 523264  }
  0x5a   : > { %7509 = vmatprep.subr.bf16.mxu0 (!%p1090_p9), %v8216_v3  ;;  %v7516_v20 = vpack.c.bf16 (!%p1090_p9), %v1293_v14, %v1292_v13  ;;  %v8545_v29 = vld [vmem:[%s8251_s21] ss:$0 sm:$0xff] (!%p1090_p9)  ;;  %v8558_v34 = vld [vmem:[%s9540_s3 + $0x8] sm:$0xff] (!%p1090_p9)  ;;  %v8561_v35 = vld [vmem:[%s9540_s3 + $0x10] sm:$0xff] (!%p1090_p9)  ;;  %v8582_v43 = vpack.i.bf16 (!%p1090_p9), %v1293_v14, %v1292_v13  ;;  %vm3921_vm6 = vcmask (!%p1090_p9), 195584   ;;  %s9574_s4 = sld [smem:[#allocation34_spill]] (!%p1090_p9) }
  0x5b   : > { %v8555_v33 = vld [vmem:[%s9540_s3] sm:$0xff] (!%p1090_p9)  ;;  %v8566_v37 = vld [vmem:[%s9540_s3 + $0x18] sm:$0xff] (!%p1090_p9)  ;;  %s9560_s3 = sld [smem:[#allocation22_spill]] (!%p1090_p9)  ;;  %vm6292_vm7 = vcmask (!%p1090_p9), 57344  }
  0x5c   : > { %v7520_v36 = vpack.c.bf16 (!%p1090_p9), %v8558_v34, %v8555_v33  ;;  %v7524_v38 = vpack.c.bf16 (!%p1090_p9), %v8566_v37, %v8561_v35  ;;  %v8623_v14 = vpack.i.bf16 (!%p1090_p9), %v8558_v34, %v8555_v33 }
  0x5d   : > { %7511 = vmatpush3.bf16.msra.mxu0 (!%p1090_p9), %v7510_v9 }
  0x5e   : > { %s1189_s18 = scalar_select %p1188_p10, %s8449_s0, 1  ;;  %7513 = vmatprep.subr.bf16.mxu0 %v7512_v11 }
  0x5f   : > { %v8598_v51 = vld [vmem:[%s9548_s8] ss:$0 sm:$0xff] }
  0x60   : > { %s6577_s1 = sshll.u32 %s1189_s18, 4  ;;  %s6419_s7 = sshll.u32 %s1189_s18, 3 }
  0x61   : > { %s1192_s10 = scalar_lea.vmem %s9544_s5, %s6577_s1  ;;  %s1196_s17 = scalar_lea.vmem %s9545_s9, %s6419_s7 }
  0x62   : > { %v1197_v15 = vld [vmem:[%s1192_s10] sm:$0xff]  ;;  %v1198_v16 = vld [vmem:[%s1192_s10 + $0x8] sm:$0xff]  ;;  %s9499_s18 = smov 112   ;;  %s9497_s1 = smov 104  }
  0x63   : > { %v8515_v17 = vld [vmem:[%s1196_s17] sm:$0xff]  ;;  %v8517_v18 = vadd.f32 %v1199_v10, %v1197_v15  ;;  %v8519_v19 = vadd.f32 %v1200_v12, %v1198_v16  ;;  %s9501_s17 = smov 120   ;;  %v8629_v15 = vpack.i.bf16 %v8566_v37, %v8561_v35  ;;  %s9549_s7 = sld [smem:[#allocation11_spill]] }
  0x64   : > { %6867 = vmatmul.mubr.msk.f32.vlgmr.msra.gmra.mrb[0].mxu0 %vm1215_vm1, %v8515_v17  ;;  %7843 = vrot.lane.b32.xlu1 %v8578_v42, %s9501_s17  ;;  %s9550_s10 = sld [smem:[#allocation13_spill]]  ;;  %s9563_s5 = smov 112  }
  0x65   : > { %3473 = vst.msk [vmem:[#allocation2] sm:$0xff] %vm1215_vm1, %v8517_v18  ;;  %3474 = vst.msk [vmem:[#allocation2 + $0x8] sm:$0xff] %vm1215_vm1, %v8519_v19  ;;  %7515 = vmatpush3.bf16.msra.mxu0 %v7512_v11  ;;  %6877 = vmatprep.mubr.msk.f32.mxu0 %vm1215_vm1, %v8517_v18  ;;  %s8222_s9 = smov [#allocation3]  }
  0x66   : > { %7517 = vmatprep.subr.bf16.mxu0 %v7516_v20 }
  0x68   : > { %7848 = vrot.lane.b32.xlu1 %v8582_v43, %s9501_s17 }
  0x69   : > { %7519 = vmatpush3.bf16.msra.mxu0 %v7516_v20 }
  0x6a   : > { %7521 = vmatprep.subr.bf16.mxu0 %v7520_v36 }
  0x6c   : > { %6878 = vmatmul.mubr.msk.f32.vlgmr.msra.gmra.mrb[2].mxu0 %vm1215_vm1, %v8519_v19  ;;  %7858 = vrot.lane.b32.xlu1 %v8588_v44, %s9501_s17 }
  0x6d   : > { %6888 = vmatprep.mubr.msk.f32.mxu0 %vm1215_vm1, %v8517_v18  ;;  %7523 = vmatpush3.bf16.msra.mxu0 %v7520_v36 }
  0x6e   : > { %7525 = vmatprep.subr.bf16.mxu0 %v7524_v38 }
  0x70   : > { %1740 = vrot.lane.b32.xlu1 %v8534_v23, %s9501_s17 }
  0x71   : > { %7527 = vmatpush3.bf16.msra.mxu0 %v7524_v38 }
  0x72   : > { %7532 = vmatprep.subr.bf16.mxu0 %v8216_v3 }
  0x74   : > { %6889 = vmatmul.mubr.msk.f32.vlgmr.msra.gmra.mrb[4].mxu0 %vm1215_vm1, %v8519_v19  ;;  %1650 = vrot.lane.b32.xlu1 %v8545_v29, %s9501_s17 }
  0x75   : > { %6902 = vmatprep.mubr.msk.f32.mxu0 %vm8217_vm0, %v8218_v6 }
  0x78   : > { %7863 = vrot.lane.b32.xlu1 %v8623_v14, %s9501_s17 }
  0x7c   : > { %7868 = vrot.lane.b32.xlu1 %v8629_v15, %s9501_s17 }
  0xd6   : > { %v7844_v57 = vpop.permute.xlu1 %7843 }
  0xd7   : > { %v7846_v58 = vunpack.i.h.bf16 %v7844_v57  ;;  %v7845_v59 = vunpack.i.l.bf16 %v7844_v57 }
  0xd9   : > { %v7541_v60 = vpack.c.bf16 %v7846_v58, %v7845_v59  ;;  %v2075_v58 = vld [vmem:[%s8276_s14 + $0x8] sm:$0xff] }
  0xda   : > { %v7849_v61 = vpop.permute.xlu1 %7848 }
  0xdb   : > { %v7851_v8 = vunpack.i.h.bf16 %v7849_v61  ;;  %v7850_v9 = vunpack.i.l.bf16 %v7849_v61 }
  0xdd   : > { %v7545_v13 = vpack.c.bf16 %v7851_v8, %v7850_v9  ;;  %v1633_v8 = vld [vmem:[%s8276_s14] sm:$0xff] }
  0xde   : > { %v7859_v63 = vpop.permute.xlu1 %7858 }
  0xdf   : > { %v7861_v4 = vunpack.i.h.bf16 %v7859_v63  ;;  %v7860_v5 = vunpack.i.l.bf16 %v7859_v63 }
  0xe1   : > { %v7539_v10 = vpack.c.bf16 %v7861_v4, %v7860_v5 }
 0x137   : > { %v1285_v21 = vpop.f32.mrb[0].mxu0 }
 0x138   : > { %v6868_v22 = vpop.f32.mrb[1].mxu0  ;;  %v1286_v31 = vadd.f32 %v8545_v29, %v1285_v21 }
 0x13a   : > { %v1289_v32 = vmul.f32 0.35355338, %v1286_v31 }
 0x13f   : > { %v6879_v24 = vpop.f32.mrb[2].mxu0 }
 0x140   : > { %v1379_v25 = vadd.f32 %v6879_v24, %v8534_v23  ;;  %v1373_v26 = vpop.f32.mrb[3].mxu0  ;;  %v1741_v24 = vpop.permute.xlu1 %1740 }
 0x141   : > { %v1374_v27 = vadd.f32 %v8534_v23, %v1373_v26 }
 0x143   : > { %v7529_v30 = vpack.c.bf16 %v1379_v25, %v1374_v27 }
 0x144   : > { %v1651_v31 = vpop.permute.xlu1 %1650 }
 0x145   : > { %7531 = vmatpush3.bf16.xpose.msk.msra.mxu1 %vm8540_vm3, %v7529_v30 }
 0x146   : > { %7535 = vmatprep.subr.bf16.mxu1 %v8216_v3 }
 0x147   : > { %v6890_v50 = vpop.f32.mrb[4].mxu0 }
 0x148   : > { %v1459_v52 = vpop.f32.mrb[5].mxu0  ;;  %v1465_v54 = vadd.f32 %v6890_v50, %v8598_v51  ;;  %v7864_v35 = vpop.permute.xlu1 %7863 }
 0x149   : > { %v1460_v55 = vadd.f32 %v8598_v51, %v1459_v52  ;;  %v7866_v36 = vunpack.i.h.bf16 %v7864_v35  ;;  %v7865_v37 = vunpack.i.l.bf16 %v7864_v35 }
 0x14b   : > { %v7533_v56 = vpack.c.bf16 %v1465_v54, %v1460_v55  ;;  %v7549_v38 = vpack.c.bf16 %v7866_v36, %v7865_v37 }
 0x14c   : > { %6896 = vmatmul.mubr.msk.f32.vlgmr.msra.gmra.mrb[0].mxu1 %vm1468_vm2, %v1289_v32 }
 0x14d   : > { %6913 = vmatprep.mubr.msk.f32.mxu1 %vm8217_vm0, %v8218_v6  ;;  %7534 = vmatpush3.bf16.msra.mxu0 %v7533_v56 }
 0x14e   : > { %7542 = vmatprep.subr.bf16.mxu0 %v7541_v60 }
 0x21f   : > { %v1544_v39 = vpop.f32.mrb[0].mxu1 }
 0x220   : > { %v6897_v40 = vpop.f32.mrb[1].mxu1  ;;  %v1549_v41 = vsel %vm1548_vm4, %v1544_v39, -inf }
 0x221   : > { %1550 = vmax.xlane.f32.xlu0 %v1549_v41 }
 0x2ae   : > { %v1551_v45 = vpop.xlane.xlu0 %1550 }
 0x2af   : > { %v1552_v46 = vsub.f32 %v1544_v39, %v1551_v45  ;;  %v7869_v39 = vpop.permute.xlu1 %7868 }
 0x2b0   : > { %v7871_v40 = vunpack.i.h.bf16 %v7869_v39  ;;  %v7870_v41 = vunpack.i.l.bf16 %v7869_v39 }
 0x2b1   : > { %v1553_v47 = vmul.f32 1.442695, %v1552_v46 }
 0x2b2   : > { %v7553_v45 = vpack.c.bf16 %v7871_v40, %v7870_v41 }
 0x2b3   : > { %8022 = vpow2.f32 %v1553_v47 }
 0x2bd   : > { %v8023_v48 = vpop.eup %8022 }
 0x2be   : > { %v1555_v49 = vsel %vm1548_vm4, %v8023_v48, 0.0 }
 0x2bf   : > { %1556 = vadd.xlane.f32.xlu0 %v1555_v49 }
 0x2d5   : > { %7853 = vrot.lane.b32.xlu0 %v8602_v53, %s9501_s17 }
 0x34c   : > { %v1557_v62 = vpop.xlane.xlu0 %1556 }
 0x34d   : > { %8024 = vrcp.f32 %v1557_v62 }
 0x350   : > { %v7854_v0 = vpop.permute.xlu0 %7853 }
 0x351   : > { %v7856_v1 = vunpack.i.h.bf16 %v7854_v0  ;;  %v7855_v2 = vunpack.i.l.bf16 %v7854_v0 }
 0x353   : > { %v7536_v7 = vpack.c.bf16 %v7856_v1, %v7855_v2 }
 0x355   : > { %7537 = vmatpush3.bf16.msra.mxu1 %v7536_v7 }
 0x356   : > { %7538 = vmatprep.subr.bf16.mxu1 %v8216_v3 }
 0x357   : > { %v8025_v11 = vpop.eup %8024 }
 0x358   : > { %v1559_v12 = vmul.f32 %v8025_v11, %v8023_v48 }
 0x359   : > { %7540 = vmatpush3.bf16.msra.mxu1 %v7539_v10 }
 0x35a   : > { %6903 = vmatmul.mubr.msk.f32.vlgmr.msra.gmra.mrb[6].mxu0 %vm1548_vm4, %v1559_v12  ;;  %7550 = vmatprep.subr.bf16.mxu1 %v7549_v38 }
 0x35b   : > { %7544 = vmatpush3.bf16.msra.mxu0 %v7541_v60  ;;  %6924 = vmatprep.mubr.msk.f32.mxu0 %vm1215_vm1, %v8517_v18 }
 0x35c   : > { %7546 = vmatprep.subr.bf16.mxu0 %v7545_v13  ;;  %6914 = vmatmul.mubr.msk.f32.vlgmr.msra.gmra.mrb[2].mxu1 %vm1215_vm1, %v8515_v17 }
 0x35d   : > { %6935 = vmatprep.mubr.msk.f32.mxu1 %vm1215_vm1, %v8517_v18  ;;  %7552 = vmatpush3.bf16.msra.mxu1 %v7549_v38 }
 0x35e   : > { %7554 = vmatprep.subr.bf16.mxu1 %v7553_v45 }
 0x35f   : > { %7548 = vmatpush3.bf16.msra.mxu0 %v7545_v13 }
 0x360   : > { %7557 = vmatprep.subr.bf16.mxu0 %v8216_v3 }
 0x361   : > { %7556 = vmatpush3.bf16.msra.mxu1 %v7553_v45 }
 0x362   : > { %6925 = vmatmul.mubr.msk.f32.vlgmr.msra.gmra.mrb[8].mxu0 %vm1215_vm1, %v8519_v19  ;;  %7561 = vmatprep.subr.bf16.mxu1 %v8216_v3 }
 0x363   : > { %6942 = vmatprep.mubr.msk.f32.mxu0 %vm8217_vm0, %v8218_v6 }
 0x364   : > { %6936 = vmatmul.mubr.msk.f32.vlgmr.msra.gmra.mrb[4].mxu1 %vm1215_vm1, %v8519_v19 }
 0x365   : > { %6949 = vmatprep.mubr.msk.f32.mxu1 %vm8217_vm0, %v8218_v6 }
 0x42d   : > { %v8633_v16 = vpop.f32.mrb[6].mxu0 }
 0x42e   : > { %v6904_v20 = vpop.f32.mrb[7].mxu0 }
 0x42f   : > { %v1719_v21 = vpop.f32.mrb[2].mxu1 }
 0x430   : > { %v6915_v22 = vpop.f32.mrb[3].mxu1  ;;  %v1720_v33 = vadd.f32 %v1719_v21, %v1651_v31 }
 0x432   : > { %v1723_v34 = vmul.f32 0.35355338, %v1720_v33 }
 0x435   : > { %v6926_v25 = vpop.f32.mrb[8].mxu0 }
 0x436   : > { %v1815_v26 = vadd.f32 %v6926_v25, %v1741_v24  ;;  %v1809_v27 = vpop.f32.mrb[9].mxu0 }
 0x437   : > { %v1810_v30 = vadd.f32 %v1809_v27, %v1741_v24  ;;  %v6937_v56 = vpop.f32.mrb[4].mxu1 }
 0x438   : > { %v1903_v57 = vpop.f32.mrb[5].mxu1 }
 0x439   : > { %v7558_v32 = vpack.c.bf16 %v1815_v26, %v1810_v30 }
 0x43b   : > { %7560 = vmatpush3.bf16.xpose.msk.msra.mxu0 %vm8540_vm3, %v7558_v32 }
 0x43c   : > { %6952 = vmatprep.subr.mxu0 %v8218_v6 }
 0x442   : > { %6943 = vmatmul.mubr.msk.f32.vlgmr.msra.gmra.mrb[10].mxu0 %vm1468_vm2, %v1723_v34 }
 0x443   : > { %6954 = vmatprep.mubr.msk.f32.mxu0 %vm8217_vm0, %v8218_v6  ;;  %6953 = vmatpush3.msra.mxu0 %v2075_v58 }
 0x444   : > { %7564 = vmatprep.subr.bf16.mxu0 %v8216_v3 }
 0x515   : > { %v1987_v46 = vpop.f32.mrb[10].mxu0 }
 0x516   : > { %v6944_v47 = vpop.f32.mrb[11].mxu0  ;;  %v1991_v48 = vsel %vm1548_vm4, %v1987_v46, -inf }
 0x517   : > { %1992 = vmax.xlane.f32.xlu1 %v1991_v48 }
 0x528   : > { %7873 = vrot.lane.b32.xlu1 %v8578_v42, %s9499_s18 }
 0x52c   : > { %7878 = vrot.lane.b32.xlu1 %v8582_v43, %s9499_s18 }
 0x530   : > { %7888 = vrot.lane.b32.xlu1 %v8588_v44, %s9499_s18 }
 0x534   : > { %2234 = vrot.lane.b32.xlu1 %v8545_v29, %s9499_s18 }
 0x538   : > { %7898 = vrot.lane.b32.xlu1 %v8629_v15, %s9499_s18 }
 0x5a4   : > { %v1993_v49 = vpop.xlane.xlu1 %1992 }
 0x5a5   : > { %v1994_v50 = vsub.f32 %v1987_v46, %v1993_v49 }
 0x5a7   : > { %v1995_v52 = vmul.f32 1.442695, %v1994_v50 }
 0x5a8   : > { %v7874_v63 = vpop.permute.xlu1 %7873 }
 0x5a9   : > { %8026 = vpow2.f32 %v1995_v52  ;;  %v7876_v1 = vunpack.i.h.bf16 %v7874_v63  ;;  %v7875_v2 = vunpack.i.l.bf16 %v7874_v63 }
 0x5ab   : > { %v7570_v11 = vpack.c.bf16 %v7876_v1, %v7875_v2 }
 0x5ac   : > { %v7879_v4 = vpop.permute.xlu1 %7878 }
 0x5ad   : > { %v7881_v9 = vunpack.i.h.bf16 %v7879_v4  ;;  %v7880_v10 = vunpack.i.l.bf16 %v7879_v4 }
 0x5af   : > { %v7574_v12 = vpack.c.bf16 %v7881_v9, %v7880_v10 }
 0x5b0   : > { %v7889_v22 = vpop.permute.xlu1 %7888 }
 0x5b1   : > { %v7890_v25 = vunpack.i.l.bf16 %v7889_v22 }
 0x5b3   : > { %v8027_v54 = vpop.eup %8026 }
 0x5b4   : > { %v1997_v55 = vsel %vm1548_vm4, %v8027_v54, 0.0  ;;  %v2235_v45 = vpop.permute.xlu1 %2234 }
 0x5b5   : > { %1998 = vadd.xlane.f32.xlu0 %v1997_v55 }
 0x5b8   : > { %v7899_v52 = vpop.permute.xlu1 %7898 }
 0x5cb   : > { %1834 = vrot.lane.b32.xlu0 %v8598_v51, %s9501_s17  ;;  %s9559_s17 = sld [smem:[#allocation18_spill]] }
 0x5cf   : > { %7883 = vrot.lane.b32.xlu0 %v8602_v53, %s9499_s18 }
 0x5d3   : > { %2320 = vrot.lane.b32.xlu0 %v8534_v23, %s9499_s18 }
 0x5d7   : > { %7893 = vrot.lane.b32.xlu0 %v8623_v14, %s9499_s18 }
 0x642   : > { %v1999_v59 = vpop.xlane.xlu0 %1998 }
 0x643   : > { %8028 = vrcp.f32 %v1999_v59 }
 0x646   : > { %v1835_v60 = vpop.permute.xlu0 %1834 }
 0x647   : > { %v1909_v61 = vadd.f32 %v6937_v56, %v1835_v60  ;;  %v1904_v62 = vadd.f32 %v1903_v57, %v1835_v60  ;;  %v7901_v56 = vunpack.i.h.bf16 %v7899_v52  ;;  %v7900_v57 = vunpack.i.l.bf16 %v7899_v52 }
 0x649   : > { %v7562_v0 = vpack.c.bf16 %v1909_v61, %v1904_v62  ;;  %v7582_v59 = vpack.c.bf16 %v7901_v56, %v7900_v57 }
 0x64a   : > { %v7884_v13 = vpop.permute.xlu0 %7883 }
 0x64b   : > { %7563 = vmatpush3.bf16.msra.mxu1 %v7562_v0  ;;  %v7886_v20 = vunpack.i.h.bf16 %v7884_v13  ;;  %v7885_v21 = vunpack.i.l.bf16 %v7884_v13 }
 0x64c   : > { %6957 = vmatprep.subr.mxu1 %v8218_v6 }
 0x64d   : > { %v8029_v5 = vpop.eup %8028  ;;  %v7565_v24 = vpack.c.bf16 %v7886_v20, %v7885_v21 }
 0x64e   : > { %v2001_v7 = vmul.f32 %v8029_v5, %v8027_v54  ;;  %v2321_v33 = vpop.permute.xlu0 %2320 }
 0x650   : > { %6950 = vmatmul.mubr.msk.f32.vlgmr.msra.gmra.mrb[6].mxu1 %vm1548_vm4, %v2001_v7 }
 0x651   : > { %6958 = vmatpush3.msra.mxu1 %v1633_v8  ;;  %6959 = vmatprep.mubr.msk.f32.mxu1 %vm8217_vm0, %v8218_v6 }
 0x652   : > { %7571 = vmatprep.subr.bf16.mxu1 %v7570_v11  ;;  %v7894_v50 = vpop.permute.xlu0 %7893 }
 0x653   : > { %v7896_v54 = vunpack.i.h.bf16 %v7894_v50  ;;  %v7895_v55 = vunpack.i.l.bf16 %v7894_v50 }
 0x654   : > { %6960 = vmatmul.mubr.msk.f32.vlgmr.msra.gmra.mrb[8].mxu1 %vm1468_vm2, %v8633_v16  ;;  %v7891_v16 = vunpack.i.h.bf16 %v7889_v22 }
 0x655   : > { %7573 = vmatpush3.bf16.msra.mxu1 %v7570_v11  ;;  %6981 = vmatprep.mubr.msk.f32.mxu1 %vm1215_vm1, %v8517_v18  ;;  %v7578_v58 = vpack.c.bf16 %v7896_v54, %v7895_v55 }
 0x656   : > { %7575 = vmatprep.subr.bf16.mxu1 %v7574_v12  ;;  %v7568_v30 = vpack.c.bf16 %v7891_v16, %v7890_v25 }
 0x659   : > { %7577 = vmatpush3.bf16.msra.mxu1 %v7574_v12  ;;  %v2651_v12 = vld [vmem:[%s8276_s14 + $0x10] sm:$0xff] }
 0x65a   : > { %7586 = vmatprep.subr.bf16.mxu1 %v8216_v3 }
 0x65c   : > { %6982 = vmatmul.mubr.msk.f32.vlgmr.msra.gmra.mrb[10].mxu1 %vm1215_vm1, %v8519_v19 }
 0x65d   : > { %6999 = vmatprep.mubr.msk.f32.mxu1 %vm8217_vm0, %v8218_v6 }
 0x723   : > { %v2071_v26 = vpop.f32.mrb[6].mxu1 }
 0x724   : > { %v6951_v27 = vpop.f32.mrb[7].mxu1  ;;  %6955 = vmatmul.mubr.msk.f32.vlgmr.msra.gmra.mrb[12].mxu0 %vm1468_vm2, %v2071_v26 }
 0x725   : > { %7566 = vmatpush3.bf16.msra.mxu0 %v7565_v24  ;;  %6970 = vmatprep.mubr.msk.f32.mxu0 %vm8217_vm0, %v8218_v6 }
 0x726   : > { %7567 = vmatprep.subr.bf16.mxu0 %v8216_v3 }
 0x727   : > { %v2218_v31 = vpop.f32.mrb[8].mxu1 }
 0x728   : > { %v6961_v32 = vpop.f32.mrb[9].mxu1 }
 0x729   : > { %7569 = vmatpush3.bf16.msra.mxu0 %v7568_v30 }
 0x72a   : > { %7579 = vmatprep.subr.bf16.mxu0 %v7578_v58 }
 0x72c   : > { %6971 = vmatmul.mubr.msk.f32.vlgmr.msra.gmra.mrb[14].mxu0 %vm1215_vm1, %v8515_v17 }
 0x72d   : > { %6992 = vmatprep.mubr.msk.f32.mxu0 %vm1215_vm1, %v8517_v18  ;;  %7581 = vmatpush3.bf16.msra.mxu0 %v7578_v58 }
 0x72e   : > { %7583 = vmatprep.subr.bf16.mxu0 %v7582_v59 }
 0x72f   : > { %v6983_v34 = vpop.f32.mrb[10].mxu1 }
 0x730   : > { %v2395_v35 = vadd.f32 %v6983_v34, %v2321_v33  ;;  %v2389_v36 = vpop.f32.mrb[11].mxu1 }
 0x731   : > { %v2390_v37 = vadd.f32 %v2389_v36, %v2321_v33  ;;  %7585 = vmatpush3.bf16.msra.mxu0 %v7582_v59 }
 0x732   : > { %7590 = vmatprep.subr.bf16.mxu0 %v8216_v3 }
 0x733   : > { %v7587_v38 = vpack.c.bf16 %v2395_v35, %v2390_v37 }
 0x734   : > { %6993 = vmatmul.mubr.msk.f32.vlgmr.msra.gmra.mrb[16].mxu0 %vm1215_vm1, %v8519_v19 }
 0x735   : > { %7589 = vmatpush3.bf16.xpose.msk.msra.mxu1 %vm8540_vm3, %v7587_v38  ;;  %7006 = vmatprep.mubr.msk.f32.mxu0 %vm8217_vm0, %v8218_v6 }
 0x736   : > { %7009 = vmatprep.subr.mxu1 %v8218_v6 }
 0x7f7   : > { %v2145_v39 = vpop.f32.mrb[12].mxu0 }
 0x7f8   : > { %v8693_v40 = vadd.f32 %v2218_v31, %v2145_v39  ;;  %v6956_v41 = vpop.f32.mrb[13].mxu0 }
 0x7ff   : > { %v2303_v46 = vpop.f32.mrb[14].mxu0 }
 0x800   : > { %v2304_v47 = vadd.f32 %v2303_v46, %v2235_v45  ;;  %v6972_v48 = vpop.f32.mrb[15].mxu0 }
 0x802   : > { %v2307_v49 = vmul.f32 0.35355338, %v2304_v47 }
 0x804   : > { %7000 = vmatmul.mubr.msk.f32.vlgmr.msra.gmra.mrb[12].mxu1 %vm1468_vm2, %v2307_v49 }
 0x805   : > { %7011 = vmatprep.mubr.msk.f32.mxu1 %vm8217_vm0, %v8218_v6  ;;  %7010 = vmatpush3.msra.mxu1 %v2651_v12 }
 0x807   : > { %v6994_v5 = vpop.f32.mrb[16].mxu0 }
 0x808   : > { %v2479_v8 = vpop.f32.mrb[17].mxu0 }
 0x8d7   : > { %v2563_v60 = vpop.f32.mrb[12].mxu1 }
 0x8d8   : > { %v7001_v61 = vpop.f32.mrb[13].mxu1  ;;  %v2567_v62 = vsel %vm1548_vm4, %v2563_v60, -inf }
 0x8d9   : > { %2568 = vmax.xlane.f32.xlu0 %v2567_v62 }
 0x8ef   : > { %2410 = vrot.lane.b32.xlu0 %v8598_v51, %s9499_s18  ;;  %s9555_s18 = sld [smem:[#allocation19_spill]] }
 0x8f3   : > { %7908 = vrot.lane.b32.xlu0 %v8582_v43, %s9497_s1 }
 0x8f7   : > { %7918 = vrot.lane.b32.xlu0 %v8588_v44, %s9497_s1 }
 0x8fb   : > { %2738 = vrot.lane.b32.xlu0 %v8545_v29, %s9497_s1 }
 0x8ff   : > { %7928 = vrot.lane.b32.xlu0 %v8629_v15, %s9497_s1 }
 0x966   : > { %v2569_v63 = vpop.xlane.xlu0 %2568 }
 0x967   : > { %v2570_v0 = vsub.f32 %v2563_v60, %v2569_v63 }
 0x969   : > { %v2571_v1 = vmul.f32 1.442695, %v2570_v0 }
 0x96a   : > { %v2411_v7 = vpop.permute.xlu0 %2410 }
 0x96b   : > { %8030 = vpow2.f32 %v2571_v1  ;;  %v2485_v9 = vadd.f32 %v6994_v5, %v2411_v7  ;;  %v2480_v10 = vadd.f32 %v2479_v8, %v2411_v7 }
 0x96d   : > { %v7591_v11 = vpack.c.bf16 %v2485_v9, %v2480_v10 }
 0x96e   : > { %v7909_v44 = vpop.permute.xlu0 %7908 }
 0x96f   : > { %7592 = vmatpush3.bf16.msra.mxu0 %v7591_v11  ;;  %v7911_v31 = vunpack.i.h.bf16 %v7909_v44  ;;  %v7910_v32 = vunpack.i.l.bf16 %v7909_v44 }
 0x970   : > { %7593 = vmatprep.subr.bf16.mxu0 %v8216_v3 }
 0x971   : > { %v7603_v33 = vpack.c.bf16 %v7911_v31, %v7910_v32  ;;  %v3270_v31 = vld [vmem:[%s9539_s6 + $0x8] sm:$0xff] }
 0x972   : > { %v7919_v29 = vpop.permute.xlu0 %7918 }
 0x973   : > { %v7921_v26 = vunpack.i.h.bf16 %v7919_v29  ;;  %v7920_v27 = vunpack.i.l.bf16 %v7919_v29 }
 0x975   : > { %v8031_v2 = vpop.eup %8030  ;;  %v7597_v30 = vpack.c.bf16 %v7921_v26, %v7920_v27 }
 0x976   : > { %v2573_v4 = vsel %vm1548_vm4, %v8031_v2, 0.0  ;;  %v2739_v49 = vpop.permute.xlu0 %2738 }
 0x977   : > { %2574 = vadd.xlane.f32.xlu1 %v2573_v4 }
 0x988   : > { %7903 = vrot.lane.b32.xlu1 %v8578_v42, %s9497_s1 }
 0x98c   : > { %7913 = vrot.lane.b32.xlu1 %v8602_v53, %s9497_s1 }
 0x990   : > { %2824 = vrot.lane.b32.xlu1 %v8534_v23, %s9497_s1 }
 0x994   : > { %7923 = vrot.lane.b32.xlu1 %v8623_v14, %s9497_s1 }
 0xa04   : > { %v2575_v13 = vpop.xlane.xlu1 %2574 }
 0xa05   : > { %8032 = vrcp.f32 %v2575_v13 }
 0xa08   : > { %v7904_v42 = vpop.permute.xlu1 %7903 }
 0xa09   : > { %v7906_v43 = vunpack.i.h.bf16 %v7904_v42  ;;  %v7905_v53 = vunpack.i.l.bf16 %v7904_v42 }
 0xa0b   : > { %v7599_v22 = vpack.c.bf16 %v7906_v43, %v7905_v53  ;;  %v6463_v43 = vld [vmem:[%s8281_s19] ss:$0 sm:$0xff] }
 0xa0c   : > { %v7914_v24 = vpop.permute.xlu1 %7913 }
 0xa0d   : > { %7600 = vmatprep.subr.bf16.mxu1 %v7599_v22  ;;  %v7916_v23 = vunpack.i.h.bf16 %v7914_v24  ;;  %v7915_v16 = vunpack.i.l.bf16 %v7914_v24 }
 0xa0f   : > { %v8033_v20 = vpop.eup %8032  ;;  %v7594_v25 = vpack.c.bf16 %v7916_v23, %v7915_v16 }
 0xa10   : > { %v2577_v21 = vmul.f32 %v8033_v20, %v8031_v2  ;;  %v2825_v41 = vpop.permute.xlu1 %2824  ;;  %v3155_v20 = vld [vmem:[%s8276_s14 + $0x18] sm:$0xff] }
 0xa12   : > { %7007 = vmatmul.mubr.msk.f32.vlgmr.msra.gmra.mrb[18].mxu0 %vm1548_vm4, %v2577_v21 }
 0xa13   : > { %7022 = vmatprep.mubr.msk.f32.mxu0 %vm8217_vm0, %v8218_v6  ;;  %7595 = vmatpush3.bf16.msra.mxu0 %v7594_v25 }
 0xa14   : > { %7596 = vmatprep.subr.bf16.mxu0 %v8216_v3  ;;  %v7924_v15 = vpop.permute.xlu1 %7923 }
 0xa15   : > { %v7926_v54 = vunpack.i.h.bf16 %v7924_v15  ;;  %v7925_v55 = vunpack.i.l.bf16 %v7924_v15  ;;  %v6465_v15 = vld [vmem:[%s9549_s7] ss:$0 sm:$0xff]  ;;  %s9552_s7 = sld [smem:[#allocation15_spill]] }
 0xa17   : > { %7598 = vmatpush3.bf16.msra.mxu0 %v7597_v30  ;;  %v7607_v58 = vpack.c.bf16 %v7926_v54, %v7925_v55  ;;  %v3269_v30 = vld [vmem:[%s9539_s6] sm:$0xff]  ;;  %v3360_v55 = vld [vmem:[%s8306_s20 + $0x30] sm:$0xff] }
 0xa18   : > { %v7623_v32 = vpack.c.bf16 %v3270_v31, %v3269_v30 }
 0xa19   : > { %7608 = vmatprep.subr.bf16.mxu0 %v7607_v58 }
 0xa1a   : > { %7023 = vmatmul.mubr.msk.f32.vlgmr.msra.gmra.mrb[20].mxu0 %vm1215_vm1, %v8515_v17 }
 0xa1b   : > { %7044 = vmatprep.mubr.msk.f32.mxu0 %vm1215_vm1, %v8517_v18  ;;  %7610 = vmatpush3.bf16.msra.mxu0 %v7607_v58  ;;  %v6466_v58 = vld [vmem:[%s9550_s10] ss:$0 sm:$0xff]  ;;  %s9553_s10 = sld [smem:[#allocation16_spill]] }
 0xae5   : > { %v2647_v34 = vpop.f32.mrb[18].mxu0 }
 0xae6   : > { %v7008_v35 = vpop.f32.mrb[19].mxu0  ;;  %7012 = vmatmul.mubr.msk.f32.vlgmr.msra.gmra.mrb[14].mxu1 %vm1468_vm2, %v2647_v34 }
 0xae7   : > { %7602 = vmatpush3.bf16.msra.mxu1 %v7599_v22  ;;  %7033 = vmatprep.mubr.msk.f32.mxu1 %vm1215_vm1, %v8517_v18  ;;  %v3354_v35 = vld [vmem:[%s8306_s20] sm:$0xff] }
 0xae8   : > { %7604 = vmatprep.subr.bf16.mxu1 %v7603_v33 }
 0xaeb   : > { %7606 = vmatpush3.bf16.msra.mxu1 %v7603_v33  ;;  %v3272_v33 = vld [vmem:[%s9539_s6 + $0x18] sm:$0xff] }
 0xaec   : > { %7615 = vmatprep.subr.bf16.mxu1 %v8216_v3 }
 0xaed   : > { %v2807_v36 = vpop.f32.mrb[20].mxu0 }
 0xaee   : > { %7034 = vmatmul.mubr.msk.f32.vlgmr.msra.gmra.mrb[16].mxu1 %vm1215_vm1, %v8519_v19  ;;  %v7024_v37 = vpop.f32.mrb[21].mxu0  ;;  %v2808_v52 = vadd.f32 %v2807_v36, %v2739_v49  ;;  %v3355_v36 = vld [vmem:[%s8306_s20 + $0x8] sm:$0xff] }
 0xaef   : > { %7051 = vmatprep.mubr.msk.f32.mxu1 %vm8217_vm0, %v8218_v6  ;;  %v3356_v37 = vld [vmem:[%s8306_s20 + $0x10] sm:$0xff] }
 0xaf0   : > { %v2811_v14 = vmul.f32 0.35355338, %v2808_v52  ;;  %v6464_v52 = vld [vmem:[%s8286_s24] ss:$0 sm:$0xff] }
 0xbb9   : > { %v2721_v38 = vpop.f32.mrb[14].mxu1 }
 0xbba   : > { %v8742_v18 = vadd.f32 %v2721_v38, %v8693_v40  ;;  %v7013_v39 = vpop.f32.mrb[15].mxu1  ;;  %v7929_v40 = vpop.permute.xlu0 %7928  ;;  %v7629_v38 = vpack.c.bf16 %v3355_v36, %v3354_v35 }
 0xbbb   : > { %v7931_v56 = vunpack.i.h.bf16 %v7929_v40  ;;  %v7930_v57 = vunpack.i.l.bf16 %v7929_v40 }
 0xbbd   : > { %v7611_v59 = vpack.c.bf16 %v7931_v56, %v7930_v57  ;;  %v3361_v56 = vld [vmem:[%s8306_s20 + $0x38] sm:$0xff] }
 0xbbe   : > { %v7638_v57 = vpack.c.bf16 %v3361_v56, %v3360_v55 }
 0xbbf   : > { %7612 = vmatprep.subr.bf16.mxu0 %v7611_v59 }
 0xbc0   : > { %7614 = vmatpush3.bf16.msra.mxu0 %v7611_v59 }
 0xbc1   : > { %v7035_v45 = vpop.f32.mrb[16].mxu1  ;;  %7619 = vmatprep.subr.bf16.mxu0 %v8216_v3 }
 0xbc2   : > { %v2899_v46 = vadd.f32 %v7035_v45, %v2825_v41  ;;  %v2893_v47 = vpop.f32.mrb[17].mxu1  ;;  %v3359_v45 = vld [vmem:[%s8306_s20 + $0x28] sm:$0xff] }
 0xbc3   : > { %v2894_v48 = vadd.f32 %v2893_v47, %v2825_v41  ;;  %7045 = vmatmul.mubr.msk.f32.vlgmr.msra.gmra.mrb[22].mxu0 %vm1215_vm1, %v8519_v19  ;;  %v3358_v41 = vld [vmem:[%s8306_s20 + $0x20] sm:$0xff] }
 0xbc4   : > { %7058 = vmatprep.mubr.msk.f32.mxu0 %vm8217_vm0, %v8218_v6 }
 0xbc5   : > { %v7616_v50 = vpack.c.bf16 %v2899_v46, %v2894_v48  ;;  %v7635_v46 = vpack.c.bf16 %v3359_v45, %v3358_v41 }
 0xbc7   : > { %7618 = vmatpush3.bf16.xpose.msk.msra.mxu1 %vm8540_vm3, %v7616_v50 }
 0xbc8   : > { %7061 = vmatprep.subr.mxu1 %v8218_v6 }
 0xbce   : > { %7052 = vmatmul.mubr.msk.f32.vlgmr.msra.gmra.mrb[18].mxu1 %vm1468_vm2, %v2811_v14 }
 0xbcf   : > { %7063 = vmatprep.mubr.msk.f32.mxu1 %vm8217_vm0, %v8218_v6  ;;  %7062 = vmatpush3.msra.mxu1 %v3155_v20 }
 0xbd0   : > { %7628 = vmatprep.subr.bf16.mxu1 %v8216_v3 }
 0xc96   : > { %v7046_v5 = vpop.f32.mrb[22].mxu0 }
 0xc97   : > { %v2983_v7 = vpop.f32.mrb[23].mxu0 }
 0xca1   : > { %v3067_v60 = vpop.f32.mrb[18].mxu1 }
 0xca2   : > { %v7053_v61 = vpop.f32.mrb[19].mxu1  ;;  %v3071_v62 = vsel %vm1548_vm4, %v3067_v60, -inf }
 0xca3   : > { %3072 = vmax.xlane.f32.xlu1 %v3071_v62 }
 0xd30   : > { %v3073_v63 = vpop.xlane.xlu1 %3072 }
 0xd31   : > { %v3074_v0 = vsub.f32 %v3067_v60, %v3073_v63 }
 0xd33   : > { %v3075_v1 = vmul.f32 1.442695, %v3074_v0 }
 0xd35   : > { %8034 = vpow2.f32 %v3075_v1 }
 0xd3f   : > { %v8035_v2 = vpop.eup %8034 }
 0xd40   : > { %v3077_v4 = vsel %vm1548_vm4, %v8035_v2, 0.0 }
 0xd41   : > { %3078 = vadd.xlane.f32.xlu0 %v3077_v4 }
 0xd57   : > { %2914 = vrot.lane.b32.xlu0 %v8598_v51, %s9497_s1  ;;  %s9551_s1 = sld [smem:[#allocation14_spill]] }
 0xd5d   : > { %v6468_v63 = vld [vmem:[%s9551_s1] ss:$0 sm:$0xff]  ;;  %s9554_s1 = sld [smem:[#allocation17_spill]] }
 0xd63   : > { %v8812_v36 = vld [vmem:[%s9554_s1] sm:$0xff]  ;;  %v8829_v45 = vld [vmem:[%s9554_s1 + $0x10] sm:$0xff] }
 0xdce   : > { %v3079_v19 = vpop.xlane.xlu0 %3078 }
 0xdcf   : > { %8036 = vrcp.f32 %v3079_v19 }
 0xdd2   : > { %v2915_v8 = vpop.permute.xlu0 %2914 }
 0xdd3   : > { %v2984_v9 = vadd.f32 %v2983_v7, %v2915_v8  ;;  %v2989_v10 = vadd.f32 %v7046_v5, %v2915_v8  ;;  %v3477_v7 = vld [vmem:[#allocation2 + $0x8] sm:$0xff] }
 0xdd4   : > { %v3484_v19 = vsel %vm1215_vm1, %v3477_v7, 0.0 }
 0xdd5   : > { %v7620_v11 = vpack.c.bf16 %v2989_v10, %v2984_v9  ;;  %3485 = vadd.xlane.f32.xlu0 %v3484_v19 }
 0xdd7   : > { %7621 = vmatpush3.bf16.msra.mxu0 %v7620_v11 }
 0xdd8   : > { %7622 = vmatprep.subr.bf16.mxu0 %v8216_v3 }
 0xdd9   : > { %v8037_v12 = vpop.eup %8036 }
 0xdda   : > { %v3081_v13 = vmul.f32 %v8037_v12, %v8035_v2  ;;  %v3476_v12 = vld [vmem:[#allocation2] sm:$0xff] }
 0xddb   : > { %v3481_v20 = vsel %vm1215_vm1, %v3476_v12, 0.0 }
 0xddc   : > { %7059 = vmatmul.mubr.msk.f32.vlgmr.msra.gmra.mrb[24].mxu0 %vm1548_vm4, %v3081_v13 }
 0xddd   : > { %7074 = vmatprep.mubr.msk.f32.mxu0 %vm8217_vm0, %v8218_v6  ;;  %7624 = vmatpush3.bf16.msra.mxu0 %v7623_v32 }
 0xdde   : > { %7625 = vmatprep.subr.bf16.mxu0 %v8216_v3 }
 0xeaf   : > { %v3151_v51 = vpop.f32.mrb[24].mxu0 }
 0xeb0   : > { %v7060_v21 = vpop.f32.mrb[25].mxu0  ;;  %7064 = vmatmul.mubr.msk.f32.vlgmr.msra.gmra.mrb[20].mxu1 %vm1468_vm2, %v3151_v51 }
 0xeb1   : > { %7093 = vmatprep.mubr.msk.f32.mxu1 %vm8217_vm0, %v8218_v6  ;;  %7630 = vmatpush3.bf16.msra.mxu1 %v7629_v38  ;;  %v8818_v38 = vld [vmem:[%s9555_s18] sm:$0xff] }
 0xeb2   : > { %7631 = vmatprep.subr.bf16.mxu1 %v8216_v3 }
 0xf83   : > { %v3225_v42 = vpop.f32.mrb[20].mxu1 }
 0xf84   : > { %v3229_v53 = vadd.f32 %v3225_v42, %v8742_v18  ;;  %v7065_v22 = vpop.f32.mrb[21].mxu1  ;;  %v3357_v18 = vld [vmem:[%s8306_s20 + $0x18] sm:$0xff] }
 0xf85   : > { %v7632_v39 = vpack.c.bf16 %v3357_v18, %v3356_v37  ;;  %v8815_v37 = vld [vmem:[%s9554_s1 + $0x8] sm:$0xff] }
 0xf86   : > { %v3237_v44 = vadd.f32 %v6463_v43, %v3229_v53  ;;  %v6470_v53 = vld [vmem:[%s9552_s7] ss:$0 sm:$0xff]  ;;  %v7641_v18 = vpack.c.bf16 %v8815_v37, %v8812_v36  ;;  %s9556_s7 = sld [smem:[#allocation33_spill]] }
 0xf87   : > { %7633 = vmatpush3.bf16.msra.mxu1 %v7632_v39  ;;  %v8823_v39 = vld [vmem:[%s9555_s18 + $0x8] sm:$0xff] }
 0xf88   : > { %v3238_v24 = vadd.f32 %v3237_v44, %v8515_v17  ;;  %v3271_v17 = vld [vmem:[%s9539_s6 + $0x10] sm:$0xff]  ;;  %7634 = vmatprep.subr.bf16.mxu1 %v8216_v3  ;;  %v6471_v44 = vld [vmem:[%s9553_s10] ss:$0 sm:$0xff]  ;;  %v7647_v41 = vpack.c.bf16 %v8823_v39, %v8818_v38  ;;  %s9557_s10 = sld [smem:[#allocation21_spill]]  ;;  %s9570_s6 = sld [smem:[#allocation28_spill]] }
 0xf89   : > { %v7626_v34 = vpack.c.bf16 %v3272_v33, %v3271_v17 }
 0xf8a   : > { %v3241_v23 = vsel %vm1215_vm1, %v3238_v24, 0.0 }
 0xf8b   : > { %3242 = vadd.xlane.f32.xlu1 %v3241_v23  ;;  %7627 = vmatpush3.bf16.msra.mxu0 %v7626_v34 }
 0xf8c   : > { %7640 = vmatprep.subr.bf16.mxu0 %v8216_v3  ;;  %7636 = vmatpush3.bf16.msra.mxu1 %v7635_v46  ;;  %v8832_v46 = vld [vmem:[%s9554_s1 + $0x18] sm:$0xff] }
 0xf8d   : > { %7637 = vmatprep.subr.bf16.mxu1 %v8216_v3 }
 0xf90   : > { %7639 = vmatpush3.bf16.msra.mxu1 %v7638_v57 }
 0xf91   : > { %7646 = vmatprep.subr.bf16.mxu1 %v8216_v3 }
0x1018   : > { %v3243_v16 = vpop.xlane.xlu1 %3242 }
0x1019   : > { %v3245_v25 = vmul.f32 0.03125, %v3243_v16 }
0x101b   : > { %v3246_v29 = vsub.f32 %v3238_v24, %v3245_v25 }
0x101d   : > { %v3247_v26 = vmul.f32 %v3246_v29, %v3246_v29 }
0x101f   : > { %v3248_v27 = vsel %vm1215_vm1, %v3247_v26, 0.0 }
0x1020   : > { %3249 = vadd.xlane.f32.xlu1 %v3248_v27 }
0x10ad   : > { %v3250_v47 = vpop.xlane.xlu1 %3249 }
0x10ae   : > { %v3251_v48 = vmul.f32 0.03125, %v3250_v47  ;;  %v8835_v47 = vld [vmem:[%s9555_s18 + $0x10] sm:$0xff] }
0x10b0   : > { %v3252_v49 = vadd.f32 1e-05, %v3251_v48  ;;  %v7644_v48 = vpack.c.bf16 %v8832_v46, %v8829_v45 }
0x10b2   : > { %8038 = vrsqrt.f32 %v3252_v49  ;;  %v8841_v49 = vld [vmem:[%s9555_s18 + $0x18] sm:$0xff] }
0x10bc   : > { %v8039_v50 = vpop.eup %8038 }
0x10bd   : > { %v3254_v14 = vmul.f32 %v8039_v50, %v3246_v29  ;;  %v3486_v29 = vpop.xlane.xlu0 %3485  ;;  %v7650_v50 = vpack.c.bf16 %v8841_v49, %v8835_v47 }
0x10be   : > { %v3491_v27 = vmul.f32 0.03125, %v3486_v29 }
0x10bf   : > { %v3261_v40 = vmul.f32 %v6464_v52, %v3254_v14 }
0x10c0   : > { %v3494_v30 = vsub.f32 %v3477_v7, %v3491_v27 }
0x10c1   : > { %v3268_v54 = vadd.f32 %v6465_v15, %v3261_v40 }
0x10c2   : > { %v3497_v34 = vmul.f32 %v3494_v30, %v3494_v30 }
0x10c3   : > { %7075 = vmatmul.mubr.msk.f32.vlgmr.msra.gmra.mrb[26].mxu0 %vm1215_vm1, %v3268_v54 }
0x10c4   : > { %7104 = vmatprep.mubr.msk.f32.mxu0 %vm8217_vm0, %v8218_v6  ;;  %v3502_v35 = vsel %vm1215_vm1, %v3497_v34, 0.0  ;;  %7642 = vmatpush3.bf16.msra.mxu0 %v7641_v18 }
0x10c5   : > { %7643 = vmatprep.subr.bf16.mxu0 %v8216_v3 }
0x10c8   : > { %7645 = vmatpush3.bf16.msra.mxu0 %v7644_v48 }
0x10c9   : > { %7652 = vmatprep.subr.bf16.mxu0 %v8216_v3 }
0x1196   : > { %v3349_v59 = vpop.f32.mrb[26].mxu0 }
0x1197   : > { %v3350_v60 = vadd.f32 %v6466_v58, %v3349_v59  ;;  %v7076_v61 = vpop.f32.mrb[27].mxu0 }
0x1199   : > { %v3353_v62 = vmax.f32 %v3350_v60, 0.0 }
0x119b   : > { %7094 = vmatmul.mubr.msk.f32.vlgmr.msra.gmra.mrb[22].mxu1 %vm3369_vm5, %v3353_v62  ;;  %v6472_v62 = vld [vmem:[%s9556_s7] ss:$0 sm:$0xff]  ;;  %s9558_s7 = sld [smem:[#allocation20_spill]] }
0x119c   : > { %7121 = vmatprep.mubr.msk.f32.mxu1 %vm8217_vm0, %v8218_v6  ;;  %7648 = vmatpush3.bf16.msra.mxu1 %v7647_v41 }
0x119d   : > { %7649 = vmatprep.subr.bf16.mxu1 %v8216_v3 }
0x11a0   : > { %7651 = vmatpush3.bf16.msra.mxu1 %v7650_v50 }
0x11a1   : > { %7658 = vmatprep.subr.bf16.mxu1 %v8216_v3 }
0x126e   : > { %v3439_v0 = vpop.f32.mrb[22].mxu1 }
0x126f   : > { %v3440_v1 = vadd.f32 %v6468_v63, %v3439_v0  ;;  %v7095_v2 = vpop.f32.mrb[23].mxu1  ;;  %v6473_v0 = vld [vmem:[%s8411_s27] ss:$0 sm:$0xff] }
0x1271   : > { %v3443_v4 = vadd.f32 %v3440_v1, %v3268_v54 }
0x1273   : > { %v3446_v5 = vsel %vm1215_vm1, %v3443_v4, 0.0 }
0x1274   : > { %3447 = vadd.xlane.f32.xlu1 %v3446_v5 }
0x1301   : > { %v3448_v8 = vpop.xlane.xlu1 %3447 }
0x1302   : > { %v3449_v9 = vmul.f32 0.03125, %v3448_v8  ;;  %v8871_v8 = vld [vmem:[%s9557_s10] sm:$0xff] }
0x1304   : > { %v3450_v10 = vsub.f32 %v3443_v4, %v3449_v9  ;;  %v8874_v9 = vld [vmem:[%s9557_s10 + $0x8] sm:$0xff] }
0x1306   : > { %v3451_v11 = vmul.f32 %v3450_v10, %v3450_v10 }
0x1308   : > { %v3452_v13 = vsel %vm1215_vm1, %v3451_v11, 0.0  ;;  %v8880_v11 = vld [vmem:[%s9557_s10 + $0x10] sm:$0xff] }
0x1309   : > { %3453 = vadd.xlane.f32.xlu1 %v3452_v13 }
0x130d   : > { %3482 = vadd.xlane.f32.xlu1 %v3481_v20 }
0x1396   : > { %v3454_v51 = vpop.xlane.xlu1 %3453 }
0x1397   : > { %v3455_v21 = vmul.f32 0.03125, %v3454_v51 }
0x1399   : > { %v3456_v42 = vadd.f32 1e-05, %v3455_v21 }
0x139a   : > { %v3483_v24 = vpop.xlane.xlu1 %3482 }
0x139b   : > { %8040 = vrsqrt.f32 %v3456_v42  ;;  %v3490_v25 = vmul.f32 0.03125, %v3483_v24 }
0x139d   : > { %v3493_v26 = vsub.f32 %v3476_v12, %v3490_v25  ;;  %v8883_v12 = vld [vmem:[%s9557_s10 + $0x18] sm:$0xff]  ;;  %v8911_v25 = vld [vmem:[%s9558_s7] ss:$0 sm:$0xff]  ;;  %s9562_s7 = sld [smem:[#allocation23_spill]] }
0x139e   : > { %v7656_v13 = vpack.c.bf16 %v8883_v12, %v8880_v11 }
0x139f   : > { %v3496_v31 = vmul.f32 %v3493_v26, %v3493_v26 }
0x13a1   : > { %v3499_v33 = vsel %vm1215_vm1, %v3496_v31, 0.0 }
0x13a5   : > { %v8041_v43 = vpop.eup %8040 }
0x13a6   : > { %v3458_v22 = vmul.f32 %v8041_v43, %v3450_v10  ;;  %v7653_v10 = vpack.c.bf16 %v8874_v9, %v8871_v8 }
0x13a8   : > { %v3465_v23 = vmul.f32 %v6470_v53, %v3458_v22 }
0x13aa   : > { %v3472_v16 = vadd.f32 %v6471_v44, %v3465_v23 }
0x13ac   : > { %3475 = vst.msk [vmem:[#allocation2 + $0x10] sm:$0xff] %vm1215_vm1, %v3472_v16 }
0x13b3   : > { %v3478_v32 = vld [vmem:[#allocation2 + $0x10] sm:$0xff] }
0x13b4   : > { %v3487_v17 = vsel %vm1215_vm1, %v3478_v32, 0.0 }
0x13b5   : > { %3488 = vadd.xlane.f32.xlu1 %v3487_v17 }
0x13b9   : > { %3500 = vadd.xlane.f32.xlu1 %v3499_v33  ;;  %v8919_v33 = vld [vmem:[%s9559_s17] ss:$0 sm:$0xff]  ;;  %s9561_s17 = smov 120  }
0x13bd   : > { %3503 = vadd.xlane.f32.xlu1 %v3502_v35 }
0x1442   : > { %v3489_v52 = vpop.xlane.xlu1 %3488 }
0x1443   : > { %v3492_v14 = vmul.f32 0.03125, %v3489_v52 }
0x1445   : > { %v3495_v15 = vsub.f32 %v3478_v32, %v3492_v14 }
0x1446   : > { %v3501_v40 = vpop.xlane.xlu1 %3500 }
0x1447   : > { %v3508_v54 = vmul.f32 0.03125, %v3501_v40  ;;  %v3498_v55 = vmul.f32 %v3495_v15, %v3495_v15 }
0x1449   : > { %v3511_v56 = vadd.f32 1e-05, %v3508_v54  ;;  %v3505_v57 = vsel %vm1215_vm1, %v3498_v55, 0.0  ;;  %v8927_v54 = vld [vmem:[%s9560_s3] ss:$0 sm:$0xff] }
0x144a   : > { %3506 = vadd.xlane.f32.xlu1 %v3505_v57  ;;  %v3504_v58 = vpop.xlane.xlu1 %3503 }
0x144b   : > { %8042 = vrsqrt.f32 %v3511_v56  ;;  %v3509_v59 = vmul.f32 0.03125, %v3504_v58 }
0x144d   : > { %v3512_v60 = vadd.f32 1e-05, %v3509_v59 }
0x144f   : > { %8044 = vrsqrt.f32 %v3512_v60 }
0x1455   : > { %v8043_v61 = vpop.eup %8042 }
0x1456   : > { %v3517_v63 = vmul.f32 %v8043_v61, %v3493_v26 }
0x1458   : > { %v3526_v1 = vmul.f32 %v6472_v62, %v3517_v63 }
0x1459   : > { %v8045_v2 = vpop.eup %8044 }
0x145a   : > { %v8850_v4 = vadd.f32 %v6473_v0, %v3526_v1  ;;  %v3518_v5 = vmul.f32 %v8045_v2, %v3494_v30 }
0x145c   : > { %v3527_v7 = vmul.f32 %v6472_v62, %v3518_v5  ;;  %7105 = vmatmul.mubr.msk.f32.vlgmr.msra.gmra.mrb[28].mxu0 %vm1215_vm1, %v8850_v4  ;;  %7122 = vmatmul.mubr.msk.f32.vlgmr.msra.gmra.mrb[24].mxu1 %vm1215_vm1, %v8850_v4 }
0x145d   : > { %7107 = vmatprep.mubr.msk.f32.mxu0 %vm8217_vm0, %v8218_v6  ;;  %7124 = vmatprep.mubr.msk.f32.mxu1 %vm8217_vm0, %v8218_v6 }
0x145e   : > { %v8860_v19 = vadd.f32 %v6473_v0, %v3527_v7  ;;  %7654 = vmatpush3.bf16.msra.mxu0 %v7653_v10 }
0x145f   : > { %7655 = vmatprep.subr.bf16.mxu0 %v8216_v3 }
0x1460   : > { %7108 = vmatmul.mubr.msk.f32.gmra.mrb[30].mxu0 %vm1215_vm1, %v8860_v19  ;;  %7125 = vmatmul.mubr.msk.f32.gmra.mrb[26].mxu1 %vm1215_vm1, %v8860_v19 }
0x1461   : > { %7110 = vmatprep.mubr.msk.f32.mxu0 %vm8217_vm0, %v8218_v6  ;;  %7127 = vmatprep.mubr.msk.f32.mxu1 %vm8217_vm0, %v8218_v6 }
0x1462   : > { %7657 = vmatpush3.bf16.msra.mxu0 %v7656_v13 }
0x1463   : > { %7662 = vmatprep.subr.bf16.mxu0 %v8216_v3 }
0x14d7   : > { %v3507_v20 = vpop.xlane.xlu1 %3506 }
0x14d8   : > { %v3510_v51 = vmul.f32 0.03125, %v3507_v20 }
0x14da   : > { %v3513_v21 = vadd.f32 1e-05, %v3510_v51 }
0x14dc   : > { %8046 = vrsqrt.f32 %v3513_v21 }
0x14e6   : > { %v8047_v42 = vpop.eup %8046 }
0x14e7   : > { %v3519_v43 = vmul.f32 %v8047_v42, %v3495_v15 }
0x14e9   : > { %v3528_v53 = vmul.f32 %v6472_v62, %v3519_v43 }
0x14eb   : > { %v8888_v22 = vadd.f32 %v6473_v0, %v3528_v53 }
0x14ed   : > { %7111 = vmatmul.mubr.msk.f32.gmra.mrb[32].mxu0 %vm1215_vm1, %v8888_v22  ;;  %7128 = vmatmul.mubr.msk.f32.gmra.mrb[28].mxu1 %vm1215_vm1, %v8888_v22 }
0x14ee   : > { %7138 = vmatprep.mubr.msk.f32.mxu0 %vm8217_vm0, %v8218_v6  ;;  %7153 = vmatprep.mubr.msk.f32.mxu1 %vm8217_vm0, %v8218_v6 }
0x14f1   : > { %7139 = vmatmul.mubr.msk.f32.vlgmr.msra.gmra.mrb[34].mxu0 %vm1215_vm1, %v8850_v4 }
0x14f2   : > { %7141 = vmatprep.mubr.msk.f32.mxu0 %vm8217_vm0, %v8218_v6 }
0x14f5   : > { %7142 = vmatmul.mubr.msk.f32.gmra.mrb[36].mxu0 %vm1215_vm1, %v8860_v19 }
0x14f6   : > { %7144 = vmatprep.mubr.msk.f32.mxu0 %vm8217_vm0, %v8218_v6 }
0x14f9   : > { %7145 = vmatmul.mubr.msk.f32.gmra.mrb[38].mxu0 %vm1215_vm1, %v8888_v22 }
0x14fa   : > { %7168 = vmatprep.mubr.msk.f32.mxu0 %vm8217_vm0, %v8218_v6 }
0x152f   : > { %v3624_v44 = vpop.f32.mrb[28].mxu0  ;;  %v3718_v24 = vpop.f32.mrb[24].mxu1 }
0x1530   : > { %v7106_v23 = vpop.f32.mrb[29].mxu0  ;;  %v7123_v16 = vpop.f32.mrb[25].mxu1  ;;  %v3719_v27 = vadd.f32 %v8911_v25, %v3718_v24  ;;  %v3625_v34 = vadd.f32 %v8919_v33, %v3624_v44 }
0x1532   : > { %v3638_v52 = vmul.f32 0.35355338, %v3625_v34 }
0x1533   : > { %v3629_v29 = vpop.f32.mrb[30].mxu0  ;;  %v3723_v26 = vpop.f32.mrb[26].mxu1 }
0x1534   : > { %v3724_v30 = vadd.f32 %v8911_v25, %v3723_v26  ;;  %v7109_v31 = vpop.f32.mrb[31].mxu0  ;;  %v7126_v32 = vpop.f32.mrb[27].mxu1  ;;  %v3630_v14 = vadd.f32 %v8919_v33, %v3629_v29 }
0x1536   : > { %v7659_v17 = vpack.c.bf16 %v3724_v30, %v3719_v27  ;;  %v3639_v55 = vmul.f32 0.35355338, %v3630_v14 }
0x1538   : > { %7661 = vmatpush3.bf16.xpose.msk.msra.mxu1 %vm8540_vm3, %v7659_v17 }
0x1539   : > { %7151 = vmatprep.subr.mxu1 %v8218_v6 }
0x15c0   : > { %v3634_v35 = vpop.f32.mrb[32].mxu0  ;;  %v3728_v18 = vpop.f32.mrb[28].mxu1 }
0x15c1   : > { %v3729_v41 = vadd.f32 %v8911_v25, %v3728_v18  ;;  %v7112_v48 = vpop.f32.mrb[33].mxu0  ;;  %v7129_v50 = vpop.f32.mrb[29].mxu1  ;;  %v3635_v56 = vadd.f32 %v8919_v33, %v3634_v35  ;;  %v8952_v18 = vpack.i.bf16 %v8841_v49, %v8835_v47 }
0x15c2   : > { %v8962_v48 = vpack.i.bf16 %v8815_v37, %v8812_v36  ;;  %v8968_v50 = vpack.i.bf16 %v8832_v46, %v8829_v45  ;;  %v8978_v36 = vpack.i.bf16 %v8874_v9, %v8871_v8  ;;  %v8984_v37 = vpack.i.bf16 %v8883_v12, %v8880_v11 }
0x15c3   : > { %7152 = vmatpush3.xpose.msk.msra.mxu1 %vm1468_vm2, %v3729_v41  ;;  %v3640_v62 = vmul.f32 0.35355338, %v3635_v56  ;;  %v8956_v41 = vpack.i.bf16 %v8823_v39, %v8818_v38 }
0x15c4   : > { %v3809_v15 = vpop.f32.mrb[34].mxu0  ;;  %7665 = vmatprep.subr.bf16.mxu1 %v8216_v3 }
0x15c5   : > { %v7140_v40 = vpop.f32.mrb[35].mxu0  ;;  %v3810_v58 = vadd.f32 %v8927_v54, %v3809_v15 }
0x15c6   : > { %7154 = vmatmul.mubr.msk.f32.vlgmr.msra.gmra.mrb[30].mxu1 %vm1468_vm2, %v3638_v52 }
0x15c7   : > { %7156 = vmatprep.mubr.msk.f32.mxu1 %vm8217_vm0, %v8218_v6 }
0x15c8   : > { %v3814_v57 = vpop.f32.mrb[36].mxu0 }
0x15c9   : > { %v3815_v59 = vadd.f32 %v8927_v54, %v3814_v57  ;;  %v7143_v60 = vpop.f32.mrb[37].mxu0 }
0x15ca   : > { %7157 = vmatmul.mubr.msk.f32.gmra.mrb[32].mxu1 %vm1468_vm2, %v3639_v55 }
0x15cb   : > { %v7663_v61 = vpack.c.bf16 %v3815_v59, %v3810_v58  ;;  %7159 = vmatprep.mubr.msk.f32.mxu1 %vm8217_vm0, %v8218_v6 }
0x15cc   : > { %v3819_v63 = vpop.f32.mrb[38].mxu0 }
0x15cd   : > { %v7146_v0 = vpop.f32.mrb[39].mxu0  ;;  %7664 = vmatpush3.bf16.msra.mxu0 %v7663_v61  ;;  %v3820_v1 = vadd.f32 %v8927_v54, %v3819_v63 }
0x15ce   : > { %7160 = vmatmul.mubr.msk.f32.gmra.mrb[34].mxu1 %vm1468_vm2, %v3640_v62  ;;  %7166 = vmatprep.subr.mxu0 %v8218_v6 }
0x15cf   : > { %7185 = vmatprep.mubr.msk.f32.mxu1 %vm8217_vm0, %v8218_v6 }
0x15d1   : > { %7167 = vmatpush3.msra.mxu0 %v3820_v1 }
0x15d2   : > { %7671 = vmatprep.subr.bf16.mxu0 %v8216_v3 }
0x1699   : > { %v3907_v2 = vpop.f32.mrb[30].mxu1 }
0x169a   : > { %v7155_v5 = vpop.f32.mrb[31].mxu1  ;;  %v3922_v7 = vsel %vm3921_vm6, %v3907_v2, -inf }
0x169b   : > { %3923 = vmax.xlane.f32.xlu1 %v3922_v7 }
0x169d   : > { %v3912_v10 = vpop.f32.mrb[32].mxu1 }
0x169e   : > { %v7158_v13 = vpop.f32.mrb[33].mxu1  ;;  %v3925_v20 = vsel %vm3921_vm6, %v3912_v10, -inf }
0x169f   : > { %3926 = vmax.xlane.f32.xlu1 %v3925_v20 }
0x16a1   : > { %v3917_v51 = vpop.f32.mrb[34].mxu1 }
0x16a2   : > { %v7161_v21 = vpop.f32.mrb[35].mxu1  ;;  %v3928_v42 = vsel %vm3921_vm6, %v3917_v51, -inf }
0x16a3   : > { %3929 = vmax.xlane.f32.xlu1 %v3928_v42 }
0x1728   : > { %v3924_v43 = vpop.xlane.xlu1 %3923 }
0x1729   : > { %v3931_v53 = vsub.f32 %v3907_v2, %v3924_v43 }
0x172b   : > { %v3934_v44 = vmul.f32 1.442695, %v3931_v53 }
0x172c   : > { %v3927_v24 = vpop.xlane.xlu1 %3926 }
0x172d   : > { %8048 = vpow2.f32 %v3934_v44  ;;  %v3932_v23 = vsub.f32 %v3912_v10, %v3927_v24 }
0x172f   : > { %v3936_v16 = vmul.f32 1.442695, %v3932_v23 }
0x1730   : > { %v3930_v29 = vpop.xlane.xlu1 %3929 }
0x1731   : > { %8050 = vpow2.f32 %v3936_v16  ;;  %v3933_v26 = vsub.f32 %v3917_v51, %v3930_v29 }
0x1733   : > { %v3938_v27 = vmul.f32 1.442695, %v3933_v26 }
0x1735   : > { %8052 = vpow2.f32 %v3938_v27 }
0x1737   : > { %v8049_v30 = vpop.eup %8048 }
0x1738   : > { %v3940_v31 = vsel %vm3921_vm6, %v8049_v30, 0.0 }
0x1739   : > { %3941 = vadd.xlane.f32.xlu1 %v3940_v31 }
0x173b   : > { %v8051_v32 = vpop.eup %8050 }
0x173c   : > { %v3943_v17 = vsel %vm3921_vm6, %v8051_v32, 0.0 }
0x173d   : > { %3944 = vadd.xlane.f32.xlu0 %v3943_v17 }
0x173f   : > { %v8053_v34 = vpop.eup %8052 }
0x1740   : > { %v3946_v35 = vsel %vm3921_vm6, %v8053_v34, 0.0 }
0x1741   : > { %3947 = vadd.xlane.f32.xlu1 %v3946_v35 }
0x1752   : > { %7938 = vrot.lane.b32.xlu1 %v8952_v18, %s9561_s17 }
0x1753   : > { %7933 = vrot.lane.b32.xlu0 %v8956_v41, %s9561_s17 }
0x1756   : > { %7943 = vrot.lane.b32.xlu1 %v8962_v48, %s9561_s17 }
0x1757   : > { %7948 = vrot.lane.b32.xlu0 %v8968_v50, %s9561_s17 }
0x175a   : > { %4163 = vrot.lane.b32.xlu1 %v8911_v25, %s9561_s17 }
0x175b   : > { %4061 = vrot.lane.b32.xlu0 %v8919_v33, %s9561_s17 }
0x175e   : > { %7953 = vrot.lane.b32.xlu1 %v8978_v36, %s9561_s17 }
0x175f   : > { %7958 = vrot.lane.b32.xlu0 %v8984_v37, %s9561_s17 }
0x17c6   : > { %v3942_v38 = vpop.xlane.xlu1 %3941 }
0x17c7   : > { %8054 = vrcp.f32 %v3942_v38 }
0x17ca   : > { %v3945_v39 = vpop.xlane.xlu0 %3944 }
0x17cb   : > { %8056 = vrcp.f32 %v3945_v39 }
0x17ce   : > { %v3948_v45 = vpop.xlane.xlu1 %3947  ;;  %v7934_v46 = vpop.permute.xlu0 %7933 }
0x17cf   : > { %8058 = vrcp.f32 %v3948_v45  ;;  %v7936_v47 = vunpack.i.h.bf16 %v7934_v46  ;;  %v7935_v49 = vunpack.i.l.bf16 %v7934_v46 }
0x17d1   : > { %v8055_v8 = vpop.eup %8054  ;;  %v7672_v9 = vpack.c.bf16 %v7936_v47, %v7935_v49 }
0x17d2   : > { %v3952_v52 = vmul.f32 %v8055_v8, %v8049_v30  ;;  %v7939_v11 = vpop.permute.xlu1 %7938  ;;  %v7949_v12 = vpop.permute.xlu0 %7948 }
0x17d3   : > { %v7941_v14 = vunpack.i.h.bf16 %v7939_v11  ;;  %v7940_v15 = vunpack.i.l.bf16 %v7939_v11  ;;  %v7951_v61 = vunpack.i.h.bf16 %v7949_v12  ;;  %v7950_v62 = vunpack.i.l.bf16 %v7949_v12 }
0x17d4   : > { %7169 = vmatmul.mubr.msk.f32.vlgmr.msra.gmra.mrb[40].mxu0 %vm3921_vm6, %v3952_v52 }
0x17d5   : > { %v8057_v40 = vpop.eup %8056  ;;  %v7675_v55 = vpack.c.bf16 %v7941_v14, %v7940_v15  ;;  %7171 = vmatprep.mubr.msk.f32.mxu0 %vm8217_vm0, %v8218_v6  ;;  %7673 = vmatpush3.bf16.msra.mxu0 %v7672_v9  ;;  %v7669_v5 = vpack.c.bf16 %v7951_v61, %v7950_v62 }
0x17d6   : > { %v7944_v56 = vpop.permute.xlu1 %7943  ;;  %v3953_v57 = vmul.f32 %v8057_v40, %v8051_v32  ;;  %7674 = vmatprep.subr.bf16.mxu0 %v8216_v3  ;;  %v8994_v58 = vpop.permute.xlu0 %4061 }
0x17d7   : > { %v7946_v59 = vunpack.i.h.bf16 %v7944_v56  ;;  %v7945_v60 = vunpack.i.l.bf16 %v7944_v56 }
0x17d8   : > { %7172 = vmatmul.mubr.msk.f32.gmra.mrb[42].mxu0 %vm3921_vm6, %v3953_v57 }
0x17d9   : > { %v8059_v63 = vpop.eup %8058  ;;  %v7666_v0 = vpack.c.bf16 %v7946_v59, %v7945_v60  ;;  %7174 = vmatprep.mubr.msk.f32.mxu0 %vm8217_vm0, %v8218_v6  ;;  %7676 = vmatpush3.bf16.msra.mxu0 %v7675_v55 }
0x17da   : > { %v3954_v1 = vmul.f32 %v8059_v63, %v8053_v34  ;;  %v8999_v2 = vpop.permute.xlu1 %4163  ;;  %7683 = vmatprep.subr.bf16.mxu0 %v8216_v3  ;;  %v7959_v7 = vpop.permute.xlu0 %7958 }
0x17db   : > { %7667 = vmatpush3.bf16.msra.mxu1 %v7666_v0  ;;  %v7961_v51 = vunpack.i.h.bf16 %v7959_v7  ;;  %v7960_v21 = vunpack.i.l.bf16 %v7959_v7 }
0x17dc   : > { %7175 = vmatmul.mubr.msk.f32.gmra.mrb[44].mxu0 %vm3921_vm6, %v3954_v1  ;;  %7668 = vmatprep.subr.bf16.mxu1 %v8216_v3 }
0x17dd   : > { %7202 = vmatprep.mubr.msk.f32.mxu0 %vm8217_vm0, %v8218_v6  ;;  %v7681_v43 = vpack.c.bf16 %v7961_v51, %v7960_v21 }
0x17de   : > { %v7954_v10 = vpop.permute.xlu1 %7953 }
0x17df   : > { %7670 = vmatpush3.bf16.msra.mxu1 %v7669_v5  ;;  %v7956_v13 = vunpack.i.h.bf16 %v7954_v10  ;;  %v7955_v20 = vunpack.i.l.bf16 %v7954_v10 }
0x17e0   : > { %7203 = vmatmul.mubr.msk.f32.vlgmr.msra.gmra.mrb[46].mxu0 %vm1215_vm1, %v8850_v4  ;;  %7677 = vmatprep.subr.bf16.mxu1 %v8216_v3 }
0x17e1   : > { %v7678_v42 = vpack.c.bf16 %v7956_v13, %v7955_v20  ;;  %7205 = vmatprep.mubr.msk.f32.mxu0 %vm8217_vm0, %v8218_v6 }
0x17e2   : > { %7186 = vmatmul.mubr.msk.f32.vlgmr.msra.gmra.mrb[36].mxu1 %vm1215_vm1, %v8850_v4 }
0x17e3   : > { %7188 = vmatprep.mubr.msk.f32.mxu1 %vm8217_vm0, %v8218_v6  ;;  %7679 = vmatpush3.bf16.msra.mxu1 %v7678_v42 }
0x17e4   : > { %7206 = vmatmul.mubr.msk.f32.gmra.mrb[48].mxu0 %vm1215_vm1, %v8860_v19  ;;  %7680 = vmatprep.subr.bf16.mxu1 %v8216_v3 }
0x17e5   : > { %7208 = vmatprep.mubr.msk.f32.mxu0 %vm8217_vm0, %v8218_v6 }
0x17e6   : > { %7189 = vmatmul.mubr.msk.f32.gmra.mrb[38].mxu1 %vm1215_vm1, %v8860_v19 }
0x17e7   : > { %7191 = vmatprep.mubr.msk.f32.mxu1 %vm8217_vm0, %v8218_v6  ;;  %7682 = vmatpush3.bf16.msra.mxu1 %v7681_v43 }
0x17e8   : > { %7209 = vmatmul.mubr.msk.f32.gmra.mrb[50].mxu0 %vm1215_vm1, %v8888_v22  ;;  %7687 = vmatprep.subr.bf16.mxu1 %v8216_v3 }
0x17e9   : > { %7234 = vmatprep.mubr.msk.f32.mxu0 %vm8217_vm0, %v8218_v6 }
0x17ea   : > { %7192 = vmatmul.mubr.msk.f32.gmra.mrb[40].mxu1 %vm1215_vm1, %v8888_v22 }
0x17eb   : > { %7219 = vmatprep.mubr.msk.f32.mxu1 %vm8217_vm0, %v8218_v6 }
0x17ee   : > { %7220 = vmatmul.mubr.msk.f32.vlgmr.msra.gmra.mrb[42].mxu1 %vm1215_vm1, %v8850_v4 }
0x17ef   : > { %7222 = vmatprep.mubr.msk.f32.mxu1 %vm8217_vm0, %v8218_v6 }
0x17f2   : > { %7223 = vmatmul.mubr.msk.f32.gmra.mrb[44].mxu1 %vm1215_vm1, %v8860_v19 }
0x17f3   : > { %7225 = vmatprep.mubr.msk.f32.mxu1 %vm8217_vm0, %v8218_v6 }
0x17f6   : > { %7226 = vmatmul.mubr.msk.f32.gmra.mrb[46].mxu1 %vm1215_vm1, %v8888_v22 }
0x17f7   : > { %7249 = vmatprep.mubr.msk.f32.mxu1 %vm8217_vm0, %v8218_v6 }
0x18a7   : > { %v9045_v53 = vpop.f32.mrb[40].mxu0 }
0x18a8   : > { %v7170_v44 = vpop.f32.mrb[41].mxu0 }
0x18ab   : > { %v9047_v24 = vpop.f32.mrb[42].mxu0 }
0x18ac   : > { %v7173_v23 = vpop.f32.mrb[43].mxu0 }
0x18af   : > { %v9049_v16 = vpop.f32.mrb[44].mxu0 }
0x18b0   : > { %v7176_v29 = vpop.f32.mrb[45].mxu0 }
0x18b3   : > { %v4232_v26 = vpop.f32.mrb[46].mxu0 }
0x18b4   : > { %v7204_v27 = vpop.f32.mrb[47].mxu0  ;;  %v4233_v17 = vadd.f32 %v4232_v26, %v8999_v2 }
0x18b5   : > { %v4130_v30 = vpop.f32.mrb[36].mxu1 }
0x18b6   : > { %v7187_v31 = vpop.f32.mrb[37].mxu1  ;;  %v4131_v9 = vadd.f32 %v4130_v30, %v8994_v58 }
0x18b7   : > { %v4237_v32 = vpop.f32.mrb[48].mxu0 }
0x18b8   : > { %v4238_v34 = vadd.f32 %v4237_v32, %v8999_v2  ;;  %v7207_v35 = vpop.f32.mrb[49].mxu0  ;;  %v4144_v14 = vmul.f32 0.35355338, %v4131_v9 }
0x18b9   : > { %v4135_v38 = vpop.f32.mrb[38].mxu1 }
0x18ba   : > { %v7684_v39 = vpack.c.bf16 %v4238_v34, %v4233_v17  ;;  %v7190_v45 = vpop.f32.mrb[39].mxu1  ;;  %v4136_v15 = vadd.f32 %v4135_v38, %v8994_v58  ;;  %v4565_v34 = vld [vmem:[%s9562_s7 + $0x8] sm:$0xff] }
0x18bb   : > { %v4242_v46 = vpop.f32.mrb[50].mxu0 }
0x18bc   : > { %v7210_v47 = vpop.f32.mrb[51].mxu0  ;;  %7686 = vmatpush3.bf16.xpose.msk.msra.mxu0 %vm8540_vm3, %v7684_v39  ;;  %v4243_v11 = vadd.f32 %v4242_v46, %v8999_v2  ;;  %v4145_v56 = vmul.f32 0.35355338, %v4136_v15 }
0x18bd   : > { %v4140_v49 = vpop.f32.mrb[40].mxu1  ;;  %7232 = vmatprep.subr.mxu0 %v8218_v6 }
0x18be   : > { %v7193_v8 = vpop.f32.mrb[41].mxu1  ;;  %v4141_v57 = vadd.f32 %v4140_v49, %v8994_v58  ;;  %v4044_v49 = vld [vmem:[%s9562_s7] sm:$0xff] }
0x18c0   : > { %v4146_v61 = vmul.f32 0.35355338, %v4141_v57 }
0x18c1   : > { %v9057_v52 = vpop.f32.mrb[42].mxu1 }
0x18c2   : > { %v7221_v12 = vpop.f32.mrb[43].mxu1 }
0x18c4   : > { %7233 = vmatpush3.xpose.msk.msra.mxu0 %vm1468_vm2, %v4243_v11 }
0x18c5   : > { %v9062_v40 = vpop.f32.mrb[44].mxu1  ;;  %7258 = vmatprep.subr.mxu0 %v8218_v6 }
0x18c6   : > { %v7224_v55 = vpop.f32.mrb[45].mxu1 }
0x18c7   : > { %7235 = vmatmul.mubr.msk.f32.vlgmr.msra.gmra.mrb[52].mxu0 %vm1468_vm2, %v4144_v14 }
0x18c8   : > { %7237 = vmatprep.mubr.msk.f32.mxu0 %vm8217_vm0, %v8218_v6  ;;  %7259 = vmatpush3.msra.mxu0 %v4565_v34 }
0x18c9   : > { %v9069_v59 = vpop.f32.mrb[46].mxu1  ;;  %7690 = vmatprep.subr.bf16.mxu0 %v8216_v3 }
0x18ca   : > { %v7227_v60 = vpop.f32.mrb[47].mxu1 }
0x18cb   : > { %7238 = vmatmul.mubr.msk.f32.gmra.mrb[54].mxu0 %vm1468_vm2, %v4145_v56 }
0x18cc   : > { %7240 = vmatprep.mubr.msk.f32.mxu0 %vm8217_vm0, %v8218_v6 }
0x18cf   : > { %7241 = vmatmul.mubr.msk.f32.gmra.mrb[56].mxu0 %vm1468_vm2, %v4146_v61 }
0x18d0   : > { %7260 = vmatprep.mubr.msk.f32.mxu0 %vm8217_vm0, %v8218_v6 }
0x199a   : > { %v4429_v62 = vpop.f32.mrb[52].mxu0 }
0x199b   : > { %v7236_v63 = vpop.f32.mrb[53].mxu0  ;;  %v4443_v0 = vsel %vm3921_vm6, %v4429_v62, -inf }
0x199c   : > { %4444 = vmax.xlane.f32.xlu1 %v4443_v0 }
0x199e   : > { %v4434_v58 = vpop.f32.mrb[54].mxu0 }
0x199f   : > { %v7239_v1 = vpop.f32.mrb[55].mxu0  ;;  %v4446_v2 = vsel %vm3921_vm6, %v4434_v58, -inf }
0x19a0   : > { %4447 = vmax.xlane.f32.xlu0 %v4446_v2 }
0x19a2   : > { %v4439_v5 = vpop.f32.mrb[56].mxu0 }
0x19a3   : > { %v7242_v7 = vpop.f32.mrb[57].mxu0  ;;  %v4449_v10 = vsel %vm3921_vm6, %v4439_v5, -inf }
0x19a4   : > { %4450 = vmax.xlane.f32.xlu0 %v4449_v10 }
0x1a29   : > { %v4445_v13 = vpop.xlane.xlu1 %4444 }
0x1a2a   : > { %v4452_v20 = vsub.f32 %v4429_v62, %v4445_v13 }
0x1a2c   : > { %v4455_v51 = vmul.f32 1.442695, %v4452_v20 }
0x1a2d   : > { %v4448_v21 = vpop.xlane.xlu0 %4447 }
0x1a2e   : > { %8060 = vpow2.f32 %v4455_v51  ;;  %v4453_v42 = vsub.f32 %v4434_v58, %v4448_v21 }
0x1a30   : > { %v4457_v43 = vmul.f32 1.442695, %v4453_v42 }
0x1a31   : > { %v4451_v44 = vpop.xlane.xlu0 %4450 }
0x1a32   : > { %8062 = vpow2.f32 %v4457_v43  ;;  %v4454_v23 = vsub.f32 %v4439_v5, %v4451_v44 }
0x1a34   : > { %v4459_v29 = vmul.f32 1.442695, %v4454_v23 }
0x1a36   : > { %8064 = vpow2.f32 %v4459_v29 }
0x1a38   : > { %v8061_v26 = vpop.eup %8060 }
0x1a39   : > { %v4461_v27 = vsel %vm3921_vm6, %v8061_v26, 0.0 }
0x1a3a   : > { %4462 = vadd.xlane.f32.xlu1 %v4461_v27 }
0x1a3c   : > { %v8063_v30 = vpop.eup %8062 }
0x1a3d   : > { %v4464_v31 = vsel %vm3921_vm6, %v8063_v30, 0.0 }
0x1a3e   : > { %4465 = vadd.xlane.f32.xlu0 %v4464_v31 }
0x1a40   : > { %v8065_v32 = vpop.eup %8064 }
0x1a41   : > { %v4467_v17 = vsel %vm3921_vm6, %v8065_v32, 0.0 }
0x1a42   : > { %4468 = vadd.xlane.f32.xlu1 %v4467_v17 }
0x1a53   : > { %7963 = vrot.lane.b32.xlu1 %v8956_v41, %s9563_s5 }
0x1a54   : > { %4262 = vrot.lane.b32.xlu0 %v8927_v54, %s9561_s17  ;;  %s9564_s17 = smov 104  }
0x1a57   : > { %7968 = vrot.lane.b32.xlu1 %v8952_v18, %s9563_s5 }
0x1a58   : > { %7973 = vrot.lane.b32.xlu0 %v8962_v48, %s9563_s5 }
0x1a5b   : > { %7978 = vrot.lane.b32.xlu1 %v8968_v50, %s9563_s5 }
0x1a5c   : > { %4854 = vrot.lane.b32.xlu0 %v8911_v25, %s9563_s5 }
0x1a5f   : > { %4756 = vrot.lane.b32.xlu1 %v8919_v33, %s9563_s5 }
0x1a60   : > { %7983 = vrot.lane.b32.xlu0 %v8978_v36, %s9563_s5 }
0x1a63   : > { %7988 = vrot.lane.b32.xlu1 %v8984_v37, %s9563_s5 }
0x1ac7   : > { %v4463_v18 = vpop.xlane.xlu1 %4462 }
0x1ac8   : > { %8066 = vrcp.f32 %v4463_v18 }
0x1acb   : > { %v4466_v41 = vpop.xlane.xlu0 %4465 }
0x1acc   : > { %8068 = vrcp.f32 %v4466_v41 }
0x1acf   : > { %v4469_v48 = vpop.xlane.xlu1 %4468  ;;  %v4263_v50 = vpop.permute.xlu0 %4262 }
0x1ad0   : > { %v4332_v35 = vadd.f32 %v9057_v52, %v4263_v50  ;;  %v4337_v38 = vadd.f32 %v9062_v40, %v4263_v50  ;;  %8070 = vrcp.f32 %v4469_v48  ;;  %v4342_v46 = vadd.f32 %v9069_v59, %v4263_v50 }
0x1ad2   : > { %v7688_v39 = vpack.c.bf16 %v4337_v38, %v4332_v35  ;;  %v8067_v45 = vpop.eup %8066 }
0x1ad3   : > { %v4473_v47 = vmul.f32 %v8067_v45, %v8061_v26  ;;  %v7964_v9 = vpop.permute.xlu1 %7963 }
0x1ad4   : > { %7689 = vmatpush3.bf16.msra.mxu1 %v7688_v39  ;;  %v7966_v12 = vunpack.i.h.bf16 %v7964_v9  ;;  %v7965_v14 = vunpack.i.l.bf16 %v7964_v9 }
0x1ad5   : > { %7247 = vmatprep.subr.mxu1 %v8218_v6 }
0x1ad6   : > { %v8069_v8 = vpop.eup %8068  ;;  %v7697_v55 = vpack.c.bf16 %v7966_v12, %v7965_v14 }
0x1ad7   : > { %v4474_v52 = vmul.f32 %v8069_v8, %v8063_v30  ;;  %v7969_v40 = vpop.permute.xlu1 %7968 }
0x1ad8   : > { %7248 = vmatpush3.msra.mxu1 %v4342_v46  ;;  %v7971_v56 = vunpack.i.h.bf16 %v7969_v40  ;;  %v7970_v57 = vunpack.i.l.bf16 %v7969_v40 }
0x1ad9   : > { %7250 = vmatmul.mubr.msk.f32.vlgmr.msra.gmra.mrb[48].mxu1 %vm3921_vm6, %v4473_v47  ;;  %7269 = vmatprep.subr.mxu1 %v8218_v6 }
0x1ada   : > { %7252 = vmatprep.mubr.msk.f32.mxu1 %vm8217_vm0, %v8218_v6  ;;  %7270 = vmatpush3.msra.mxu1 %v4044_v49  ;;  %v8071_v11 = vpop.eup %8070  ;;  %v7700_v59 = vpack.c.bf16 %v7971_v56, %v7970_v57 }
0x1adb   : > { %7696 = vmatprep.subr.bf16.mxu1 %v8216_v3  ;;  %v4475_v15 = vmul.f32 %v8071_v11, %v8065_v32  ;;  %v7979_v60 = vpop.permute.xlu1 %7978 }
0x1adc   : > { %v7981_v63 = vunpack.i.h.bf16 %v7979_v60  ;;  %v7980_v0 = vunpack.i.l.bf16 %v7979_v60 }
0x1add   : > { %7253 = vmatmul.mubr.msk.f32.gmra.mrb[50].mxu1 %vm3921_vm6, %v4474_v52 }
0x1ade   : > { %7255 = vmatprep.mubr.msk.f32.mxu1 %vm8217_vm0, %v8218_v6  ;;  %v7694_v5 = vpack.c.bf16 %v7981_v63, %v7980_v0 }
0x1adf   : > { %v9148_v2 = vpop.permute.xlu1 %4756 }
0x1ae1   : > { %7256 = vmatmul.mubr.msk.f32.gmra.mrb[52].mxu1 %vm3921_vm6, %v4475_v15 }
0x1ae2   : > { %7271 = vmatprep.mubr.msk.f32.mxu1 %vm8217_vm0, %v8218_v6 }
0x1ae3   : > { %v7989_v21 = vpop.permute.xlu1 %7988 }
0x1ae4   : > { %v7991_v23 = vunpack.i.h.bf16 %v7989_v21  ;;  %v7990_v29 = vunpack.i.l.bf16 %v7989_v21 }
0x1ae5   : > { %7272 = vmatmul.mubr.msk.f32.vlgmr.msra.gmra.mrb[54].mxu1 %vm1468_vm2, %v9045_v53  ;;  %v7974_v53 = vpop.permute.xlu0 %7973 }
0x1ae6   : > { %7274 = vmatprep.mubr.msk.f32.mxu1 %vm8217_vm0, %v8218_v6  ;;  %7698 = vmatpush3.bf16.msra.mxu1 %v7697_v55  ;;  %v7706_v30 = vpack.c.bf16 %v7991_v23, %v7990_v29 }
0x1ae7   : > { %7699 = vmatprep.subr.bf16.mxu1 %v8216_v3 }
0x1ae9   : > { %7275 = vmatmul.mubr.msk.f32.gmra.mrb[56].mxu1 %vm1468_vm2, %v9047_v24  ;;  %v7976_v24 = vunpack.i.h.bf16 %v7974_v53  ;;  %v9145_v61 = vpop.permute.xlu0 %4854 }
0x1aea   : > { %7277 = vmatprep.mubr.msk.f32.mxu1 %vm8217_vm0, %v8218_v6  ;;  %7701 = vmatpush3.bf16.msra.mxu1 %v7700_v59 }
0x1aeb   : > { %7708 = vmatprep.subr.bf16.mxu1 %v8216_v3 }
0x1aed   : > { %7278 = vmatmul.mubr.msk.f32.gmra.mrb[58].mxu1 %vm1468_vm2, %v9049_v16  ;;  %v7975_v16 = vunpack.i.l.bf16 %v7974_v53  ;;  %v7984_v7 = vpop.permute.xlu0 %7983 }
0x1aee   : > { %7305 = vmatprep.mubr.msk.f32.mxu1 %vm8217_vm0, %v8218_v6  ;;  %v7986_v20 = vunpack.i.h.bf16 %v7984_v7  ;;  %v7985_v51 = vunpack.i.l.bf16 %v7984_v7 }
0x1aef   : > { %v7691_v62 = vpack.c.bf16 %v7976_v24, %v7975_v16 }
0x1af0   : > { %v7703_v44 = vpack.c.bf16 %v7986_v20, %v7985_v51 }
0x1af1   : > { %7306 = vmatmul.mubr.msk.f32.vlgmr.msra.gmra.mrb[60].mxu1 %vm1215_vm1, %v8850_v4 }
0x1af2   : > { %7308 = vmatprep.mubr.msk.f32.mxu1 %vm8217_vm0, %v8218_v6 }
0x1af5   : > { %7309 = vmatmul.mubr.msk.f32.gmra.mrb[62].mxu1 %vm1215_vm1, %v8860_v19 }
0x1af6   : > { %7311 = vmatprep.mubr.msk.f32.mxu1 %vm8217_vm0, %v8218_v6 }
0x1af9   : > { %7312 = vmatmul.mubr.msk.f32.gmra.mrb[64].mxu1 %vm1215_vm1, %v8888_v22 }
0x1afa   : > { %7337 = vmatprep.mubr.msk.f32.mxu1 %vm8217_vm0, %v8218_v6 }
0x1bac   : > { %v4551_v58 = vpop.f32.mrb[48].mxu1 }
0x1bad   : > { %v7251_v1 = vpop.f32.mrb[49].mxu1  ;;  %7261 = vmatmul.mubr.msk.f32.vlgmr.msra.gmra.mrb[58].mxu0 %vm1468_vm2, %v4551_v58 }
0x1bae   : > { %7263 = vmatprep.mubr.msk.f32.mxu0 %vm8217_vm0, %v8218_v6  ;;  %7692 = vmatpush3.bf16.msra.mxu0 %v7691_v62 }
0x1baf   : > { %7693 = vmatprep.subr.bf16.mxu0 %v8216_v3 }
0x1bb0   : > { %v4556_v10 = vpop.f32.mrb[50].mxu1 }
0x1bb1   : > { %v7254_v13 = vpop.f32.mrb[51].mxu1  ;;  %7264 = vmatmul.mubr.msk.f32.gmra.mrb[60].mxu0 %vm1468_vm2, %v4556_v10 }
0x1bb2   : > { %7266 = vmatprep.mubr.msk.f32.mxu0 %vm8217_vm0, %v8218_v6  ;;  %7695 = vmatpush3.bf16.msra.mxu0 %v7694_v5 }
0x1bb3   : > { %7702 = vmatprep.subr.bf16.mxu0 %v8216_v3 }
0x1bb4   : > { %v4561_v42 = vpop.f32.mrb[52].mxu1 }
0x1bb5   : > { %v7257_v43 = vpop.f32.mrb[53].mxu1  ;;  %7267 = vmatmul.mubr.msk.f32.gmra.mrb[62].mxu0 %vm1468_vm2, %v4561_v42 }
0x1bb6   : > { %7288 = vmatprep.mubr.msk.f32.mxu0 %vm8217_vm0, %v8218_v6 }
0x1bb8   : > { %v4730_v26 = vpop.f32.mrb[54].mxu1 }
0x1bb9   : > { %v7273_v27 = vpop.f32.mrb[55].mxu1  ;;  %7289 = vmatmul.mubr.msk.f32.vlgmr.msra.gmra.mrb[64].mxu0 %vm1215_vm1, %v8850_v4 }
0x1bba   : > { %7291 = vmatprep.mubr.msk.f32.mxu0 %vm8217_vm0, %v8218_v6  ;;  %7704 = vmatpush3.bf16.msra.mxu0 %v7703_v44 }
0x1bbb   : > { %7705 = vmatprep.subr.bf16.mxu0 %v8216_v3 }
0x1bbc   : > { %v4735_v31 = vpop.f32.mrb[56].mxu1 }
0x1bbd   : > { %v7276_v32 = vpop.f32.mrb[57].mxu1  ;;  %7292 = vmatmul.mubr.msk.f32.gmra.mrb[66].mxu0 %vm1215_vm1, %v8860_v19 }
0x1bbe   : > { %7294 = vmatprep.mubr.msk.f32.mxu0 %vm8217_vm0, %v8218_v6  ;;  %7707 = vmatpush3.bf16.msra.mxu0 %v7706_v30 }
0x1bbf   : > { %7712 = vmatprep.subr.bf16.mxu0 %v8216_v3 }
0x1bc0   : > { %v4740_v17 = vpop.f32.mrb[58].mxu1 }
0x1bc1   : > { %v7279_v34 = vpop.f32.mrb[59].mxu1  ;;  %7295 = vmatmul.mubr.msk.f32.gmra.mrb[68].mxu0 %vm1215_vm1, %v8888_v22 }
0x1bc2   : > { %7322 = vmatprep.mubr.msk.f32.mxu0 %vm8217_vm0, %v8218_v6 }
0x1bc4   : > { %v4923_v18 = vpop.f32.mrb[60].mxu1 }
0x1bc5   : > { %v7307_v41 = vpop.f32.mrb[61].mxu1  ;;  %7323 = vmatmul.mubr.msk.f32.vlgmr.msra.gmra.mrb[70].mxu0 %vm1215_vm1, %v8850_v4  ;;  %v4924_v50 = vadd.f32 %v4923_v18, %v9145_v61 }
0x1bc6   : > { %7325 = vmatprep.mubr.msk.f32.mxu0 %vm8217_vm0, %v8218_v6 }
0x1bc8   : > { %v4928_v48 = vpop.f32.mrb[62].mxu1 }
0x1bc9   : > { %v4929_v35 = vadd.f32 %v4928_v48, %v9145_v61  ;;  %v7310_v38 = vpop.f32.mrb[63].mxu1  ;;  %7326 = vmatmul.mubr.msk.f32.gmra.mrb[72].mxu0 %vm1215_vm1, %v8860_v19 }
0x1bca   : > { %7328 = vmatprep.mubr.msk.f32.mxu0 %vm8217_vm0, %v8218_v6 }
0x1bcb   : > { %v7709_v39 = vpack.c.bf16 %v4929_v35, %v4924_v50 }
0x1bcc   : > { %v4933_v45 = vpop.f32.mrb[64].mxu1 }
0x1bcd   : > { %v7313_v46 = vpop.f32.mrb[65].mxu1  ;;  %7329 = vmatmul.mubr.msk.f32.gmra.mrb[74].mxu0 %vm1215_vm1, %v8888_v22  ;;  %7711 = vmatpush3.bf16.xpose.msk.msra.mxu1 %vm8540_vm3, %v7709_v39  ;;  %v4934_v47 = vadd.f32 %v4933_v45, %v9145_v61 }
0x1bce   : > { %7335 = vmatprep.subr.mxu1 %v8218_v6  ;;  %7352 = vmatprep.mubr.msk.f32.mxu0 %vm8217_vm0, %v8218_v6  ;;  %v8104_v46 = vld [vmem:[%s9555_s18 + $0x10] sm:$0xff] }
0x1bd5   : > { %7336 = vmatpush3.xpose.msk.msra.mxu1 %vm1468_vm2, %v4934_v47  ;;  %v8105_v47 = vld [vmem:[%s9555_s18 + $0x18] sm:$0xff] }
0x1bd6   : > { %7361 = vmatprep.subr.mxu1 %v8218_v6 }
0x1c80   : > { %v4641_v49 = vpop.f32.mrb[58].mxu0 }
0x1c81   : > { %v9194_v8 = vadd.f32 %v4730_v26, %v4641_v49  ;;  %v7262_v9 = vpop.f32.mrb[59].mxu0  ;;  %v7997_v49 = vpack.i.bf16 %v8105_v47, %v8104_v46 }
0x1c82   : > { %v8106_v9 = vld [vmem:[%s9554_s1] sm:$0xff] }
0x1c84   : > { %v4646_v52 = vpop.f32.mrb[60].mxu0 }
0x1c85   : > { %v9196_v11 = vadd.f32 %v4735_v31, %v4646_v52  ;;  %v7265_v12 = vpop.f32.mrb[61].mxu0  ;;  %v8107_v52 = vld [vmem:[%s9554_s1 + $0x8] sm:$0xff] }
0x1c86   : > { %v8002_v12 = vpack.i.bf16 %v8107_v52, %v8106_v9 }
0x1c88   : > { %v4651_v14 = vpop.f32.mrb[62].mxu0 }
0x1c89   : > { %v9198_v15 = vadd.f32 %v4740_v17, %v4651_v14  ;;  %v7268_v40 = vpop.f32.mrb[63].mxu0  ;;  %v8108_v14 = vld [vmem:[%s9555_s18] sm:$0xff] }
0x1c8a   : > { %v8109_v40 = vld [vmem:[%s9555_s18 + $0x8] sm:$0xff] }
0x1c8c   : > { %v4825_v55 = vpop.f32.mrb[64].mxu0 }
0x1c8d   : > { %v4826_v56 = vadd.f32 %v4825_v55, %v9148_v2  ;;  %v7290_v57 = vpop.f32.mrb[65].mxu0  ;;  %v7992_v55 = vpack.i.bf16 %v8109_v40, %v8108_v14 }
0x1c8e   : > { %v8111_v57 = vld [vmem:[%s9554_s1 + $0x18] sm:$0xff] }
0x1c8f   : > { %v4839_v59 = vmul.f32 0.35355338, %v4826_v56  ;;  %v8110_v56 = vld [vmem:[%s9554_s1 + $0x10] sm:$0xff]  ;;  %s9568_s1 = sld [smem:[#allocation25_spill]] }
0x1c90   : > { %v4830_v53 = vpop.f32.mrb[66].mxu0 }
0x1c91   : > { %v4831_v24 = vadd.f32 %v4830_v53, %v9148_v2  ;;  %v7293_v16 = vpop.f32.mrb[67].mxu0  ;;  %7338 = vmatmul.mubr.msk.f32.vlgmr.msra.gmra.mrb[66].mxu1 %vm1468_vm2, %v4839_v59  ;;  %v8007_v59 = vpack.i.bf16 %v8111_v57, %v8110_v56 }
0x1c92   : > { %7340 = vmatprep.mubr.msk.f32.mxu1 %vm8217_vm0, %v8218_v6 }
0x1c93   : > { %v4840_v60 = vmul.f32 0.35355338, %v4831_v24 }
0x1c94   : > { %v4835_v61 = vpop.f32.mrb[68].mxu0 }
0x1c95   : > { %v4836_v62 = vadd.f32 %v4835_v61, %v9148_v2  ;;  %v7296_v63 = vpop.f32.mrb[69].mxu0  ;;  %7341 = vmatmul.mubr.msk.f32.gmra.mrb[68].mxu1 %vm1468_vm2, %v4840_v60 }
0x1c96   : > { %7343 = vmatprep.mubr.msk.f32.mxu1 %vm8217_vm0, %v8218_v6 }
0x1c97   : > { %v4841_v0 = vmul.f32 0.35355338, %v4836_v62 }
0x1c98   : > { %v9209_v58 = vpop.f32.mrb[70].mxu0 }
0x1c99   : > { %v7324_v1 = vpop.f32.mrb[71].mxu0  ;;  %7344 = vmatmul.mubr.msk.f32.gmra.mrb[70].mxu1 %vm1468_vm2, %v4841_v0 }
0x1c9a   : > { %7363 = vmatprep.mubr.msk.f32.mxu1 %vm8217_vm0, %v8218_v6 }
0x1c9c   : > { %v9214_v5 = vpop.f32.mrb[72].mxu0 }
0x1c9d   : > { %v7327_v7 = vpop.f32.mrb[73].mxu0 }
0x1ca0   : > { %v9216_v10 = vpop.f32.mrb[74].mxu0 }
0x1ca1   : > { %v7330_v2 = vpop.f32.mrb[75].mxu0 }
0x1d64   : > { %v5116_v13 = vpop.f32.mrb[66].mxu1 }
0x1d65   : > { %v7339_v20 = vpop.f32.mrb[67].mxu1  ;;  %v5130_v51 = vsel %vm3921_vm6, %v5116_v13, -inf }
0x1d66   : > { %5131 = vmax.xlane.f32.xlu0 %v5130_v51 }
0x1d68   : > { %v5121_v21 = vpop.f32.mrb[68].mxu1 }
0x1d69   : > { %v7342_v42 = vpop.f32.mrb[69].mxu1  ;;  %v5133_v43 = vsel %vm3921_vm6, %v5121_v21, -inf }
0x1d6a   : > { %5134 = vmax.xlane.f32.xlu1 %v5133_v43 }
0x1d6c   : > { %v5126_v44 = vpop.f32.mrb[70].mxu1 }
0x1d6d   : > { %v7345_v23 = vpop.f32.mrb[71].mxu1  ;;  %v5136_v29 = vsel %vm3921_vm6, %v5126_v44, -inf }
0x1d6e   : > { %5137 = vmax.xlane.f32.xlu0 %v5136_v29 }
0x1df3   : > { %v5132_v26 = vpop.xlane.xlu0 %5131 }
0x1df4   : > { %v5139_v27 = vsub.f32 %v5116_v13, %v5132_v26 }
0x1df6   : > { %v5142_v30 = vmul.f32 1.442695, %v5139_v27 }
0x1df7   : > { %v5135_v31 = vpop.xlane.xlu1 %5134 }
0x1df8   : > { %8072 = vpow2.f32 %v5142_v30  ;;  %v5140_v32 = vsub.f32 %v5121_v21, %v5135_v31 }
0x1dfa   : > { %v5144_v17 = vmul.f32 1.442695, %v5140_v32 }
0x1dfb   : > { %v5138_v34 = vpop.xlane.xlu0 %5137 }
0x1dfc   : > { %8074 = vpow2.f32 %v5144_v17  ;;  %v5141_v18 = vsub.f32 %v5126_v44, %v5138_v34 }
0x1dfe   : > { %v5146_v41 = vmul.f32 1.442695, %v5141_v18 }
0x1e00   : > { %8076 = vpow2.f32 %v5146_v41 }
0x1e02   : > { %v8073_v48 = vpop.eup %8072 }
0x1e03   : > { %v5148_v50 = vsel %vm3921_vm6, %v8073_v48, 0.0 }
0x1e04   : > { %5149 = vadd.xlane.f32.xlu0 %v5148_v50 }
0x1e06   : > { %v8075_v35 = vpop.eup %8074 }
0x1e07   : > { %v5151_v38 = vsel %vm3921_vm6, %v8075_v35, 0.0 }
0x1e08   : > { %5152 = vadd.xlane.f32.xlu1 %v5151_v38 }
0x1e0a   : > { %v9223_v39 = vpop.eup %8076 }
0x1e0b   : > { %v5154_v45 = vsel %vm3921_vm6, %v9223_v39, 0.0 }
0x1e0c   : > { %5155 = vadd.xlane.f32.xlu0 %v5154_v45 }
0x1e19   : > { %4949 = vrot.lane.b32.xlu1 %v8927_v54, %s9563_s5  ;;  %v5252_v54 = vld [vmem:[%s9562_s7 + $0x10] sm:$0xff]  ;;  %s9565_s5 = sld [smem:[#allocation24_spill]] }
0x1e1a   : > { %7362 = vmatpush3.msra.mxu1 %v5252_v54 }
0x1e1b   : > { %7721 = vmatprep.subr.bf16.mxu1 %v8216_v3 }
0x1e1d   : > { %7998 = vrot.lane.b32.xlu1 %v7997_v49, %s9564_s17 }
0x1e21   : > { %8003 = vrot.lane.b32.xlu1 %v8002_v12, %s9564_s17 }
0x1e22   : > { %7993 = vrot.lane.b32.xlu0 %v7992_v55, %s9564_s17 }
0x1e25   : > { %5455 = vrot.lane.b32.xlu1 %v8911_v25, %s9564_s17 }
0x1e26   : > { %8008 = vrot.lane.b32.xlu0 %v8007_v59, %s9564_s17 }
0x1e29   : > { %8013 = vrot.lane.b32.xlu1 %v8978_v36, %s9564_s17 }
0x1e2a   : > { %5357 = vrot.lane.b32.xlu0 %v8919_v33, %s9564_s17 }
0x1e2e   : > { %8018 = vrot.lane.b32.xlu0 %v8984_v37, %s9564_s17 }
0x1e91   : > { %v5150_v53 = vpop.xlane.xlu0 %5149 }
0x1e92   : > { %8078 = vrcp.f32 %v5150_v53 }
0x1e95   : > { %v5153_v24 = vpop.xlane.xlu1 %5152 }
0x1e96   : > { %8080 = vrcp.f32 %v5153_v24 }
0x1e99   : > { %v4950_v25 = vpop.permute.xlu1 %4949  ;;  %v5156_v16 = vpop.xlane.xlu0 %5155 }
0x1e9a   : > { %v5019_v60 = vadd.f32 %v9209_v58, %v4950_v25  ;;  %v5024_v36 = vadd.f32 %v9214_v5, %v4950_v25  ;;  %8082 = vrcp.f32 %v5156_v16  ;;  %v5029_v63 = vadd.f32 %v9216_v10, %v4950_v25 }
0x1e9c   : > { %v7713_v61 = vpack.c.bf16 %v5024_v36, %v5019_v60  ;;  %v8079_v37 = vpop.eup %8078 }
0x1e9d   : > { %v9253_v33 = vpop.permute.xlu1 %7998  ;;  %v7994_v62 = vpop.permute.xlu0 %7993  ;;  %v5160_v0 = vmul.f32 %v8079_v37, %v8073_v48 }
0x1e9e   : > { %7714 = vmatpush3.bf16.msra.mxu0 %v7713_v61  ;;  %v7996_v18 = vunpack.i.h.bf16 %v7994_v62  ;;  %v7995_v41 = vunpack.i.l.bf16 %v7994_v62  ;;  %v8001_v48 = vunpack.i.h.bf16 %v9253_v33  ;;  %v8000_v50 = vunpack.i.l.bf16 %v9253_v33 }
0x1e9f   : > { %7350 = vmatprep.subr.mxu0 %v8218_v6 }
0x1ea0   : > { %v8081_v2 = vpop.eup %8080  ;;  %v7725_v45 = vpack.c.bf16 %v8001_v48, %v8000_v50 }
0x1ea1   : > { %v8004_v1 = vpop.permute.xlu1 %8003  ;;  %v8009_v7 = vpop.permute.xlu0 %8008  ;;  %v5161_v21 = vmul.f32 %v8081_v2, %v8075_v35  ;;  %v7722_v35 = vpack.c.bf16 %v7996_v18, %v7995_v41 }
0x1ea2   : > { %7351 = vmatpush3.msra.mxu0 %v5029_v63  ;;  %v8006_v13 = vunpack.i.h.bf16 %v8004_v1  ;;  %v8005_v58 = vunpack.i.l.bf16 %v8004_v1  ;;  %v8011_v20 = vunpack.i.h.bf16 %v8009_v7  ;;  %v8010_v5 = vunpack.i.l.bf16 %v8009_v7 }
0x1ea3   : > { %7353 = vmatmul.mubr.msk.f32.vlgmr.msra.gmra.mrb[76].mxu0 %vm3921_vm6, %v5160_v0  ;;  %7715 = vmatprep.subr.bf16.mxu0 %v8216_v3 }
0x1ea4   : > { %v7716_v51 = vpack.c.bf16 %v8006_v13, %v8005_v58  ;;  %7355 = vmatprep.mubr.msk.f32.mxu0 %vm8217_vm0, %v8218_v6  ;;  %v8083_v43 = vpop.eup %8082  ;;  %v7719_v44 = vpack.c.bf16 %v8011_v20, %v8010_v5 }
0x1ea5   : > { %v9261_v42 = vpop.permute.xlu1 %5455  ;;  %v9263_v10 = vpop.permute.xlu0 %5357  ;;  %v5162_v23 = vmul.f32 %v8083_v43, %v9223_v39 }
0x1ea6   : > { %7717 = vmatpush3.bf16.msra.mxu0 %v7716_v51 }
0x1ea7   : > { %7356 = vmatmul.mubr.msk.f32.gmra.mrb[78].mxu0 %vm3921_vm6, %v5161_v21  ;;  %7718 = vmatprep.subr.bf16.mxu0 %v8216_v3 }
0x1ea8   : > { %7358 = vmatprep.mubr.msk.f32.mxu0 %vm8217_vm0, %v8218_v6 }
0x1ea9   : > { %v8014_v29 = vpop.permute.xlu1 %8013  ;;  %v8019_v26 = vpop.permute.xlu0 %8018 }
0x1eaa   : > { %7720 = vmatpush3.bf16.msra.mxu0 %v7719_v44  ;;  %v8016_v27 = vunpack.i.h.bf16 %v8014_v29  ;;  %v8015_v30 = vunpack.i.l.bf16 %v8014_v29  ;;  %v8021_v32 = vunpack.i.h.bf16 %v8019_v26  ;;  %v8020_v17 = vunpack.i.l.bf16 %v8019_v26 }
0x1eab   : > { %7359 = vmatmul.mubr.msk.f32.gmra.mrb[80].mxu0 %vm3921_vm6, %v5162_v23  ;;  %7727 = vmatprep.subr.bf16.mxu0 %v8216_v3 }
0x1eac   : > { %7380 = vmatprep.mubr.msk.f32.mxu0 %vm8217_vm0, %v8218_v6  ;;  %v7728_v31 = vpack.c.bf16 %v8016_v27, %v8015_v30  ;;  %v7731_v34 = vpack.c.bf16 %v8021_v32, %v8020_v17 }
0x1eaf   : > { %7381 = vmatmul.mubr.msk.f32.vlgmr.msra.gmra.mrb[82].mxu0 %vm1215_vm1, %v8850_v4 }
0x1eb0   : > { %7383 = vmatprep.mubr.msk.f32.mxu0 %vm8217_vm0, %v8218_v6  ;;  %7729 = vmatpush3.bf16.msra.mxu0 %v7728_v31 }
0x1eb1   : > { %7730 = vmatprep.subr.bf16.mxu0 %v8216_v3 }
0x1eb3   : > { %7384 = vmatmul.mubr.msk.f32.gmra.mrb[84].mxu0 %vm1215_vm1, %v8860_v19 }
0x1eb4   : > { %7386 = vmatprep.mubr.msk.f32.mxu0 %vm8217_vm0, %v8218_v6  ;;  %7732 = vmatpush3.bf16.msra.mxu0 %v7731_v34 }
0x1eb5   : > { %7737 = vmatprep.subr.bf16.mxu0 %v8216_v3 }
0x1eb7   : > { %7387 = vmatmul.mubr.msk.f32.gmra.mrb[86].mxu0 %vm1215_vm1, %v8888_v22 }
0x1eb8   : > { %7414 = vmatprep.mubr.msk.f32.mxu0 %vm8217_vm0, %v8218_v6 }
0x1ebb   : > { %7415 = vmatmul.mubr.msk.f32.vlgmr.msra.gmra.mrb[88].mxu0 %vm1215_vm1, %v8850_v4 }
0x1ebc   : > { %7417 = vmatprep.mubr.msk.f32.mxu0 %vm8217_vm0, %v8218_v6 }
0x1ebf   : > { %7418 = vmatmul.mubr.msk.f32.gmra.mrb[90].mxu0 %vm1215_vm1, %v8860_v19 }
0x1ec0   : > { %7420 = vmatprep.mubr.msk.f32.mxu0 %vm8217_vm0, %v8218_v6 }
0x1ec3   : > { %7421 = vmatmul.mubr.msk.f32.gmra.mrb[92].mxu0 %vm1215_vm1, %v8888_v22 }
0x1ec4   : > { %7444 = vmatprep.mubr.msk.f32.mxu0 %vm8217_vm0, %v8218_v6 }
0x1f76   : > { %v5238_v38 = vpop.f32.mrb[76].mxu0 }
0x1f77   : > { %v7354_v39 = vpop.f32.mrb[77].mxu0  ;;  %7364 = vmatmul.mubr.msk.f32.vlgmr.msra.gmra.mrb[72].mxu1 %vm1468_vm2, %v5238_v38 }
0x1f78   : > { %7366 = vmatprep.mubr.msk.f32.mxu1 %vm8217_vm0, %v8218_v6  ;;  %7723 = vmatpush3.bf16.msra.mxu1 %v7722_v35 }
0x1f79   : > { %7724 = vmatprep.subr.bf16.mxu1 %v8216_v3 }
0x1f7a   : > { %v5243_v46 = vpop.f32.mrb[78].mxu0 }
0x1f7b   : > { %v7357_v47 = vpop.f32.mrb[79].mxu0  ;;  %7367 = vmatmul.mubr.msk.f32.gmra.mrb[74].mxu1 %vm1468_vm2, %v5243_v46 }
0x1f7c   : > { %7369 = vmatprep.mubr.msk.f32.mxu1 %vm8217_vm0, %v8218_v6  ;;  %7726 = vmatpush3.bf16.msra.mxu1 %v7725_v45 }
0x1f7d   : > { %7733 = vmatprep.subr.bf16.mxu1 %v8216_v3 }
0x1f7e   : > { %v5248_v49 = vpop.f32.mrb[80].mxu0 }
0x1f7f   : > { %v7360_v9 = vpop.f32.mrb[81].mxu0  ;;  %7370 = vmatmul.mubr.msk.f32.gmra.mrb[76].mxu1 %vm1468_vm2, %v5248_v49 }
0x1f80   : > { %7397 = vmatprep.mubr.msk.f32.mxu1 %vm8217_vm0, %v8218_v6 }
0x1f82   : > { %v5426_v52 = vpop.f32.mrb[82].mxu0 }
0x1f83   : > { %v7382_v12 = vpop.f32.mrb[83].mxu0  ;;  %7398 = vmatmul.mubr.msk.f32.vlgmr.msra.gmra.mrb[78].mxu1 %vm1215_vm1, %v8850_v4 }
0x1f84   : > { %7400 = vmatprep.mubr.msk.f32.mxu1 %vm8217_vm0, %v8218_v6 }
0x1f86   : > { %v5431_v14 = vpop.f32.mrb[84].mxu0 }
0x1f87   : > { %v7385_v40 = vpop.f32.mrb[85].mxu0  ;;  %7401 = vmatmul.mubr.msk.f32.gmra.mrb[80].mxu1 %vm1215_vm1, %v8860_v19  ;;  %v5432_v43 = vadd.f32 %v5431_v14, %v9263_v10  ;;  %v8112_v14 = vld [vmem:[%s9560_s3] ss:$0 sm:$0xff]  ;;  %s9569_s3 = sld [smem:[#allocation26_spill]] }
0x1f88   : > { %7403 = vmatprep.mubr.msk.f32.mxu1 %vm8217_vm0, %v8218_v6  ;;  %v5853_v40 = vld [vmem:[%s9562_s7 + $0x18] sm:$0xff] }
0x1f89   : > { %v5441_v28 = vmul.f32 0.35355338, %v5432_v43 }
0x1f8a   : > { %v5436_v55 = vpop.f32.mrb[86].mxu0 }
0x1f8b   : > { %v7388_v56 = vpop.f32.mrb[87].mxu0  ;;  %7404 = vmatmul.mubr.msk.f32.gmra.mrb[82].mxu1 %vm1215_vm1, %v8888_v22  ;;  %v5437_v44 = vadd.f32 %v5436_v55, %v9263_v10 }
0x1f8c   : > { %7429 = vmatprep.mubr.msk.f32.mxu1 %vm8217_vm0, %v8218_v6 }
0x1f8e   : > { %v9325_v57 = vpop.f32.mrb[88].mxu0 }
0x1f8f   : > { %v7416_v59 = vpop.f32.mrb[89].mxu0 }
0x1f92   : > { %v9327_v54 = vpop.f32.mrb[90].mxu0 }
0x1f93   : > { %v7419_v53 = vpop.f32.mrb[91].mxu0 }
0x1f96   : > { %v9329_v24 = vpop.f32.mrb[92].mxu0 }
0x1f97   : > { %v7422_v25 = vpop.f32.mrb[93].mxu0 }
0x204a   : > { %v5328_v16 = vpop.f32.mrb[72].mxu1 }
0x204b   : > { %v9332_v60 = vadd.f32 %v5328_v16, %v9194_v8  ;;  %v7365_v36 = vpop.f32.mrb[73].mxu1 }
0x204e   : > { %v5333_v61 = vpop.f32.mrb[74].mxu1 }
0x204f   : > { %v9335_v33 = vadd.f32 %v5333_v61, %v9196_v11  ;;  %v7368_v62 = vpop.f32.mrb[75].mxu1  ;;  %v5427_v11 = vadd.f32 %v5426_v52, %v9263_v10 }
0x2051   : > { %v5440_v21 = vmul.f32 0.35355338, %v5427_v11 }
0x2052   : > { %v5338_v37 = vpop.f32.mrb[76].mxu1 }
0x2053   : > { %v9338_v63 = vadd.f32 %v5338_v37, %v9198_v15  ;;  %v7371_v0 = vpop.f32.mrb[77].mxu1 }
0x2056   : > { %v5524_v1 = vpop.f32.mrb[78].mxu1 }
0x2057   : > { %v7399_v7 = vpop.f32.mrb[79].mxu1  ;;  %v5525_v13 = vadd.f32 %v5524_v1, %v9261_v42 }
0x205a   : > { %v5529_v2 = vpop.f32.mrb[80].mxu1 }
0x205b   : > { %v5530_v58 = vadd.f32 %v5529_v2, %v9261_v42  ;;  %v7402_v8 = vpop.f32.mrb[81].mxu1 }
0x205d   : > { %v7734_v20 = vpack.c.bf16 %v5530_v58, %v5525_v13 }
0x205e   : > { %v5534_v5 = vpop.f32.mrb[82].mxu1 }
0x205f   : > { %v7405_v51 = vpop.f32.mrb[83].mxu1  ;;  %7736 = vmatpush3.bf16.xpose.msk.msra.mxu1 %vm8540_vm3, %v7734_v20  ;;  %v5535_v15 = vadd.f32 %v5534_v5, %v9261_v42  ;;  %v5442_v42 = vmul.f32 0.35355338, %v5437_v44  ;;  %v6561_v5 = vld [vmem:[%s9565_s5] ss:$0 sm:$0xff]  ;;  %s9567_s5 = sld [smem:[#allocation29_spill]] }
0x2060   : > { %7427 = vmatprep.subr.mxu1 %v8218_v6 }
0x2067   : > { %7428 = vmatpush3.xpose.msk.msra.mxu1 %vm1468_vm2, %v5535_v15 }
0x2068   : > { %7453 = vmatprep.subr.mxu1 %v8218_v6 }
0x206a   : > { %7430 = vmatmul.mubr.msk.f32.vlgmr.msra.gmra.mrb[84].mxu1 %vm1468_vm2, %v5440_v21 }
0x206b   : > { %7432 = vmatprep.mubr.msk.f32.mxu1 %vm8217_vm0, %v8218_v6  ;;  %7454 = vmatpush3.msra.mxu1 %v5853_v40  ;;  %v6122_v40 = vld [vmem:[%s9567_s5 + $0x8] sm:$0xff] }
0x206c   : > { %7746 = vmatprep.subr.bf16.mxu1 %v8216_v3 }
0x206e   : > { %7433 = vmatmul.mubr.msk.f32.gmra.mrb[86].mxu1 %vm1468_vm2, %v5441_v28 }
0x206f   : > { %7435 = vmatprep.mubr.msk.f32.mxu1 %vm8217_vm0, %v8218_v6 }
0x2072   : > { %7436 = vmatmul.mubr.msk.f32.gmra.mrb[88].mxu1 %vm1468_vm2, %v5442_v42 }
0x2073   : > { %7455 = vmatprep.mubr.msk.f32.mxu1 %vm8217_vm0, %v8218_v6 }
0x213d   : > { %v5717_v23 = vpop.f32.mrb[84].mxu1 }
0x213e   : > { %v7431_v29 = vpop.f32.mrb[85].mxu1  ;;  %v5731_v26 = vsel %vm3921_vm6, %v5717_v23, -inf }
0x213f   : > { %5732 = vmax.xlane.f32.xlu1 %v5731_v26 }
0x2141   : > { %v5722_v27 = vpop.f32.mrb[86].mxu1 }
0x2142   : > { %v7434_v30 = vpop.f32.mrb[87].mxu1  ;;  %v5734_v10 = vsel %vm3921_vm6, %v5722_v27, -inf }
0x2143   : > { %5735 = vmax.xlane.f32.xlu0 %v5734_v10 }
0x2145   : > { %v5727_v31 = vpop.f32.mrb[88].mxu1 }
0x2146   : > { %v7437_v32 = vpop.f32.mrb[89].mxu1  ;;  %v5737_v17 = vsel %vm3921_vm6, %v5727_v31, -inf }
0x2147   : > { %5738 = vmax.xlane.f32.xlu0 %v5737_v17 }
0x21cc   : > { %v5733_v34 = vpop.xlane.xlu1 %5732 }
0x21cd   : > { %v5740_v18 = vsub.f32 %v5717_v23, %v5733_v34 }
0x21cf   : > { %v5743_v41 = vmul.f32 1.442695, %v5740_v18 }
0x21d0   : > { %v5736_v48 = vpop.xlane.xlu0 %5735 }
0x21d1   : > { %8084 = vpow2.f32 %v5743_v41  ;;  %v5741_v50 = vsub.f32 %v5722_v27, %v5736_v48 }
0x21d3   : > { %v5745_v35 = vmul.f32 1.442695, %v5741_v50 }
0x21d4   : > { %v5739_v38 = vpop.xlane.xlu0 %5738 }
0x21d5   : > { %8086 = vpow2.f32 %v5745_v35  ;;  %v5742_v39 = vsub.f32 %v5727_v31, %v5739_v38 }
0x21d7   : > { %v5747_v45 = vmul.f32 1.442695, %v5742_v39 }
0x21d9   : > { %8088 = vpow2.f32 %v5747_v45 }
0x21db   : > { %v8085_v46 = vpop.eup %8084 }
0x21dc   : > { %v5749_v47 = vsel %vm3921_vm6, %v8085_v46, 0.0 }
0x21dd   : > { %5750 = vadd.xlane.f32.xlu1 %v5749_v47 }
0x21df   : > { %v8087_v49 = vpop.eup %8086 }
0x21e0   : > { %v5752_v9 = vsel %vm3921_vm6, %v8087_v49, 0.0 }
0x21e1   : > { %5753 = vadd.xlane.f32.xlu0 %v5752_v9 }
0x21e3   : > { %v8089_v52 = vpop.eup %8088 }
0x21e4   : > { %v5755_v12 = vsel %vm3921_vm6, %v8089_v52, 0.0 }
0x21e5   : > { %5756 = vadd.xlane.f32.xlu1 %v5755_v12 }
0x21f7   : > { %5550 = vrot.lane.b32.xlu0 %v8112_v14, %s9564_s17  ;;  %s9566_s17 = sld [smem:[#allocation27_spill]]  ;;  %v6121_v14 = vld [vmem:[%s9567_s5] sm:$0xff] }
0x21fd   : > { %v6019_v47 = vld [vmem:[%s9566_s17 + $0x8] sm:$0xff]  ;;  %v6020_v9 = vld [vmem:[%s9566_s17 + $0x10] sm:$0xff] }
0x226a   : > { %v5751_v55 = vpop.xlane.xlu1 %5750 }
0x226b   : > { %8090 = vrcp.f32 %v5751_v55  ;;  %v6123_v55 = vld [vmem:[%s9567_s5 + $0x10] sm:$0xff] }
0x226e   : > { %v5754_v56 = vpop.xlane.xlu0 %5753 }
0x226f   : > { %8092 = vrcp.f32 %v5754_v56  ;;  %v7747_v56 = vpack.c.bf16 %v6122_v40, %v6121_v14 }
0x2272   : > { %v5757_v59 = vpop.xlane.xlu1 %5756  ;;  %v5551_v53 = vpop.permute.xlu0 %5550 }
0x2273   : > { %v5620_v25 = vadd.f32 %v9325_v57, %v5551_v53  ;;  %v5625_v16 = vadd.f32 %v9327_v54, %v5551_v53  ;;  %8094 = vrcp.f32 %v5757_v59  ;;  %v5630_v62 = vadd.f32 %v9329_v24, %v5551_v53  ;;  %v6124_v59 = vld [vmem:[%s9567_s5 + $0x18] sm:$0xff] }
0x2274   : > { %v7750_v53 = vpack.c.bf16 %v6124_v59, %v6123_v55 }
0x2275   : > { %v7738_v36 = vpack.c.bf16 %v5625_v16, %v5620_v25  ;;  %v8091_v61 = vpop.eup %8090  ;;  %v6125_v25 = vld [vmem:[%s9567_s5 + $0x20] sm:$0xff]  ;;  %v6126_v16 = vld [vmem:[%s9567_s5 + $0x28] sm:$0xff] }
0x2276   : > { %v5761_v37 = vmul.f32 %v8091_v61, %v8085_v46  ;;  %v6018_v46 = vld [vmem:[%s9566_s17] sm:$0xff] }
0x2277   : > { %7739 = vmatpush3.bf16.msra.mxu0 %v7738_v36  ;;  %v7753_v36 = vpack.c.bf16 %v6126_v16, %v6125_v25  ;;  %v6253_v16 = vld [vmem:[%s9574_s4] sm:$0xff] }
0x2278   : > { %7442 = vmatprep.subr.mxu0 %v8218_v6 }
0x2279   : > { %v8093_v0 = vpop.eup %8092 }
0x227a   : > { %v5762_v57 = vmul.f32 %v8093_v0, %v8087_v49  ;;  %v7741_v49 = vpack.c.bf16 %v6019_v47, %v6018_v46 }
0x227b   : > { %7443 = vmatpush3.msra.mxu0 %v5630_v62 }
0x227c   : > { %7445 = vmatmul.mubr.msk.f32.vlgmr.msra.gmra.mrb[94].mxu0 %vm3921_vm6, %v5761_v37  ;;  %7740 = vmatprep.subr.bf16.mxu0 %v8216_v3 }
0x227d   : > { %7447 = vmatprep.mubr.msk.f32.mxu0 %vm8217_vm0, %v8218_v6  ;;  %v8095_v54 = vpop.eup %8094  ;;  %7742 = vmatpush3.bf16.msra.mxu0 %v7741_v49 }
0x227e   : > { %v5763_v1 = vmul.f32 %v8095_v54, %v8089_v52  ;;  %7743 = vmatprep.subr.bf16.mxu0 %v8216_v3  ;;  %v6021_v52 = vld [vmem:[%s9566_s17 + $0x18] sm:$0xff] }
0x227f   : > { %v7744_v12 = vpack.c.bf16 %v6021_v52, %v6020_v9 }
0x2280   : > { %7448 = vmatmul.mubr.msk.f32.gmra.mrb[96].mxu0 %vm3921_vm6, %v5762_v57 }
0x2281   : > { %7450 = vmatprep.mubr.msk.f32.mxu0 %vm8217_vm0, %v8218_v6  ;;  %7745 = vmatpush3.bf16.msra.mxu0 %v7744_v12 }
0x2284   : > { %7451 = vmatmul.mubr.msk.f32.gmra.mrb[98].mxu0 %vm3921_vm6, %v5763_v1 }
0x2285   : > { %7472 = vmatprep.mubr.msk.f32.mxu0 %vm8217_vm0, %v8218_v6 }
0x234f   : > { %v5839_v24 = vpop.f32.mrb[94].mxu0 }
0x2350   : > { %v7446_v7 = vpop.f32.mrb[95].mxu0  ;;  %7456 = vmatmul.mubr.msk.f32.vlgmr.msra.gmra.mrb[90].mxu1 %vm1468_vm2, %v5839_v24 }
0x2351   : > { %7458 = vmatprep.mubr.msk.f32.mxu1 %vm8217_vm0, %v8218_v6  ;;  %7748 = vmatpush3.bf16.msra.mxu1 %v7747_v56 }
0x2352   : > { %7749 = vmatprep.subr.bf16.mxu1 %v8216_v3 }
0x2353   : > { %v5844_v2 = vpop.f32.mrb[96].mxu0 }
0x2354   : > { %v7449_v13 = vpop.f32.mrb[97].mxu0  ;;  %7459 = vmatmul.mubr.msk.f32.gmra.mrb[92].mxu1 %vm1468_vm2, %v5844_v2 }
0x2355   : > { %7461 = vmatprep.mubr.msk.f32.mxu1 %vm8217_vm0, %v8218_v6  ;;  %7751 = vmatpush3.bf16.msra.mxu1 %v7750_v53  ;;  %v6562_v13 = vld [vmem:[%s9568_s1] ss:$0 sm:$0xff]  ;;  %s9573_s1 = sld [smem:[#allocation32_spill]] }
0x2356   : > { %7752 = vmatprep.subr.bf16.mxu1 %v8216_v3 }
0x2357   : > { %v5849_v58 = vpop.f32.mrb[98].mxu0 }
0x2358   : > { %v7452_v8 = vpop.f32.mrb[99].mxu0  ;;  %7462 = vmatmul.mubr.msk.f32.gmra.mrb[94].mxu1 %vm1468_vm2, %v5849_v58 }
0x2359   : > { %7497 = vmatprep.mubr.msk.f32.mxu1 %vm8217_vm0, %v8218_v6  ;;  %7754 = vmatpush3.bf16.msra.mxu1 %v7753_v36  ;;  %v6563_v8 = vld [vmem:[%s9569_s3] ss:$0 sm:$0xff]  ;;  %s9571_s3 = sld [smem:[#allocation30_spill]] }
0x235a   : > { %7755 = vmatprep.subr.bf16.mxu1 %v8216_v3 }
0x235b   : > { %v6573_v53 = vld [vmem:[%s9573_s1] ss:$0 sm:$0xff] }
0x2423   : > { %v5929_v20 = vpop.f32.mrb[90].mxu1 }
0x2424   : > { %v5943_v51 = vadd.f32 %v5929_v20, %v9332_v60  ;;  %v7457_v11 = vpop.f32.mrb[91].mxu1 }
0x2426   : > { %v5953_v15 = vadd.f32 %v6561_v5, %v5943_v51 }
0x2427   : > { %v5934_v21 = vpop.f32.mrb[92].mxu1 }
0x2428   : > { %v5944_v43 = vadd.f32 %v5934_v21, %v9335_v33  ;;  %v7460_v28 = vpop.f32.mrb[93].mxu1  ;;  %v5956_v44 = vadd.f32 %v5953_v15, %v8850_v4 }
0x242a   : > { %v5954_v42 = vadd.f32 %v6561_v5, %v5944_v43  ;;  %v5961_v23 = vsel %vm1215_vm1, %v5956_v44, 0.0 }
0x242b   : > { %5962 = vadd.xlane.f32.xlu1 %v5961_v23  ;;  %v5939_v29 = vpop.f32.mrb[94].mxu1  ;;  %v6128_v23 = vld [vmem:[%s9567_s5 + $0x38] sm:$0xff] }
0x242c   : > { %v5945_v26 = vadd.f32 %v5939_v29, %v9338_v63  ;;  %v7463_v27 = vpop.f32.mrb[95].mxu1  ;;  %v5957_v30 = vadd.f32 %v5954_v42, %v8860_v19  ;;  %v6127_v42 = vld [vmem:[%s9567_s5 + $0x30] sm:$0xff]  ;;  %s6574_s5 = sshll.u32 %s8449_s0, 4  ;;  %s8117_s0 = sshll.u32 %s8222_s9, 4  ;;  %s8118_s0 = int_to_ptr.vmem [resolvable:$false] %s8117_s0 }
0x242d   : > { %v7756_v29 = vpack.c.bf16 %v6128_v23, %v6127_v42  ;;  %s8119_s10 = scalar_lea.vmem %s8118_s0, 32 }
0x242e   : > { %v5955_v10 = vadd.f32 %v6561_v5, %v5945_v26  ;;  %v5964_v60 = vsel %vm1215_vm1, %v5957_v30, 0.0  ;;  %v6564_v26 = vld [vmem:[%s9570_s6] ss:$0 sm:$0xff]  ;;  %s9572_s6 = sld [smem:[#allocation31_spill]] }
0x242f   : > { %5965 = vadd.xlane.f32.xlu1 %v5964_v60  ;;  %7757 = vmatpush3.bf16.msra.mxu1 %v7756_v29 }
0x2430   : > { %v5958_v31 = vadd.f32 %v5955_v10, %v8888_v22 }
0x2432   : > { %v5967_v33 = vsel %vm1215_vm1, %v5958_v31, 0.0 }
0x2433   : > { %5968 = vadd.xlane.f32.xlu1 %v5967_v33 }
0x2434   : > { %v6572_v56 = vld [vmem:[%s9572_s6] ss:$0 sm:$0xff]  ;;  %s9450_s6 = scalar_lea.hbm %s8426_s30, %s6574_s5 }
0x24b8   : > { %v5963_v4 = vpop.xlane.xlu1 %5962 }
0x24b9   : > { %v5970_v32 = vmul.f32 0.03125, %v5963_v4 }
0x24bb   : > { %v5973_v17 = vsub.f32 %v5956_v44, %v5970_v32 }
0x24bc   : > { %v5966_v34 = vpop.xlane.xlu1 %5965 }
0x24bd   : > { %v5971_v18 = vmul.f32 0.03125, %v5966_v34  ;;  %v5976_v63 = vmul.f32 %v5973_v17, %v5973_v17 }
0x24bf   : > { %v5974_v41 = vsub.f32 %v5957_v30, %v5971_v18  ;;  %v5979_v19 = vsel %vm1215_vm1, %v5976_v63, 0.0 }
0x24c0   : > { %5980 = vadd.xlane.f32.xlu1 %v5979_v19  ;;  %v5969_v48 = vpop.xlane.xlu1 %5968 }
0x24c1   : > { %v5972_v50 = vmul.f32 0.03125, %v5969_v48  ;;  %v5977_v22 = vmul.f32 %v5974_v41, %v5974_v41 }
0x24c3   : > { %v5975_v35 = vsub.f32 %v5958_v31, %v5972_v50  ;;  %v5982_v38 = vsel %vm1215_vm1, %v5977_v22, 0.0  ;;  %v6568_v22 = vld [vmem:[%s9571_s3] ss:$0 sm:$0xff]  ;;  %s1186_s3 = sand.u32 1, %s8167_s23  }
0x24c4   : > { %5983 = vadd.xlane.f32.xlu1 %v5982_v38  ;;  %s1187_s7 = scalar_lea.vmem [#allocation3], %s1186_s3  ;;  %s6295_s1 = scalar_lea.sflag [#allocation4], %s1186_s3 }
0x24c5   : > { %v5978_v39 = vmul.f32 %v5975_v35, %v5975_v35  ;;  %s6307_s8 = sshll.u32 %s1187_s7, 4  ;;  %s9452_s8 = int_to_ptr.vmem [resolvable:$true] %s6307_s8 }
0x24c6   : > { %s8113_s4 = scalar_lea.vmem %s9452_s8, 16  ;;  %p8120_p0 = scmp.lt.s32.totalorder %s9452_s8, %s8118_s0 }
0x24c7   : > { %v5985_v45 = vsel %vm1215_vm1, %v5978_v39, 0.0  ;;  %p8114_p11 = scmp.ne.s32.totalorder %s9452_s8, %s8113_s4  ;;  %p8121_p1 = scmp.lt.s32.totalorder %s8119_s10, %s8113_s4 }
0x24c8   : > { %5986 = vadd.xlane.f32.xlu0 %v5985_v45 }
0x24c9   : > { %p8115_p12 = pnand %p8114_p11, %p8466_p5  ;;  %p8122_p2 = por %p8121_p1, %p8120_p0 }
0x24cb   : > { %p8116_p13 = pneg %p8115_p12 }
0x24cd   : > { %p8123_p3 = pnand %p8122_p2, %p8116_p13 }
0x254d   : > { %v5981_v61 = vpop.xlane.xlu1 %5980 }
0x254e   : > { %v5988_v62 = vmul.f32 0.03125, %v5981_v61 }
0x2550   : > { %v5991_v37 = vadd.f32 1e-05, %v5988_v62 }
0x2551   : > { %v5984_v0 = vpop.xlane.xlu1 %5983 }
0x2552   : > { %8096 = vrsqrt.f32 %v5991_v37  ;;  %v5989_v57 = vmul.f32 0.03125, %v5984_v0  ;;  %v6258_v37 = vld [vmem:[%s8421_s12] sm:$0xff] }
0x2554   : > { %v5992_v54 = vadd.f32 1e-05, %v5989_v57 }
0x2555   : > { %v5987_v1 = vpop.xlane.xlu0 %5986 }
0x2556   : > { %8098 = vrsqrt.f32 %v5992_v54  ;;  %v5990_v24 = vmul.f32 0.03125, %v5987_v1 }
0x2558   : > { %v5993_v7 = vadd.f32 1e-05, %v5990_v24 }
0x255a   : > { %8100 = vrsqrt.f32 %v5993_v7 }
0x255c   : > { %v8097_v2 = vpop.eup %8096 }
0x255d   : > { %v5997_v58 = vmul.f32 %v8097_v2, %v5973_v17 }
0x255f   : > { %v6006_v20 = vmul.f32 %v6562_v13, %v5997_v58 }
0x2560   : > { %v8099_v3 = vpop.eup %8098 }
0x2561   : > { %v6015_v5 = vadd.f32 %v6563_v8, %v6006_v20  ;;  %v5998_v51 = vmul.f32 %v8099_v3, %v5974_v41 }
0x2563   : > { %7473 = vmatmul.mubr.msk.f32.vlgmr.msra.gmra.mrb[100].mxu0 %vm1215_vm1, %v6015_v5  ;;  %v6007_v11 = vmul.f32 %v6562_v13, %v5998_v51 }
0x2564   : > { %v8101_v15 = vpop.eup %8100  ;;  %7475 = vmatprep.mubr.msk.f32.mxu0 %vm8217_vm0, %v8218_v6 }
0x2565   : > { %v6016_v21 = vadd.f32 %v6563_v8, %v6007_v11  ;;  %v5999_v43 = vmul.f32 %v8101_v15, %v5975_v35 }
0x2567   : > { %7476 = vmatmul.mubr.msk.f32.gmra.mrb[102].mxu0 %vm1215_vm1, %v6016_v21  ;;  %v6008_v28 = vmul.f32 %v6562_v13, %v5999_v43 }
0x2568   : > { %7478 = vmatprep.mubr.msk.f32.mxu0 %vm8217_vm0, %v8218_v6 }
0x2569   : > { %v6017_v44 = vadd.f32 %v6563_v8, %v6008_v28 }
0x256b   : > { %7479 = vmatmul.mubr.msk.f32.gmra.mrb[104].mxu0 %vm1215_vm1, %v6017_v44 }
0x2636   : > { %v6104_v27 = vpop.f32.mrb[100].mxu0 }
0x2637   : > { %v6105_v30 = vadd.f32 %v6564_v26, %v6104_v27  ;;  %v7474_v10 = vpop.f32.mrb[101].mxu0 }
0x2639   : > { %v6118_v60 = vmax.f32 %v6105_v30, 0.0 }
0x263a   : > { %v6109_v31 = vpop.f32.mrb[102].mxu0 }
0x263b   : > { %v6110_v33 = vadd.f32 %v6564_v26, %v6109_v31  ;;  %v7477_v4 = vpop.f32.mrb[103].mxu0  ;;  %7498 = vmatmul.mubr.msk.f32.vlgmr.msra.gmra.mrb[96].mxu1 %vm3369_vm5, %v6118_v60 }
0x263c   : > { %7500 = vmatprep.mubr.msk.f32.mxu1 %vm8217_vm0, %v8218_v6 }
0x263d   : > { %v6119_v32 = vmax.f32 %v6110_v33, 0.0 }
0x263e   : > { %v6114_v17 = vpop.f32.mrb[104].mxu0 }
0x263f   : > { %v6115_v34 = vadd.f32 %v6564_v26, %v6114_v17  ;;  %v7480_v18 = vpop.f32.mrb[105].mxu0  ;;  %7501 = vmatmul.mubr.msk.f32.gmra.mrb[98].mxu1 %vm3369_vm5, %v6119_v32 }
0x2640   : > { %7503 = vmatprep.mubr.msk.f32.mxu1 %vm8217_vm0, %v8218_v6 }
0x2641   : > { %v6120_v63 = vmax.f32 %v6115_v34, 0.0 }
0x2643   : > { %7504 = vmatmul.mubr.msk.f32.gmra.mrb[100].mxu1 %vm3369_vm5, %v6120_v63 }
0x270e   : > { %v6211_v41 = vpop.f32.mrb[96].mxu1 }
0x270f   : > { %v7499_v19 = vpop.f32.mrb[97].mxu1 }
0x2712   : > { %v6215_v48 = vpop.f32.mrb[98].mxu1 }
0x2713   : > { %v7502_v50 = vpop.f32.mrb[99].mxu1 }
0x2716   : > { %v6219_v35 = vpop.f32.mrb[100].mxu1 }
0x2717   : > { %v6220_v38 = vadd.f32 %v6568_v22, %v6219_v35  ;;  %v7505_v39 = vpop.f32.mrb[101].mxu1 }
0x2719   : > { %v6223_v45 = vadd.f32 %v6220_v38, %v6017_v44 }
0x271b   : > { %v6226_v46 = vsel %vm1215_vm1, %v6223_v45, 0.0 }
0x271c   : > { %6227 = vadd.xlane.f32.xlu1 %v6226_v46 }
0x27a9   : > { %v6228_v47 = vpop.xlane.xlu1 %6227 }
0x27aa   : > { %v6229_v6 = vmul.f32 0.03125, %v6228_v47 }
0x27ac   : > { %v6230_v49 = vsub.f32 %v6223_v45, %v6229_v6 }
0x27ae   : > { %v6231_v9 = vmul.f32 %v6230_v49, %v6230_v49 }
0x27b0   : > { %v6232_v52 = vsel %vm1215_vm1, %v6231_v9, 0.0 }
0x27b1   : > { %6233 = vadd.xlane.f32.xlu1 %v6232_v52 }
0x283e   : > { %v6234_v12 = vpop.xlane.xlu1 %6233 }
0x283f   : > { %v6235_v14 = vmul.f32 0.03125, %v6234_v12 }
0x2841   : > { %v6236_v40 = vadd.f32 1e-05, %v6235_v14 }
0x2843   : > { %8102 = vrsqrt.f32 %v6236_v40 }
0x284d   : > { %v8103_v55 = vpop.eup %8102 }
0x284e   : > { %v6238_v59 = vmul.f32 %v8103_v55, %v6230_v49 }
0x2850   : > { %v6245_v25 = vmul.f32 %v6572_v56, %v6238_v59 }
0x2852   : > { %v6252_v36 = vadd.f32 %v6573_v53, %v6245_v25 }
0x2854   : > { %v6254_v61 = vmul.f32 %v6253_v16, %v6252_v36 }
0x2856   : > { %v6255_v62 = vsel %vm1215_vm1, %v6254_v61, 0.0 }
0x2857   : > { %6256 = vadd.xlane.f32.xlu1 %v6255_v62 }
0x28e4   : > { %v6257_v0 = vpop.xlane.xlu1 %6256 }
0x28e5   : > { %v6259_v57 = vadd.f32 %v6258_v37, %v6257_v0 }
0x28e7   : > { %6260 = vxpose.xlu1.b32.start.end [1/1] (short) (narrow) %v6259_v57, 8 }
0x2967   : > { %v6276_v54 = vpop.trf.xlu1 }
0x2968   : > { %6293 = vst.msk [vmem:[%s1187_s7] sm:$0x1] %vm6292_vm7, %v6276_v54 }
0x2969   : > { %8126 = shalt.err (!%p8123_p3)
}
0x296a   : > { %s8127_s7 = scalar_lea.hbm %s9450_s6, 16  ;;  %s8131_s9 = scalar_lea.hbm %s8426_s30, 32 }
0x296b   : > { %p8128_p4 = scmp.ne.s32.totalorder %s9450_s6, %s8127_s7  ;;  %p8132_p9 = scmp.lt.u32.totalorder %s9450_s6, %s8426_s30 }
0x296c   : > { %p8133_p10 = scmp.lt.u32.totalorder %s8131_s9, %s8127_s7  ;;  %p8135_p12 = scmp.lt.u32.totalorder %s8127_s7, %s9450_s6 }
0x296d   : > { %p8129_p7 = pnand %p8128_p4, %p8466_p5 }
0x296e   : > { %p8134_p11 = por %p8133_p10, %p8132_p9 }
0x296f   : > { %p8130_p8 = pneg %p8129_p7 }
0x2970   : > { %p8136_p0 = por %p8135_p12, %p8134_p11 }
0x2972   : > { %p8137_p13 = pnand %p8136_p0, %p8130_p8 }
0x2974   : > { %8140 = shalt.err (!%p8137_p13)
}
0x2975   : > { %7758 = dma.vmem_to_hbm [thread:$0]  (%p8466_p5), %s9452_s8, 16, %s9450_s6, %s6295_s1  }
0x2976 PF: > { %p7764_p1 = scmp.ge.s32.totalorder %s8175_s28, 2  ;;  %s6319_s4 = sand.u32 1, %s8163_s22  }
0x2977   : > { %s6320_s10 = scalar_lea.sflag [#allocation4], %s6319_s4 }
0x2978   : > { %p7761_p2 = pnand %p7764_p1, %p8470_p6 }
0x297a   : > { %8158 = dma.done.wait (!%p7761_p2), %s6320_s10, 16  }
0x297b   : > { %8160 = vsyncadd (!%p7761_p2), %s6320_s10, 4294967280  ;;  %p89_p3 = scmp.ge.s32.totalorder %s8453_s2, 4   ;;  %s9575_s22 = smov %s8167_s23 }
0x297c   : > { %s9576_s23 = smov %s8171_s26  ;;  %s9577_s26 = smov %s8464_s11 }
0x297d   : > { %s9578_s28 = smov %s8453_s2  ;;  %91 = sbr.rel (!%p89_p3) target bundleno = 74 (0x4a), region = 253 }
0x2984   :  { %6324 = vsyncpa [#allocation4], 1 }
0x2985   :  { %6326 = vsyncpa [#allocation4 + $0x1], 1 }

</bundles_post_ra>
